<compile_context>
chip_gen: v7x
topology: tpu7x:2x2x1
jax: 0.10.0
libtpu: 0.0.40
codegen_flags: <defaults>
</compile_context>

<pallas_src>
import functools

import jax
import jax.numpy as jnp
from jax import lax
from jax.experimental import pallas as pl
from jax.experimental.pallas import tpu as pltpu


def _pick_tile_l(L, cap=2048):
    """Whole length in one tile when it fits the cap, else the largest
    sublane-aligned divisor of L that does."""
    if L <= cap:
        return L
    for cand in range((cap // 8) * 8, 7, -8):
        if L % cand == 0:
            return cand
    # TODO(synk): no 8-aligned divisor of L below the cap; fall back to one full tile.
    return L


def td_merging_kernel(x_hbm, w_ref, b_ref, g_ref, bt_ref, o_ref,
                      xcore, xhalo, sem, *, tile_l, seq_len, n_tiles):
    # x_hbm : (B, L, C_in)   raw HBM ref (manual DMA), compute dtype, UNPADDED
    # w_ref : (3, C_in, E)   VMEM, pre-transposed conv weight, compute dtype
    # b_ref : (1, E) f32 conv bias; g_ref / bt_ref : (1, E) f32 LN gamma / beta
    # o_ref : (1, tile_l, E) output block
    # xcore : (2, tile_l, C_in)  double-buffered tile rows
    # xhalo : (2, 2, 2, C_in)    double-buffered 2-row halos: (slot, {left,right}, row, C)
    # sem   : (2, 3) DMA semaphores: (slot, {core, left, right})
    b = pl.program_id(0)
    t = pl.program_id(1)
    slot = t % 2
    c_in = xcore.shape[-1]

    def core_copy(tile, s):
        start = pl.multiple_of(tile * tile_l, tile_l)
        return pltpu.make_async_copy(
            x_hbm.at[b, pl.ds(start, tile_l), :], xcore.at[s], sem.at[s, 0])

    def left_copy(tile, s):
        return pltpu.make_async_copy(
            x_hbm.at[b, pl.ds(tile * tile_l - 2, 2), :], xhalo.at[s, 0], sem.at[s, 1])

    def right_copy(tile, s):
        return pltpu.make_async_copy(
            x_hbm.at[b, pl.ds(tile * tile_l + tile_l, 2), :], xhalo.at[s, 1], sem.at[s, 2])

    def start_window(tile, s):
        core_copy(tile, s).start()
        if n_tiles > 1:
            @pl.when(tile > 0)
            def _():
                left_copy(tile, s).start()

            @pl.when(tile < n_tiles - 1)
            def _():
                right_copy(tile, s).start()

    def wait_window(tile, s):
        core_copy(tile, s).wait()
        if n_tiles > 1:
            @pl.when(tile > 0)
            def _():
                left_copy(tile, s).wait()

            @pl.when(tile < n_tiles - 1)
            def _():
                right_copy(tile, s).wait()

    # Prime this batch row's first window.  Priming at every t==0 (not just the
    # global first step) keeps the chain correct when the batch axis is split
    # across TensorCores; for the same reason there is no cross-row prefetch --
    # a DMA started on one core must be waited on the same core.
    @pl.when(t == 0)
    def _():
        start_window(t, slot)

    # Prefetch the next window BEFORE waiting on the current one so that, if the
    # current DMA is exposed, the next one is already in flight during the stall.
    if n_tiles > 1:
        @pl.when(t + 1 < n_tiles)
        def _():
            start_window(t + 1, 1 - slot)

    wait_window(t, slot)

    # Halo rows outside [0, L) were never DMA'd: row -1 / row L must read as zero
    # (conv zero padding); rows -2 / L+1 only feed pool rows that get -inf masked.
    if n_tiles > 1:
        @pl.when(t == 0)
        def _():
            xhalo[slot, 0] = jnp.zeros((2, c_in), dtype=xhalo.dtype)

        @pl.when(t == n_tiles - 1)
        def _():
            xhalo[slot, 1] = jnp.zeros((2, c_in), dtype=xhalo.dtype)

        left = xhalo[slot, 0]
        right = xhalo[slot, 1]
    else:
        left = jnp.zeros((2, c_in), dtype=xcore.dtype)
        right = jnp.zeros((2, c_in), dtype=xcore.dtype)

    xp = jnp.concatenate([left, xcore[slot], right], axis=0)   # (tile_l + 4, C_in)
    w = w_ref[...]                                             # (3, C_in, E)

    # --- Conv1d(k=3, stride=1, pad=1): y[i] is the conv output at global position
    # t*tile_l - 1 + i, i in [0, tile_l + 2).  Three lane-dense MXU matmuls with f32
    # accumulation; the first dot defines the accumulator.
    y = jnp.dot(xp[0:tile_l + 2, :], w[0], preferred_element_type=jnp.float32)
    y = y + jnp.dot(xp[1:tile_l + 3, :], w[1], preferred_element_type=jnp.float32)
    y = y + jnp.dot(xp[2:tile_l + 4, :], w[2], preferred_element_type=jnp.float32)
    y = y + b_ref[...]                    # (1, E) lane-vector broadcast, f32

    # --- MaxPool1d(k=3, stride=1, pad=1): positions outside [0, L) act as -inf ---
    pos = t * tile_l - 1 + lax.broadcasted_iota(jnp.int32, (tile_l + 2, 1), 0)
    y = jnp.where((pos >= 0) & (pos < seq_len), y, -jnp.inf)
    m = jnp.maximum(jnp.maximum(y[0:tile_l, :], y[1:tile_l + 1, :]),
                    y[2:tile_l + 2, :])   # (tile_l, E)

    # --- LayerNorm over the embed (lane) axis: one pass produces both moments ---
    inv_e = 1.0 / m.shape[-1]
    s1 = jnp.sum(m, axis=-1, keepdims=True)
    s2 = jnp.sum(m * m, axis=-1, keepdims=True)
    mu = s1 * inv_e
    var = jnp.maximum(s2 * inv_e - mu * mu, 0.0)
    out = (m - mu) * lax.rsqrt(var + 1e-5)
    out = out * g_ref[...] + bt_ref[...]
    o_ref[0] = out.astype(o_ref.dtype)


def td_merging_block(x, w, b, gamma, beta, *, compute_dtype=jnp.bfloat16,
                     out_dtype=jnp.float32, tile_l=None):
    """x: (B, C_in, L), w: (E, C_in, 3), b/gamma/beta: (E,) -> (B, L, E) out_dtype."""
    B, C_in, L = x.shape
    E = w.shape[0]
    tl = tile_l if tile_l is not None else _pick_tile_l(L)
    assert L % tl == 0, "length tile must divide L"
    assert tl == L or tl % 8 == 0, "partial length tiles must be sublane-aligned"
    n_t = L // tl

    # Wrapper glue (one-time layout plumbing in XLA): NCL -> NLC so the embed dim sits
    # on the lane axis inside the kernel, plus the compute-dtype cast.  No halo-padding
    # pass any more -- the halo is DMA'd / zero-filled inside the kernel.
    # TODO(synk): in a full model the producer should emit length-major bf16
    # activations directly so this transpose/cast costs no extra HBM round-trip.
    x_lm = jnp.transpose(x, (0, 2, 1)).astype(compute_dtype)          # (B, L, C_in)
    w_t = jnp.transpose(w, (2, 1, 0)).astype(compute_dtype)           # (3, C_in, E)
    b2 = b.reshape(1, E).astype(jnp.float32)
    g2 = gamma.reshape(1, E).astype(jnp.float32)
    bt2 = beta.reshape(1, E).astype(jnp.float32)

    kernel = functools.partial(td_merging_kernel, tile_l=tl, seq_len=L, n_tiles=n_t)

    grid_spec = pltpu.PrefetchScalarGridSpec(
        num_scalar_prefetch=0,
        grid=(B, n_t),
        in_specs=[
            pl.BlockSpec(memory_space=pl.ANY),                      # x stays in HBM
            pl.BlockSpec((3, C_in, E), lambda bi, ti: (0, 0, 0)),   # conv weight
            pl.BlockSpec((1, E), lambda bi, ti: (0, 0)),            # conv bias
            pl.BlockSpec((1, E), lambda bi, ti: (0, 0)),            # LN gamma
            pl.BlockSpec((1, E), lambda bi, ti: (0, 0)),            # LN beta
        ],
        out_specs=pl.BlockSpec((1, tl, E), lambda bi, ti: (bi, ti, 0)),
        scratch_shapes=[
            pltpu.VMEM((2, tl, C_in), compute_dtype),      # tile rows, double buffered
            pltpu.VMEM((2, 2, 2, C_in), compute_dtype),    # 2-row halos (slot, side)
            pltpu.SemaphoreType.DMA((2, 3)),               # (slot, {core,left,right})
        ],
    )

    # Rough VMEM footprint (manual buffers + double-buffered pipeline blocks) so the
    # scoped-VMEM limit never blocks larger tiles; clamped to v7x's 64 MiB physical.
    csz = jnp.dtype(compute_dtype).itemsize
    osz = jnp.dtype(out_dtype).itemsize
    est = (2 * tl * C_in * csz + 2 * 4 * C_in * csz       # manual input buffers
           + 2 * 3 * C_in * E * csz                       # weight block
           + 2 * tl * E * osz                             # output block
           + 6 * E * 4)                                   # bias / gamma / beta
    vmem_limit = int(min(max(2 * est, 32 * 1024 * 1024), 64 * 1024 * 1024))

    return pl.pallas_call(
        kernel,
        out_shape=jax.ShapeDtypeStruct((B, L, E), out_dtype),
        grid_spec=grid_spec,
        compiler_params=pltpu.CompilerParams(
            dimension_semantics=("parallel", "arbitrary"),
            vmem_limit_bytes=vmem_limit),
    )(x_lm, w_t, b2, g2, bt2)


def td_merging_reference(x, w, b, gamma, beta):
    """Pure-JAX reference of the PyTorch forward (f32, high precision)."""
    y = lax.conv_general_dilated(
        x, w, window_strides=(1,), padding=[(1, 1)],
        dimension_numbers=('NCH', 'OIH', 'NCH'),
        precision=lax.Precision.HIGHEST)
    y = y + b[None, :, None]
    m = lax.reduce_window(y, -jnp.inf, lax.max,
                          window_dimensions=(1, 1, 3),
                          window_strides=(1, 1, 1),
                          padding=[(0, 0), (0, 0), (1, 1)])
    mt = jnp.transpose(m, (0, 2, 1))
    mu = jnp.mean(mt, axis=-1, keepdims=True)
    var = jnp.mean((mt - mu) ** 2, axis=-1, keepdims=True)
    return (mt - mu) * lax.rsqrt(var + 1e-5) * gamma + beta


if __name__ == "__main__":
    # Small shapes consistent with the module (in_chans -> embed_dim over length).
    # L=384 exercises the single-tile fast path by default and a forced 3-tile run
    # exercises the halo DMAs / prefetch chain / edge zero-fill.
    B, C_IN, E, L, K = 2, 128, 128, 384, 3

    key = jax.random.PRNGKey(0)
    kx, kw, kb, kg, kbt = jax.random.split(key, 5)

    x = jax.random.normal(kx, (B, C_IN, L), dtype=jnp.float32)

    # Conv init mirroring _init_weights (N(0, sqrt(2/fan_out)), fan_out = K*E);
    # small non-trivial bias/gamma/beta so those code paths are actually verified.
    fan_out = K * E
    w = jax.random.normal(kw, (E, C_IN, K), dtype=jnp.float32) * jnp.sqrt(2.0 / fan_out)
    b = 0.1 * jax.random.normal(kb, (E,), dtype=jnp.float32)
    gamma = 1.0 + 0.1 * jax.random.normal(kg, (E,), dtype=jnp.float32)
    beta = 0.1 * jax.random.normal(kbt, (E,), dtype=jnp.float32)

    ref = jax.block_until_ready(td_merging_reference(x, w, b, gamma, beta))

    # f32 matmul path, default (single full-length) tile: tight structural check.
    out_f32 = jax.block_until_ready(
        td_merging_block(x, w, b, gamma, beta,
                         compute_dtype=jnp.float32, out_dtype=jnp.float32))
    assert out_f32.shape == (B, L, E)
    assert jnp.allclose(out_f32, ref, rtol=2e-3, atol=2e-3), "f32 kernel mismatch"

    # f32 matmul path, forced 3-tile split: exercises halo DMAs / prefetch / zero-fill.
    out_tiled = jax.block_until_ready(
        td_merging_block(x, w, b, gamma, beta, compute_dtype=jnp.float32,
                         out_dtype=jnp.float32, tile_l=128))
    assert jnp.allclose(out_tiled, ref, rtol=2e-3, atol=2e-3), "tiled kernel mismatch"

    # bf16 matmuls + bf16 output (recommended when the consumer is bf16): loose check.
    out_bf16 = jax.block_until_ready(
        td_merging_block(x, w, b, gamma, beta,
                         compute_dtype=jnp.bfloat16, out_dtype=jnp.bfloat16))
    assert out_bf16.shape == (B, L, E) and out_bf16.dtype == jnp.bfloat16
    assert jnp.allclose(out_bf16.astype(jnp.float32), ref,
                        rtol=1e-1, atol=1e-1), "bf16 kernel mismatch"

    print("KERNEL_OK")
</pallas_src>

<mosaic_0001>
module attributes {stable_mosaic.version = 11 : i64} {
  func.func @td_merging_kernel(%arg0: i32, %arg1: i32, %arg2: memref<2x384x128xf32, #tpu.memory_space<any>>, %arg3: memref<3x128x128xf32, #tpu.memory_space<vmem>>, %arg4: memref<1x128xf32, #tpu.memory_space<vmem>>, %arg5: memref<1x128xf32, #tpu.memory_space<vmem>>, %arg6: memref<1x128xf32, #tpu.memory_space<vmem>>, %arg7: memref<1x384x128xf32, #tpu.memory_space<vmem>>, %arg8: memref<2x384x128xf32, #tpu.memory_space<vmem>>, %arg9: memref<2x2x2x128xf32, #tpu.memory_space<vmem>>, %arg10: memref<2x3x!tpu.dma_semaphore, #tpu.memory_space<semaphore_mem>>) attributes {dimension_semantics = [#tpu.dimension_semantics<parallel>, #tpu.dimension_semantics<arbitrary>], iteration_bounds = array<i64: 2, 1>, scalar_prefetch = 0 : i64, scratch_operands = 3 : i64, tpu.core_type = #tpu.core_type<tc>, window_params = [{}, {pipeline_mode = #tpu.pipeline_mode<synchronous>, transform_indices = @transform_1, window_bounds = array<i64: 3, 128, 128>}, {pipeline_mode = #tpu.pipeline_mode<synchronous>, transform_indices = @transform_2, window_bounds = array<i64: 1, 128>}, {pipeline_mode = #tpu.pipeline_mode<synchronous>, transform_indices = @transform_3, window_bounds = array<i64: 1, 128>}, {pipeline_mode = #tpu.pipeline_mode<synchronous>, transform_indices = @transform_4, window_bounds = array<i64: 1, 128>}, {transform_indices = @transform_5, window_bounds = array<i64: 1, 384, 128>}]} {
    %c2_i32 = arith.constant 2 : i32
    %c0_i32 = arith.constant 0 : i32
    %0 = arith.cmpi eq, %c2_i32, %c0_i32 : i32
    %c1_i32 = arith.constant 1 : i32
    %1 = arith.select %0, %c1_i32, %c2_i32 : i32
    %2 = arith.remsi %arg1, %1 : i32
    %c0_i32_0 = arith.constant 0 : i32
    %3 = arith.cmpi ne, %2, %c0_i32_0 : i32
    %c0_i32_1 = arith.constant 0 : i32
    %4 = arith.cmpi slt, %2, %c0_i32_1 : i32
    %c0_i32_2 = arith.constant 0 : i32
    %5 = arith.cmpi slt, %1, %c0_i32_2 : i32
    %6 = arith.xori %4, %5 : i1
    %7 = arith.andi %6, %3 : i1
    %8 = arith.addi %2, %1 : i32
    %9 = arith.select %7, %8, %2 : i32
    %c0_i32_3 = arith.constant 0 : i32
    %10 = arith.cmpi eq, %arg1, %c0_i32_3 : i32
    %11 = arith.extui %10 : i1 to i32
    %c0_i32_4 = arith.constant 0 : i32
    %12 = arith.cmpi ne, %11, %c0_i32_4 : i32
    scf.if %12 {
      %c384_i32_37 = arith.constant 384 : i32
      %93 = arith.muli %arg1, %c384_i32_37 : i32
      %94 = tpu.assume_multiple %93, 384 : i32
      %c0_i32_38 = arith.constant 0 : i32
      %c0_i32_39 = arith.constant 0 : i32
      %95 = tpu.memref_slice %arg2[%arg0, %94, %c0_i32_39] : memref<2x384x128xf32, #tpu.memory_space<any>> -> memref<1x384x128xf32, #tpu.memory_space<any>>
      %96 = tpu.memref_squeeze %95 : memref<1x384x128xf32, #tpu.memory_space<any>> -> memref<384x128xf32, #tpu.memory_space<any>>
      %c0_i32_40 = arith.constant 0 : i32
      %c0_i32_41 = arith.constant 0 : i32
      %97 = tpu.memref_slice %arg8[%9, %c0_i32_40, %c0_i32_41] : memref<2x384x128xf32, #tpu.memory_space<vmem>> -> memref<1x384x128xf32, #tpu.memory_space<vmem>>
      %98 = tpu.memref_squeeze %97 : memref<1x384x128xf32, #tpu.memory_space<vmem>> -> memref<384x128xf32, #tpu.memory_space<vmem>>
      %99 = tpu.memref_slice %arg10[%9, %c0_i32_38] : memref<2x3x!tpu.dma_semaphore, #tpu.memory_space<semaphore_mem>> -> memref<1x1x!tpu.dma_semaphore, #tpu.memory_space<semaphore_mem>>
      %100 = tpu.memref_squeeze %99 : memref<1x1x!tpu.dma_semaphore, #tpu.memory_space<semaphore_mem>> -> memref<!tpu.dma_semaphore, #tpu.memory_space<semaphore_mem>>
      tpu.enqueue_dma source(%96 : memref<384x128xf32, #tpu.memory_space<any>>) target(%98 : memref<384x128xf32, #tpu.memory_space<vmem>>) target_semaphore(%100 : memref<!tpu.dma_semaphore, #tpu.memory_space<semaphore_mem>>)
    } else {
    }
    %c384_i32 = arith.constant 384 : i32
    %13 = arith.muli %arg1, %c384_i32 : i32
    %14 = tpu.assume_multiple %13, 384 : i32
    %c0_i32_5 = arith.constant 0 : i32
    %c0_i32_6 = arith.constant 0 : i32
    %15 = tpu.memref_slice %arg2[%arg0, %14, %c0_i32_6] : memref<2x384x128xf32, #tpu.memory_space<any>> -> memref<1x384x128xf32, #tpu.memory_space<any>>
    %16 = tpu.memref_squeeze %15 : memref<1x384x128xf32, #tpu.memory_space<any>> -> memref<384x128xf32, #tpu.memory_space<any>>
    %c0_i32_7 = arith.constant 0 : i32
    %c0_i32_8 = arith.constant 0 : i32
    %17 = tpu.memref_slice %arg8[%9, %c0_i32_7, %c0_i32_8] : memref<2x384x128xf32, #tpu.memory_space<vmem>> -> memref<1x384x128xf32, #tpu.memory_space<vmem>>
    %18 = tpu.memref_squeeze %17 : memref<1x384x128xf32, #tpu.memory_space<vmem>> -> memref<384x128xf32, #tpu.memory_space<vmem>>
    %19 = tpu.memref_slice %arg10[%9, %c0_i32_5] : memref<2x3x!tpu.dma_semaphore, #tpu.memory_space<semaphore_mem>> -> memref<1x1x!tpu.dma_semaphore, #tpu.memory_space<semaphore_mem>>
    %20 = tpu.memref_squeeze %19 : memref<1x1x!tpu.dma_semaphore, #tpu.memory_space<semaphore_mem>> -> memref<!tpu.dma_semaphore, #tpu.memory_space<semaphore_mem>>
    tpu.wait_dma2 semaphore(%20 : memref<!tpu.dma_semaphore, #tpu.memory_space<semaphore_mem>>) src(%16 : memref<384x128xf32, #tpu.memory_space<any>>) dst(%18 : memref<384x128xf32, #tpu.memory_space<vmem>>)
    %cst = arith.constant 0.000000e+00 : f32
    %21 = vector.broadcast %cst : f32 to vector<2x128xf32>
    %cst_9 = arith.constant 0.000000e+00 : f32
    %22 = vector.broadcast %cst_9 : f32 to vector<2x128xf32>
    %23 = arith.index_cast %9 : i32 to index
    %c0 = arith.constant 0 : index
    %c0_10 = arith.constant 0 : index
    %24 = vector.load %arg8[%23, %c0, %c0_10] : memref<2x384x128xf32, #tpu.memory_space<vmem>>, vector<1x384x128xf32>
    %25 = vector.shape_cast %24 : vector<1x384x128xf32> to vector<384x128xf32>
    %26 = tpu.concatenate %21, %25, %22 in 0 : vector<2x128xf32>, vector<384x128xf32>, vector<2x128xf32> -> vector<388x128xf32>
    %c0_11 = arith.constant 0 : index
    %c0_12 = arith.constant 0 : index
    %c0_13 = arith.constant 0 : index
    %27 = vector.load %arg3[%c0_11, %c0_12, %c0_13] : memref<3x128x128xf32, #tpu.memory_space<vmem>>, vector<3x128x128xf32>
    %28 = vector.extract_strided_slice %26 {offsets = [0, 0], sizes = [386, 128], strides = [1, 1]} : vector<388x128xf32> to vector<386x128xf32>
    %29 = vector.extract_strided_slice %27 {offsets = [0, 0, 0], sizes = [1, 128, 128], strides = [1, 1, 1]} : vector<3x128x128xf32> to vector<1x128x128xf32>
    %30 = vector.shape_cast %29 : vector<1x128x128xf32> to vector<128x128xf32>
    %cst_14 = arith.constant dense<0.000000e+00> : vector<386x128xf32>
    %31 = tpu.matmul %28, %30, %cst_14 {dimension_numbers = #tpu.dot_dimension_numbers<[1], [0], [0], [1], [0, 0, 1, 1], [], []>} : vector<386x128xf32>, vector<128x128xf32>, vector<386x128xf32> -> vector<386x128xf32>
    %32 = vector.extract_strided_slice %26 {offsets = [1, 0], sizes = [386, 128], strides = [1, 1]} : vector<388x128xf32> to vector<386x128xf32>
    %33 = vector.extract_strided_slice %27 {offsets = [1, 0, 0], sizes = [1, 128, 128], strides = [1, 1, 1]} : vector<3x128x128xf32> to vector<1x128x128xf32>
    %34 = vector.shape_cast %33 : vector<1x128x128xf32> to vector<128x128xf32>
    %cst_15 = arith.constant dense<0.000000e+00> : vector<386x128xf32>
    %35 = tpu.matmul %32, %34, %cst_15 {dimension_numbers = #tpu.dot_dimension_numbers<[1], [0], [0], [1], [0, 0, 1, 1], [], []>} : vector<386x128xf32>, vector<128x128xf32>, vector<386x128xf32> -> vector<386x128xf32>
    %36 = arith.addf %31, %35 : vector<386x128xf32>
    %37 = vector.extract_strided_slice %26 {offsets = [2, 0], sizes = [386, 128], strides = [1, 1]} : vector<388x128xf32> to vector<386x128xf32>
    %38 = vector.extract_strided_slice %27 {offsets = [2, 0, 0], sizes = [1, 128, 128], strides = [1, 1, 1]} : vector<3x128x128xf32> to vector<1x128x128xf32>
    %39 = vector.shape_cast %38 : vector<1x128x128xf32> to vector<128x128xf32>
    %cst_16 = arith.constant dense<0.000000e+00> : vector<386x128xf32>
    %40 = tpu.matmul %37, %39, %cst_16 {dimension_numbers = #tpu.dot_dimension_numbers<[1], [0], [0], [1], [0, 0, 1, 1], [], []>} : vector<386x128xf32>, vector<128x128xf32>, vector<386x128xf32> -> vector<386x128xf32>
    %41 = arith.addf %36, %40 : vector<386x128xf32>
    %c0_17 = arith.constant 0 : index
    %c0_18 = arith.constant 0 : index
    %42 = vector.load %arg4[%c0_17, %c0_18] : memref<1x128xf32, #tpu.memory_space<vmem>>, vector<1x128xf32>
    %43 = vector.broadcast %42 : vector<1x128xf32> to vector<386x128xf32>
    %44 = arith.addf %41, %43 : vector<386x128xf32>
    %c384_i32_19 = arith.constant 384 : i32
    %45 = arith.muli %arg1, %c384_i32_19 : i32
    %c1_i32_20 = arith.constant 1 : i32
    %46 = arith.subi %45, %c1_i32_20 : i32
    %47 = tpu.iota {dimensions = array<i32: 0>} : vector<386x1xi32>
    %48 = vector.broadcast %46 : i32 to vector<386x1xi32>
    %49 = arith.addi %48, %47 : vector<386x1xi32>
    %c0_i32_21 = arith.constant 0 : i32
    %50 = vector.broadcast %c0_i32_21 : i32 to vector<386x1xi32>
    %51 = arith.cmpi sge, %49, %50 : vector<386x1xi32>
    %c384_i32_22 = arith.constant 384 : i32
    %52 = vector.broadcast %c384_i32_22 : i32 to vector<386x1xi32>
    %53 = arith.cmpi slt, %49, %52 : vector<386x1xi32>
    %54 = arith.andi %51, %53 : vector<386x1xi1>
    %cst_23 = arith.constant 0xFF800000 : f32
    %55 = vector.shape_cast %54 : vector<386x1xi1> to vector<386x1xi1>
    %56 = vector.broadcast %55 : vector<386x1xi1> to vector<386x128xi1>
    %57 = vector.broadcast %cst_23 : f32 to vector<386x128xf32>
    %58 = arith.select %56, %44, %57 : vector<386x128xi1>, vector<386x128xf32>
    %59 = vector.extract_strided_slice %58 {offsets = [0, 0], sizes = [384, 128], strides = [1, 1]} : vector<386x128xf32> to vector<384x128xf32>
    %60 = vector.extract_strided_slice %58 {offsets = [1, 0], sizes = [384, 128], strides = [1, 1]} : vector<386x128xf32> to vector<384x128xf32>
    %61 = arith.maximumf %59, %60 : vector<384x128xf32>
    %62 = vector.extract_strided_slice %58 {offsets = [2, 0], sizes = [384, 128], strides = [1, 1]} : vector<386x128xf32> to vector<384x128xf32>
    %63 = arith.maximumf %61, %62 : vector<384x128xf32>
    %cst_24 = arith.constant dense<0.000000e+00> : vector<384xf32>
    %64 = vector.multi_reduction <add>, %63, %cst_24 [1] : vector<384x128xf32> to vector<384xf32>
    %65 = vector.shape_cast %64 : vector<384xf32> to vector<384x1xf32>
    %66 = arith.mulf %63, %63 : vector<384x128xf32>
    %cst_25 = arith.constant dense<0.000000e+00> : vector<384xf32>
    %67 = vector.multi_reduction <add>, %66, %cst_25 [1] : vector<384x128xf32> to vector<384xf32>
    %68 = vector.shape_cast %67 : vector<384xf32> to vector<384x1xf32>
    %cst_26 = arith.constant 7.812500e-03 : f32
    %69 = vector.broadcast %cst_26 : f32 to vector<384x1xf32>
    %70 = arith.mulf %65, %69 : vector<384x1xf32>
    %cst_27 = arith.constant 7.812500e-03 : f32
    %71 = vector.broadcast %cst_27 : f32 to vector<384x1xf32>
    %72 = arith.mulf %68, %71 : vector<384x1xf32>
    %73 = arith.mulf %70, %70 : vector<384x1xf32>
    %74 = arith.subf %72, %73 : vector<384x1xf32>
    %cst_28 = arith.constant 0.000000e+00 : f32
    %75 = vector.broadcast %cst_28 : f32 to vector<384x1xf32>
    %76 = arith.maximumf %74, %75 : vector<384x1xf32>
    %77 = vector.broadcast %70 : vector<384x1xf32> to vector<384x128xf32>
    %78 = arith.subf %63, %77 : vector<384x128xf32>
    %cst_29 = arith.constant 9.99999974E-6 : f32
    %79 = vector.broadcast %cst_29 : f32 to vector<384x1xf32>
    %80 = arith.addf %76, %79 : vector<384x1xf32>
    %81 = math.rsqrt %80 : vector<384x1xf32>
    %82 = vector.broadcast %81 : vector<384x1xf32> to vector<384x128xf32>
    %83 = arith.mulf %78, %82 : vector<384x128xf32>
    %c0_30 = arith.constant 0 : index
    %c0_31 = arith.constant 0 : index
    %84 = vector.load %arg5[%c0_30, %c0_31] : memref<1x128xf32, #tpu.memory_space<vmem>>, vector<1x128xf32>
    %85 = vector.broadcast %84 : vector<1x128xf32> to vector<384x128xf32>
    %86 = arith.mulf %83, %85 : vector<384x128xf32>
    %c0_32 = arith.constant 0 : index
    %c0_33 = arith.constant 0 : index
    %87 = vector.load %arg6[%c0_32, %c0_33] : memref<1x128xf32, #tpu.memory_space<vmem>>, vector<1x128xf32>
    %88 = vector.broadcast %87 : vector<1x128xf32> to vector<384x128xf32>
    %89 = arith.addf %86, %88 : vector<384x128xf32>
    %c0_34 = arith.constant 0 : index
    %c0_35 = arith.constant 0 : index
    %c0_36 = arith.constant 0 : index
    %90 = vector.load %arg7[%c0_34, %c0_35, %c0_36] : memref<1x384x128xf32, #tpu.memory_space<vmem>>, vector<1x384x128xf32>
    %91 = vector.shape_cast %90 : vector<1x384x128xf32> to vector<384x128xf32>
    %92 = vector.shape_cast %89 : vector<384x128xf32> to vector<1x384x128xf32>
    tpu.vector_store %arg7[%c0_34, %c0_35, %c0_36], %92 {strides = array<i32>} : memref<1x384x128xf32, #tpu.memory_space<vmem>>, vector<1x384x128xf32>,
    return
  }
  func.func @transform_1(%arg0: i32, %arg1: i32) -> (i32, i32, i32) {
    %c0_i32 = arith.constant 0 : i32
    %c0_i32_0 = arith.constant 0 : i32
    %c0_i32_1 = arith.constant 0 : i32
    %c0_i32_2 = arith.constant 0 : i32
    return %c0_i32, %c0_i32_0, %c0_i32_1 : i32, i32, i32
  }
  func.func @transform_2(%arg0: i32, %arg1: i32) -> (i32, i32) {
    %c0_i32 = arith.constant 0 : i32
    %c0_i32_0 = arith.constant 0 : i32
    %c0_i32_1 = arith.constant 0 : i32
    return %c0_i32, %c0_i32_0 : i32, i32
  }
  func.func @transform_3(%arg0: i32, %arg1: i32) -> (i32, i32) {
    %c0_i32 = arith.constant 0 : i32
    %c0_i32_0 = arith.constant 0 : i32
    %c0_i32_1 = arith.constant 0 : i32
    return %c0_i32, %c0_i32_0 : i32, i32
  }
  func.func @transform_4(%arg0: i32, %arg1: i32) -> (i32, i32) {
    %c0_i32 = arith.constant 0 : i32
    %c0_i32_0 = arith.constant 0 : i32
    %c0_i32_1 = arith.constant 0 : i32
    return %c0_i32, %c0_i32_0 : i32, i32
  }
  func.func @transform_5(%arg0: i32, %arg1: i32) -> (i32, i32, i32) {
    %c0_i32 = arith.constant 0 : i32
    %c0_i32_0 = arith.constant 0 : i32
    return %arg0, %arg1, %c0_i32 : i32, i32, i32
  }
}

</mosaic_0001>

<bundles_post_ra>
// kernel: tpu_custom_call.1
= control target key start
LH: loop header
LB: loop body
LE: loop exit
PB: predicated region body
PF: predicated region fallthrough
CT: control target
= control target key end

     0   :  { %10 = vsyncpa [#allocation6], 0  ;;  %s6880_s0 = inlined_call_operand.hbm [shape: f32[2,384,128], index: 0, kind: input, shape index: {}]   ;;  %s6881_s1 = inlined_call_operand.hbm [shape: f32[3,128,128], index: 1, kind: input, shape index: {}]   ;;  %s6882_s2 = inlined_call_operand.vmem [shape: f32[1,128], index: 2, kind: input, shape index: {}]   ;;  %s6883_s3 = inlined_call_operand.vmem [shape: f32[1,128], index: 3, kind: input, shape index: {}]   ;;  %s6884_s4 = inlined_call_operand.vmem [shape: f32[1,128], index: 4, kind: input, shape index: {}]   ;;  %s6885_s5 = inlined_call_operand.hbm [shape: f32[2,384,128], index: 5, kind: output, shape index: {}]  }
   0x1   :  { %11 = vsyncpa [#allocation7], 0 }
   0x2   :  { %13 = vsyncpa [#allocation7 + $0x1], 0  ;;  %s4872_s18 = smov 0   ;;  %s4874_s19 = smov 0  }
   0x3   :  { %s4876_s20 = smov 0   ;;  %s4878_s21 = smov 0  }
   0x4   :  { %s4880_s22 = smov 0   ;;  %s4882_s23 = smov 0  }
   0x5 LB: > { %s3676_s24 = sadd.s32 4294967295, %s4830_s23   ;;  %s3677_s25 = sadd.s32 4294967294, %s4830_s23   ;;  %s4830_s23 = sphi %s4882_s23, %s19_s23   ;;  %s4826_s22 = sphi %s4880_s22, %s6993_s22   ;;  %s4822_s21 = sphi %s4878_s21, %s6992_s21   ;;  %s4818_s20 = sphi %s4876_s20, %s6991_s20   ;;  %s4814_s19 = sphi %s4874_s19, %s6990_s19   ;;  %s4810_s18 = sphi %s4872_s18, %s6989_s18  }
   0x6   : > { %s31_s26 = sadd.s32 1, %s4826_s22  ;;  %s124_s27 = sadd.s32 1, %s4818_s20 }
   0x7   : > { %p33_p0 = scmp.ge.s32.totalorder %s31_s26, 2  ;;  %p134_p1 = scmp.ne.s32.totalorder %s4818_s20, %s4814_s19 }
   0x8   : > { %p135_p2 = scmp.eq.s32.totalorder %s3676_s24, 1  ;;  %p140_p3 = scmp.ne.s32.totalorder %s4814_s19, %s4810_s18 }
   0x9   : > { %s6995_s26 = smov (%p33_p0, %s31_s26), 0  ;;  %p141_p5 = scmp.eq.s32.totalorder %s3677_s25, 1 }
   0xa   : > { %p4912_p4 = por %p135_p2, %p134_p1  ;;  %s119_s29 = ssub.s32 %s4826_s22, %s6995_s26 }
   0xb   : > { %p3678_p6 = scmp.ge.s32.totalorder %s4830_s23, 1  ;;  %p122_p7 = scmp.eq.s32.totalorder %s119_s29, 0 }
   0xc   : > { %s6911_s28 = scalar_select %p4912_p4, 1, 0 }
   0xd   : > { %p4919_p8 = por %p141_p5, %p140_p3  ;;  %p148_p9 = scmp.lt.s32.totalorder %s4830_s23, 3 }
   0xe   : > { %s4925_s6 = scalar_select %p122_p7, %s4818_s20, %s124_s27  }
   0xf   : > { %s6912_s30 = scalar_select %p4919_p8, 1, 0 }
  0x10   : > { %p4927_p10 = pnand %p3678_p6, %p148_p9  ;;  %p4931_p11 = scmp.eq.s32.totalorder %s3676_s24, 0 }
  0x11   : > { %s4832_s9 = smov [#allocation5]   ;;  %s4694_s14 = scalar_lea.hbm %s6881_s1, 6144 }
  0x12   : > { %s6913_s7 = scalar_select %p4927_p10, 1, 0 }
  0x13   : > { %s6914_s8 = scalar_select %p4931_p11, 1, 0 }
  0x14   : > { %p4527_p12 = pneg %p4927_p10  ;;  %s160_s10 = sshll.u32 %s4832_s9, 4  ;;  %s161_s10 = int_to_ptr.vmem [resolvable:$true] %s160_s10 }
  0x15   : > { %p4695_p0 = scmp.ne.s32.totalorder %s6881_s1, %s4694_s14  ;;  %p4701_p5 = scmp.lt.u32.totalorder %s4694_s14, %s6881_s1 }
  0x16   : > { %p4939_p13 = pnand %p4931_p11, %p4527_p12 }
  0x18   : > { %p4696_p1 = pneg %p4939_p13 }
  0x1a   : > { %p4697_p2 = pnand %p4696_p1, %p4695_p0 }
  0x1c   : > { %p4698_p3 = pneg %p4697_p2 }
  0x1e   : > { %p4703_p6 = pnand %p4701_p5, %p4698_p3 }
  0x20   : > { %4706 = shalt.err (!%p4703_p6)
}
  0x21   : > { %s4707_s25 = scalar_lea.vmem %s161_s10, 6144  ;;  %p4715_p8 = scmp.lt.s32.totalorder %s161_s10, %s161_s10 }
  0x22   : > { %p4708_p7 = scmp.ne.s32.totalorder %s161_s10, %s4707_s25  ;;  %p4716_p4 = scmp.lt.s32.totalorder %s4707_s25, %s4707_s25 }
  0x24   : > { %p4710_p9 = pnand %p4708_p7, %p4696_p1  ;;  %p4717_p11 = por %p4716_p4, %p4715_p8 }
  0x26   : > { %p4711_p12 = pneg %p4710_p9 }
  0x28   : > { %p4718_p10 = pnand %p4717_p11, %p4711_p12 }
  0x2a   : > { %4721 = shalt.err (!%p4718_p10)
}
  0x2b   : > { %s4833_s27 = smov 128   ;;  %s4834_s29 = smov 8  }
  0x2c   : > { %4530 = dma.hbm_to_vmem [thread:$0]  (!%p4939_p13), %s6881_s1, 6144, %s161_s10, [#allocation6], %s4833_s27, %s4833_s27, %s4834_s29  }
  0x2d   : > { %p6916_p0 = scmp.ne.s32.totalorder %s6913_s7, 0 }
  0x2f   : > { %185 = sbr.rel (%p6916_p0) target bundleno = 835 (0x343), region = 36 }
  0x36   : > { %p6917_p2 = scmp.ne.s32.totalorder %s6914_s8, 0 }
  0x38   : > { %4799 = dma.done.wait (%p6917_p2), [#allocation6], 6144  }
  0x39   : > { %4801 = vsyncadd (%p6917_p2), [#allocation6], 4294961152  ;;  %s203_s13 = sand.u32 1, %s4814_s19   ;;  %s3698_s14 = smul.u32 6144, %s4822_s21 }
  0x3a   : > { %s4519_s11 = smul.u32 384, %s203_s13  ;;  %s4835_s16 = smov [#allocation2]  }
  0x3b   : > { %s227_s7 = scalar_lea.hbm %s6880_s0, %s3698_s14  ;;  %s239_s17 = sshll.u32 %s4835_s16, 4  ;;  %s240_s17 = int_to_ptr.vmem [resolvable:$true] %s239_s17 }
  0x3c   : > { %s4722_s24 = scalar_lea.hbm %s227_s7, 6144  ;;  %s4724_s27 = scalar_lea.hbm %s6880_s0, 12288 }
  0x3d   : > { %p4723_p4 = scmp.ne.s32.totalorder %s227_s7, %s4722_s24  ;;  %p4725_p8 = scmp.lt.u32.totalorder %s227_s7, %s6880_s0 }
  0x3e   : > { %p4726_p10 = scmp.lt.u32.totalorder %s4724_s27, %s4722_s24  ;;  %p4728_p13 = scmp.lt.u32.totalorder %s4722_s24, %s227_s7 }
  0x40   : > { %p4727_p11 = por %p4726_p10, %p4725_p8 }
  0x42   : > { %p4729_p1 = por %p4728_p13, %p4727_p11 }
  0x44   : > { %p4730_p3 = pnand %p4729_p1, %p4723_p4 }
  0x46   : > { %4733 = shalt.err (!%p4730_p3)  }
  0x47   : > { %s4734_s12 = scalar_lea.vmem %s240_s17, 6144  ;;  %s4738_s15 = scalar_lea.vmem %s240_s17, 12288 }
  0x48   : > { %p4735_p5 = scmp.ne.s32.totalorder %s240_s17, %s4734_s12  ;;  %p4739_p6 = scmp.lt.s32.totalorder %s240_s17, %s240_s17 }
  0x49   : > { %p4740_p7 = scmp.lt.s32.totalorder %s4738_s15, %s4734_s12 }
  0x4b   : > { %p4741_p9 = por %p4740_p7, %p4739_p6 }
  0x4d   : > { %p4742_p12 = pnand %p4741_p9, %p4735_p5 }
  0x4f   : > { %4745 = shalt.err (!%p4742_p12)  }
  0x50   : > { %242 = dma.hbm_to_vmem [thread:$0]  %s227_s7, 6144, %s240_s17, [#allocation4] }
  0x51   : > { %s4980_s10 = scalar_lea.vmem [#allocation8], %s4519_s11 }
  0x52   : > { %4802 = dma.done.wait [#allocation4], 6144 }
  0x53   : > { %4803 = vsyncadd [#allocation4], 4294961152  ;;  %v4836_v0 = vmov 0.0|0.0   ;;  %vm4837_vm0 = vmmov 0   ;;  %v4838_v1 = vmov 0.0   ;;  %v510_v2 = vld [vmem:[#allocation5 + $0x80] sm:$0xff]  ;;  %s6826_s17 = scalar_lea.hbm %s6885_s5, %s3698_s14 }
  0x54   : > { %4431 = vmatprep.subr.bf16.mxu0 %v4836_v0  ;;  %4503 = vmatprep.subr.bf16.mxu1 %v4836_v0  ;;  %v511_v3 = vld [vmem:[#allocation5 + $0x88] sm:$0xff]  ;;  %v512_v4 = vld [vmem:[#allocation5 + $0x90] sm:$0xff]  ;;  %v513_v6 = vld [vmem:[#allocation5 + $0x98] sm:$0xff]  ;;  %vm347_vm1 = vcmask 1041408   ;;  %vm544_vm2 = vcmask 1046528   ;;  %vm1311_vm4 = vcmask 1045504  }
  0x55   : > { %3926 = vmatprep.mubr.msk.f32.mxu0 %vm4837_vm0, %v4838_v1  ;;  %4001 = vmatprep.mubr.msk.f32.mxu1 %vm4837_vm0, %v4838_v1  ;;  %v4432_v5 = vpack.c.bf16 %v511_v3, %v510_v2  ;;  %v4435_v7 = vpack.c.bf16 %v513_v6, %v512_v4  ;;  %v514_v8 = vld [vmem:[#allocation5 + $0xa0] sm:$0xff]  ;;  %v515_v9 = vld [vmem:[#allocation5 + $0xa8] sm:$0xff]  ;;  %v516_v11 = vld [vmem:[#allocation5 + $0xb0] sm:$0xff]  ;;  %s3549_s11 = sshll.u32 %s4980_s10, 4  ;;  %s6834_s24 = scalar_lea.sflag [#allocation7], %s203_s13  ;;  %s6829_s11 = int_to_ptr.vmem [resolvable:$true] %s3549_s11 }
  0x56   : > { %v4438_v10 = vpack.c.bf16 %v515_v9, %v514_v8  ;;  %v517_v12 = vld [vmem:[#allocation5 + $0xb8] sm:$0xff]  ;;  %v518_v14 = vld [vmem:[#allocation5 + $0xc0] sm:$0xff]  ;;  %v519_v15 = vld [vmem:[#allocation5 + $0xc8] sm:$0xff]  ;;  %s4746_s8 = scalar_lea.vmem %s6829_s11, 6144  ;;  %p6987_p2 = scmp.ne.s32.totalorder %s6911_s28, 0 }
  0x57   : > { %4433 = vmatpush3.bf16.msra.mxu0 %v4432_v5  ;;  %4511 = vmatpush3.bf16.msra.mxu1 %v4432_v5  ;;  %v4441_v13 = vpack.c.bf16 %v517_v12, %v516_v11  ;;  %v4444_v16 = vpack.c.bf16 %v519_v15, %v518_v14  ;;  %v520_v17 = vld [vmem:[#allocation5 + $0xd0] sm:$0xff]  ;;  %v521_v18 = vld [vmem:[#allocation5 + $0xd8] sm:$0xff]  ;;  %v251_v19 = vld [vmem:[#allocation2] sm:$0xff]  ;;  %p4747_p0 = scmp.ne.s32.totalorder %s6829_s11, %s4746_s8  ;;  %s4839_s21 = smov [#allocation8]  }
  0x58   : > { %4434 = vmatprep.subr.bf16.mxu0 %v4836_v0  ;;  %4504 = vmatprep.subr.bf16.mxu1 %v4836_v0  ;;  %v252_v20 = vld [vmem:[#allocation2 + $0x8] sm:$0xff]  ;;  %v4996_v21 = vld [vmem:[#allocation2 + $0xc0] sm:$0xff]  ;;  %v277_v23 = vld [vmem:[#allocation2 + $0xd0] sm:$0xff]  ;;  %v4447_v24 = vpack.c.bf16 %v521_v18, %v520_v17  ;;  %v4998_v25 = vrot.slane %v251_v19, 6  ;;  %s4750_s25 = sshll.u32 %s4839_s21, 4  ;;  %s4751_s25 = int_to_ptr.vmem [resolvable:$false] %s4750_s25 }
  0x59   : > { %v276_v22 = vld [vmem:[#allocation2 + $0xc8] sm:$0xff]  ;;  %v349_v26 = vrot.slane %v252_v20, 6  ;;  %v522_v27 = vld [vmem:[#allocation5 + $0xe0] sm:$0xff]  ;;  %v6891_v29 = vrot.slane %v4996_v21, 6  ;;  %v399_v31 = vrot.slane %v277_v23, 6  ;;  %v253_v32 = vld [vmem:[#allocation2 + $0x10] sm:$0xff]  ;;  %p4748_p4 = pnand %p4747_p0, %p6987_p2  ;;  %p4753_p10 = scmp.lt.s32.totalorder %s6829_s11, %s4751_s25 }
  0x5a   : > { %v523_v28 = vld [vmem:[#allocation5 + $0xe8] sm:$0xff]  ;;  %v397_v30 = vrot.slane %v276_v22, 6  ;;  %v278_v33 = vld [vmem:[#allocation2 + $0xd8] sm:$0xff]  ;;  %v524_v35 = vld [vmem:[#allocation5 + $0xf0] sm:$0xff]  ;;  %v5009_v38 = vsel %vm347_vm1, 0.0, %v4998_v25  ;;  %v351_v39 = vrot.slane %v253_v32, 6 }
  0x5b   : > { %4436 = vmatpush3.bf16.msra.mxu0 %v4435_v7  ;;  %4512 = vmatpush3.bf16.msra.mxu1 %v4435_v7  ;;  %v4450_v34 = vpack.c.bf16 %v523_v28, %v522_v27  ;;  %v525_v36 = vld [vmem:[#allocation5 + $0xf8] sm:$0xff]  ;;  %v5005_v37 = vsel %vm347_vm1, %v4998_v25, %v349_v26  ;;  %v401_v42 = vrot.slane %v278_v33, 6  ;;  %v279_v44 = vld [vmem:[#allocation2 + $0xe0] sm:$0xff]  ;;  %v545_v46 = vrot.slane %v5009_v38, 1  ;;  %v527_v51 = vld [vmem:[#allocation5 + $0x108] sm:$0xff]  ;;  %p4749_p8 = pneg %p4748_p4  ;;  %s4752_s14 = scalar_lea.vmem %s4751_s25, 12288 }
  0x5c   : > { %4437 = vmatprep.subr.bf16.mxu0 %v4836_v0  ;;  %4505 = vmatprep.subr.bf16.mxu1 %v4836_v0  ;;  %v5016_v40 = vsel %vm347_vm1, %v6891_v29, %v397_v30  ;;  %v5019_v41 = vsel %vm347_vm1, %v397_v30, %v399_v31  ;;  %v254_v43 = vld [vmem:[#allocation2 + $0x18] sm:$0xff]  ;;  %v4453_v45 = vpack.c.bf16 %v525_v36, %v524_v35  ;;  %v546_v47 = vrot.slane %v5005_v37, 1  ;;  %v526_v50 = vld [vmem:[#allocation5 + $0x100] sm:$0xff]  ;;  %v5033_v57 = vld [vmem:[#allocation2 + $0xe8] sm:$0xff]  ;;  %p4754_p11 = scmp.lt.s32.totalorder %s4752_s14, %s4746_s8 }
  0x5d   : > { %v6890_v48 = vrot.slane %v5016_v40, 1  ;;  %v596_v49 = vrot.slane %v5019_v41, 1  ;;  %v5026_v52 = vsel %vm347_vm1, %v349_v26, %v351_v39  ;;  %v353_v53 = vrot.slane %v254_v43, 6  ;;  %v255_v54 = vld [vmem:[#allocation2 + $0x20] sm:$0xff]  ;;  %v495_v59 = vld [vmem:[#allocation5 + $0x8] sm:$0xff]  ;;  %v528_v8 = vld [vmem:[#allocation5 + $0x110] sm:$0xff] }
  0x5e   : > { %v5031_v55 = vsel %vm347_vm1, %v399_v31, %v401_v42  ;;  %v403_v56 = vrot.slane %v279_v44, 6  ;;  %v494_v58 = vld [vmem:[#allocation5] sm:$0xff]  ;;  %v547_v60 = vsel %vm544_vm2, %v545_v46, %v546_v47  ;;  %v4480_v61 = vpack.c.bf16 %v527_v51, %v526_v50  ;;  %v529_v9 = vld [vmem:[#allocation5 + $0x118] sm:$0xff]  ;;  %v496_v11 = vld [vmem:[#allocation5 + $0x10] sm:$0xff]  ;;  %p4755_p13 = por %p4754_p11, %p4753_p10 }
  0x5f   : > { %4439 = vmatpush3.bf16.msra.mxu0 %v4438_v10  ;;  %4513 = vmatpush3.bf16.msra.mxu1 %v4438_v10  ;;  %v548_v62 = vrot.slane %v5026_v52, 1  ;;  %v355_v63 = vrot.slane %v255_v54, 6  ;;  %v597_v2 = vsel %vm544_vm2, %v6890_v48, %v596_v49  ;;  %v598_v3 = vrot.slane %v5031_v55, 1  ;;  %v5050_v10 = vld [vmem:[#allocation2 + $0x28] sm:$0xff]  ;;  %v497_v12 = vld [vmem:[#allocation5 + $0x18] sm:$0xff]  ;;  %v257_v26 = vld [vmem:[#allocation2 + $0x30] sm:$0xff] }
  0x60   : > { %4440 = vmatprep.subr.bf16.mxu0 %v4836_v0  ;;  %4506 = vmatprep.subr.bf16.mxu1 %v4836_v0  ;;  %v5042_v4 = vsel %vm347_vm1, %v351_v39, %v353_v53  ;;  %v405_v5 = vrot.slane %v5033_v57, 6  ;;  %v4456_v6 = vpack.c.bf16 %v495_v59, %v494_v58  ;;  %v5048_v7 = vsel %vm347_vm1, %v401_v42, %v403_v56  ;;  %v5067_v27 = vld [vmem:[#allocation2 + $0xf8] sm:$0xff]  ;;  %v530_v28 = vld [vmem:[#allocation5 + $0x120] sm:$0xff]  ;;  %v531_v30 = vld [vmem:[#allocation5 + $0x128] sm:$0xff]  ;;  %p4756_p1 = pnand %p4755_p13, %p4749_p8 }
  0x61   : > { %v549_v14 = vsel %vm544_vm2, %v546_v47, %v548_v62  ;;  %v550_v15 = vrot.slane %v5042_v4, 1  ;;  %v599_v17 = vsel %vm544_vm2, %v596_v49, %v598_v3  ;;  %v600_v18 = vrot.slane %v5048_v7, 1  ;;  %v498_v31 = vld [vmem:[#allocation5 + $0x20] sm:$0xff]  ;;  %v499_v32 = vld [vmem:[#allocation5 + $0x28] sm:$0xff]  ;;  %v5083_v44 = vld [vmem:[#allocation2 + $0x38] sm:$0xff] }
  0x62   : > { %v5062_v19 = vsel %vm347_vm1, %v403_v56, %v405_v5  ;;  %v357_v20 = vrot.slane %v5050_v10, 6  ;;  %v4483_v22 = vpack.c.bf16 %v529_v9, %v528_v8  ;;  %v4459_v23 = vpack.c.bf16 %v497_v12, %v496_v11  ;;  %v500_v50 = vld [vmem:[#allocation5 + $0x30] sm:$0xff]  ;;  %v501_v51 = vld [vmem:[#allocation5 + $0x38] sm:$0xff]  ;;  %v502_v8 = vld [vmem:[#allocation5 + $0x40] sm:$0xff] }
  0x63   : > { %4442 = vmatpush3.bf16.msra.mxu0 %v4441_v13  ;;  %4514 = vmatpush3.bf16.msra.mxu1 %v4441_v13  ;;  %v281_v13 = vld [vmem:[#allocation2 + $0xf0] sm:$0xff]  ;;  %v551_v33 = vsel %vm544_vm2, %v548_v62, %v550_v15  ;;  %v602_v35 = vrot.slane %v5062_v19, 1  ;;  %v601_v36 = vsel %vm544_vm2, %v598_v3, %v600_v18  ;;  %v359_v42 = vrot.slane %v257_v26, 6  ;;  %v533_v54 = vld [vmem:[#allocation5 + $0x138] sm:$0xff]  ;;  %v5110_v3 = vld [vmem:[#allocation2 + $0x108] sm:$0xff] }
  0x64   : > { %4443 = vmatprep.subr.bf16.mxu0 %v4836_v0  ;;  %4507 = vmatprep.subr.bf16.mxu1 %v4836_v0  ;;  %v5080_v39 = vsel %vm347_vm1, %v355_v63, %v357_v20  ;;  %v409_v43 = vrot.slane %v5067_v27, 6  ;;  %v4486_v47 = vpack.c.bf16 %v531_v30, %v530_v28  ;;  %v4462_v49 = vpack.c.bf16 %v499_v32, %v498_v31  ;;  %v503_v9 = vld [vmem:[#allocation5 + $0x48] sm:$0xff]  ;;  %v534_v10 = vld [vmem:[#allocation5 + $0x140] sm:$0xff]  ;;  %v504_v28 = vld [vmem:[#allocation5 + $0x50] sm:$0xff] }
  0x65   : > { %v603_v57 = vsel %vm544_vm2, %v600_v18, %v602_v35  ;;  %v361_v58 = vrot.slane %v5083_v44, 6  ;;  %v5103_v62 = vsel %vm347_vm1, %v357_v20, %v359_v42  ;;  %v535_v11 = vld [vmem:[#allocation5 + $0x148] sm:$0xff]  ;;  %v4468_v26 = vpack.c.bf16 %v503_v9, %v502_v8  ;;  %v505_v30 = vld [vmem:[#allocation5 + $0x58] sm:$0xff]  ;;  %v536_v31 = vld [vmem:[#allocation5 + $0x150] sm:$0xff] }
  0x66   : > { %v556_v12 = vrot.slane %v5103_v62, 1  ;;  %v4492_v27 = vpack.c.bf16 %v535_v11, %v534_v10  ;;  %v537_v32 = vld [vmem:[#allocation5 + $0x158] sm:$0xff]  ;;  %v5148_v44 = vld [vmem:[#allocation2 + $0x50] sm:$0xff]  ;;  %v287_v9 = vld [vmem:[#allocation2 + $0x120] sm:$0xff] }
  0x67   : > { %4445 = vmatpush3.bf16.msra.mxu0 %v4444_v16  ;;  %4515 = vmatpush3.bf16.msra.mxu1 %v4444_v16  ;;  %v5055_v16 = vsel %vm347_vm1, %v353_v53, %v355_v63  ;;  %v532_v53 = vld [vmem:[#allocation5 + $0x130] sm:$0xff]  ;;  %v262_v8 = vld [vmem:[#allocation2 + $0x58] sm:$0xff]  ;;  %vm3683_vm3 = vmneg %vm347_vm1 }
  0x68   : > { %4446 = vmatprep.subr.bf16.mxu0 %v4836_v0  ;;  %4508 = vmatprep.subr.bf16.mxu1 %v4836_v0  ;;  %v298_v48 = vld [vmem:[#allocation2 + $0x178] sm:$0xff] }
  0x69   : > { %v274_v29 = vld [vmem:[#allocation2 + $0xb8] sm:$0xff] }
  0x6b   : > { %4448 = vmatpush3.bf16.msra.mxu0 %v4447_v24  ;;  %4516 = vmatpush3.bf16.msra.mxu1 %v4447_v24  ;;  %v407_v24 = vrot.slane %v281_v13, 6 }
  0x6c   : > { %4449 = vmatprep.subr.bf16.mxu0 %v4836_v0  ;;  %4509 = vmatprep.subr.bf16.mxu1 %v4836_v0 }
  0x6d   : > { %v5088_v46 = vsel %vm347_vm1, %v405_v5, %v407_v24  ;;  %v5106_v63 = vsel %vm347_vm1, %v407_v24, %v409_v43  ;;  %v4465_v5 = vpack.c.bf16 %v501_v51, %v500_v50  ;;  %v5132_v24 = vld [vmem:[#allocation2 + $0x110] sm:$0xff]  ;;  %v4471_v50 = vpack.c.bf16 %v505_v30, %v504_v28 }
  0x6e   : > { %v606_v13 = vrot.slane %v5106_v63, 1  ;;  %v4495_v51 = vpack.c.bf16 %v537_v32, %v536_v31  ;;  %v369_v28 = vrot.slane %v262_v8, 6  ;;  %v419_v30 = vrot.slane %v287_v9, 6  ;;  %v290_v8 = vld [vmem:[#allocation2 + $0x138] sm:$0xff] }
  0x6f   : > { %4451 = vmatpush3.bf16.msra.mxu0 %v4450_v34  ;;  %4517 = vmatpush3.bf16.msra.mxu1 %v4450_v34  ;;  %v552_v34 = vrot.slane %v5055_v16, 1 }
  0x70   : > { %4452 = vmatprep.subr.bf16.mxu0 %v4836_v0  ;;  %4510 = vmatprep.subr.bf16.mxu1 %v4836_v0 }
  0x71   : > { %v553_v56 = vsel %vm544_vm2, %v550_v15, %v552_v34 }
  0x73   : > { %4454 = vmatpush3.bf16.msra.mxu0 %v4453_v45  ;;  %4518 = vmatpush3.bf16.msra.mxu1 %v4453_v45  ;;  %v5085_v45 = vld [vmem:[#allocation2 + $0x100] sm:$0xff] }
  0x74   : > { %4479 = vmatprep.subr.bf16.mxu0 %v4836_v0  ;;  %4455 = vmatprep.subr.bf16.mxu1 %v4836_v0  ;;  %v411_v59 = vrot.slane %v5085_v45, 6 }
  0x76   : > { %3927 = vmatmul.mubr.f32.vlgmr.msra.gmra.mrb[0].mxu0 %v547_v60  ;;  %4002 = vmatmul.mubr.f32.vlgmr.msra.gmra.mrb[0].mxu1 %v597_v2  ;;  %v554_v60 = vrot.slane %v5080_v39, 1  ;;  %v5108_v2 = vld [vmem:[#allocation2 + $0x40] sm:$0xff]  ;;  %v5126_v18 = vsel %vm347_vm1, %v409_v43, %v411_v59 }
  0x77   : > { %4481 = vmatpush3.bf16.msra.mxu0 %v4480_v61  ;;  %3929 = vmatprep.mubr.msk.f32.mxu0 %vm4837_vm0, %v4838_v1  ;;  %v604_v61 = vrot.slane %v5088_v46, 1  ;;  %v363_v20 = vrot.slane %v5108_v2, 6 }
  0x78   : > { %4004 = vmatprep.mubr.msk.f32.mxu1 %vm4837_vm0, %v4838_v1  ;;  %4457 = vmatpush3.bf16.msra.mxu1 %v4456_v6  ;;  %v4489_v6 = vpack.c.bf16 %v533_v54, %v532_v53  ;;  %v555_v15 = vsel %vm544_vm2, %v552_v34, %v554_v60  ;;  %v608_v34 = vrot.slane %v5126_v18, 1  ;;  %v506_v53 = vld [vmem:[#allocation5 + $0x60] sm:$0xff]  ;;  %v507_v54 = vld [vmem:[#allocation5 + $0x68] sm:$0xff] }
  0x79   : > { %4482 = vmatprep.subr.bf16.mxu0 %v4836_v0  ;;  %4458 = vmatprep.subr.bf16.mxu1 %v4836_v0  ;;  %v4474_v10 = vpack.c.bf16 %v507_v54, %v506_v53  ;;  %v289_v53 = vld [vmem:[#allocation2 + $0x130] sm:$0xff] }
  0x7a   : > { %3930 = vmatmul.mubr.f32.gmra.mrb[2].mxu0 %v549_v14  ;;  %4005 = vmatmul.mubr.f32.gmra.mrb[2].mxu1 %v599_v17  ;;  %v5117_v14 = vsel %vm347_vm1, %v359_v42, %v361_v58  ;;  %v605_v17 = vsel %vm544_vm2, %v602_v35, %v604_v61  ;;  %v557_v35 = vsel %vm544_vm2, %v554_v60, %v556_v12  ;;  %v367_v60 = vrot.slane %v5148_v44, 6 }
  0x7b   : > { %3932 = vmatprep.mubr.msk.f32.mxu0 %vm4837_vm0, %v4838_v1  ;;  %4007 = vmatprep.mubr.msk.f32.mxu1 %vm4837_vm0, %v4838_v1  ;;  %v5145_v42 = vsel %vm347_vm1, %v361_v58, %v363_v20 }
  0x7c   : > { %4484 = vmatpush3.bf16.msra.mxu0 %v4483_v22  ;;  %4460 = vmatpush3.bf16.msra.mxu1 %v4459_v23  ;;  %v413_v22 = vrot.slane %v5110_v3, 6  ;;  %v5130_v23 = vld [vmem:[#allocation2 + $0x48] sm:$0xff] }
  0x7d   : > { %4485 = vmatprep.subr.bf16.mxu0 %v4836_v0  ;;  %4461 = vmatprep.subr.bf16.mxu1 %v4836_v0  ;;  %v365_v43 = vrot.slane %v5130_v23, 6 }
  0x7e   : > { %3933 = vmatmul.mubr.f32.gmra.mrb[4].mxu0 %v551_v33  ;;  %4008 = vmatmul.mubr.f32.gmra.mrb[4].mxu1 %v601_v36  ;;  %v558_v33 = vrot.slane %v5117_v14, 1  ;;  %v607_v36 = vsel %vm544_vm2, %v604_v61, %v606_v13  ;;  %v5151_v45 = vsel %vm347_vm1, %v411_v59, %v413_v22  ;;  %v609_v59 = vsel %vm544_vm2, %v606_v13, %v608_v34  ;;  %v509_v13 = vld [vmem:[#allocation5 + $0x78] sm:$0xff] }
  0x7f   : > { %3935 = vmatprep.mubr.msk.f32.mxu0 %vm4837_vm0, %v4838_v1  ;;  %4010 = vmatprep.mubr.msk.f32.mxu1 %vm4837_vm0, %v4838_v1  ;;  %v560_v61 = vrot.slane %v5145_v42, 1  ;;  %v610_v2 = vrot.slane %v5151_v45, 1  ;;  %v5168_v3 = vsel %vm347_vm1, %v363_v20, %v365_v43 }
  0x80   : > { %4487 = vmatpush3.bf16.msra.mxu0 %v4486_v47  ;;  %4463 = vmatpush3.bf16.msra.mxu1 %v4462_v49  ;;  %v415_v47 = vrot.slane %v5132_v24, 6  ;;  %v5154_v49 = vld [vmem:[#allocation2 + $0x118] sm:$0xff]  ;;  %v559_v58 = vsel %vm544_vm2, %v556_v12, %v558_v33  ;;  %v508_v12 = vld [vmem:[#allocation5 + $0x70] sm:$0xff]  ;;  %v562_v20 = vrot.slane %v5168_v3, 1 }
  0x81   : > { %4464 = vmatprep.subr.bf16.mxu1 %v4836_v0  ;;  %4488 = vmatprep.subr.bf16.mxu0 %v4836_v0  ;;  %v561_v23 = vsel %vm544_vm2, %v558_v33, %v560_v61  ;;  %v611_v24 = vsel %vm544_vm2, %v608_v34, %v610_v2  ;;  %v4477_v31 = vpack.c.bf16 %v509_v13, %v508_v12 }
  0x82   : > { %3936 = vmatmul.mubr.f32.gmra.mrb[6].mxu0 %v553_v56  ;;  %4011 = vmatmul.mubr.f32.gmra.mrb[6].mxu1 %v603_v57  ;;  %v538_v56 = vld [vmem:[#allocation5 + $0x160] sm:$0xff]  ;;  %v539_v57 = vld [vmem:[#allocation5 + $0x168] sm:$0xff]  ;;  %v563_v33 = vsel %vm544_vm2, %v560_v61, %v562_v20 }
  0x83   : > { %3938 = vmatprep.mubr.msk.f32.mxu0 %vm4837_vm0, %v4838_v1  ;;  %4013 = vmatprep.mubr.msk.f32.mxu1 %vm4837_vm0, %v4838_v1  ;;  %v4498_v11 = vpack.c.bf16 %v539_v57, %v538_v56 }
  0x84   : > { %4466 = vmatpush3.bf16.msra.mxu1 %v4465_v5  ;;  %4490 = vmatpush3.bf16.msra.mxu0 %v4489_v6  ;;  %v417_v5 = vrot.slane %v5154_v49, 6  ;;  %v5172_v6 = vsel %vm347_vm1, %v413_v22, %v415_v47  ;;  %v5178_v22 = vsel %vm347_vm1, %v365_v43, %v367_v60 }
  0x85   : > { %4467 = vmatprep.subr.bf16.mxu1 %v4836_v0  ;;  %4491 = vmatprep.subr.bf16.mxu0 %v4836_v0  ;;  %v564_v43 = vrot.slane %v5178_v22, 1 }
  0x86   : > { %3939 = vmatmul.mubr.f32.gmra.mrb[8].mxu0 %v555_v15  ;;  %4014 = vmatmul.mubr.f32.gmra.mrb[8].mxu1 %v605_v17  ;;  %v540_v15 = vld [vmem:[#allocation5 + $0x170] sm:$0xff]  ;;  %v541_v17 = vld [vmem:[#allocation5 + $0x178] sm:$0xff] }
  0x87   : > { %3941 = vmatprep.mubr.msk.f32.mxu0 %vm4837_vm0, %v4838_v1  ;;  %4016 = vmatprep.mubr.msk.f32.mxu1 %vm4837_vm0, %v4838_v1  ;;  %v4501_v32 = vpack.c.bf16 %v541_v17, %v540_v15  ;;  %v565_v54 = vsel %vm544_vm2, %v562_v20, %v564_v43  ;;  %v425_v20 = vrot.slane %v290_v8, 6 }
  0x88   : > { %4469 = vmatpush3.bf16.msra.mxu1 %v4468_v26  ;;  %4493 = vmatpush3.bf16.msra.mxu0 %v4492_v27  ;;  %v612_v26 = vrot.slane %v5172_v6, 1  ;;  %v5188_v27 = vsel %vm347_vm1, %v415_v47, %v417_v5  ;;  %v5201_v47 = vsel %vm347_vm1, %v367_v60, %v369_v28 }
  0x89   : > { %4470 = vmatprep.subr.bf16.mxu1 %v4836_v0  ;;  %4494 = vmatprep.subr.bf16.mxu0 %v4836_v0  ;;  %v614_v44 = vrot.slane %v5188_v27, 1  ;;  %v566_v57 = vrot.slane %v5201_v47, 1 }
  0x8a   : > { %3942 = vmatmul.mubr.f32.gmra.mrb[10].mxu0 %v557_v35  ;;  %4017 = vmatmul.mubr.f32.gmra.mrb[10].mxu1 %v607_v36  ;;  %v263_v35 = vld [vmem:[#allocation2 + $0x60] sm:$0xff]  ;;  %v288_v36 = vld [vmem:[#allocation2 + $0x128] sm:$0xff]  ;;  %v613_v34 = vsel %vm544_vm2, %v610_v2, %v612_v26  ;;  %v423_v2 = vrot.slane %v289_v53, 6 }
  0x8b   : > { %3944 = vmatprep.mubr.msk.f32.mxu0 %vm4837_vm0, %v4838_v1  ;;  %4019 = vmatprep.mubr.msk.f32.mxu1 %vm4837_vm0, %v4838_v1  ;;  %v371_v49 = vrot.slane %v263_v35, 6  ;;  %v615_v56 = vsel %vm544_vm2, %v612_v26, %v614_v44  ;;  %v567_v9 = vsel %vm544_vm2, %v564_v43, %v566_v57  ;;  %v292_v43 = vld [vmem:[#allocation2 + $0x148] sm:$0xff] }
  0x8c   : > { %4472 = vmatpush3.bf16.msra.mxu1 %v4471_v50  ;;  %4496 = vmatpush3.bf16.msra.mxu0 %v4495_v51  ;;  %v421_v50 = vrot.slane %v288_v36, 6  ;;  %v264_v51 = vld [vmem:[#allocation2 + $0x68] sm:$0xff]  ;;  %v5246_v35 = vsel %vm347_vm1, %v423_v2, %v425_v20 }
  0x8d   : > { %4473 = vmatprep.subr.bf16.mxu1 %v4836_v0  ;;  %4497 = vmatprep.subr.bf16.mxu0 %v4836_v0  ;;  %v373_v61 = vrot.slane %v264_v51, 6  ;;  %v622_v51 = vrot.slane %v5246_v35, 1 }
  0x8e   : > { %3945 = vmatmul.mubr.f32.gmra.mrb[12].mxu0 %v559_v58  ;;  %4020 = vmatmul.mubr.f32.gmra.mrb[12].mxu1 %v609_v59  ;;  %v5215_v59 = vsel %vm347_vm1, %v369_v28, %v371_v49  ;;  %v5218_v60 = vsel %vm347_vm1, %v419_v30, %v421_v50  ;;  %v5232_v15 = vsel %vm347_vm1, %v421_v50, %v423_v2 }
  0x8f   : > { %3947 = vmatprep.mubr.msk.f32.mxu0 %vm4837_vm0, %v4838_v1  ;;  %4022 = vmatprep.mubr.msk.f32.mxu1 %vm4837_vm0, %v4838_v1  ;;  %v618_v12 = vrot.slane %v5218_v60, 1  ;;  %v5229_v13 = vsel %vm347_vm1, %v371_v49, %v373_v61 }
  0x90   : > { %4475 = vmatpush3.bf16.msra.mxu1 %v4474_v10  ;;  %4499 = vmatpush3.bf16.msra.mxu0 %v4498_v11  ;;  %v568_v11 = vrot.slane %v5215_v59, 1 }
  0x91   : > { %4476 = vmatprep.subr.bf16.mxu1 %v4836_v0  ;;  %4500 = vmatprep.subr.bf16.mxu0 %v4836_v0  ;;  %v5204_v0 = vsel %vm347_vm1, %v417_v5, %v419_v30  ;;  %v265_v5 = vld [vmem:[#allocation2 + $0x70] sm:$0xff]  ;;  %v570_v30 = vrot.slane %v5229_v13, 1 }
  0x92   : > { %3948 = vmatmul.mubr.f32.gmra.mrb[14].mxu0 %v561_v23  ;;  %4023 = vmatmul.mubr.f32.gmra.mrb[14].mxu1 %v611_v24  ;;  %v616_v58 = vrot.slane %v5204_v0, 1  ;;  %v375_v17 = vrot.slane %v265_v5, 6  ;;  %v266_v23 = vld [vmem:[#allocation2 + $0x78] sm:$0xff]  ;;  %v291_v24 = vld [vmem:[#allocation2 + $0x140] sm:$0xff]  ;;  %v569_v26 = vsel %vm544_vm2, %v566_v57, %v568_v11  ;;  %v429_v57 = vrot.slane %v292_v43, 6 }
  0x93   : > { %3950 = vmatprep.mubr.msk.f32.mxu0 %vm4837_vm0, %v4838_v1  ;;  %4025 = vmatprep.mubr.msk.f32.mxu1 %vm4837_vm0, %v4838_v1  ;;  %v377_v36 = vrot.slane %v266_v23, 6  ;;  %v294_v23 = vld [vmem:[#allocation2 + $0x158] sm:$0xff] }
  0x94   : > { %4478 = vmatpush3.bf16.msra.mxu1 %v4477_v31  ;;  %4502 = vmatpush3.bf16.msra.mxu0 %v4501_v32  ;;  %v617_v10 = vsel %vm544_vm2, %v614_v44, %v616_v58  ;;  %v619_v28 = vsel %vm544_vm2, %v616_v58, %v618_v12  ;;  %v620_v31 = vrot.slane %v5232_v15, 1  ;;  %v5243_v32 = vsel %vm347_vm1, %v373_v61, %v375_v17  ;;  %v268_v58 = vld [vmem:[#allocation2 + $0x88] sm:$0xff]  ;;  %v293_v61 = vld [vmem:[#allocation2 + $0x150] sm:$0xff]  ;;  %v270_v43 = vld [vmem:[#allocation2 + $0x98] sm:$0xff] }
  0x95   : > { %v571_v44 = vsel %vm544_vm2, %v568_v11, %v570_v30  ;;  %v572_v50 = vrot.slane %v5243_v32, 1  ;;  %v5257_v53 = vsel %vm347_vm1, %v375_v17, %v377_v36  ;;  %v431_v17 = vrot.slane %v293_v61, 6 }
  0x96   : > { %3951 = vmatmul.mubr.f32.gmra.mrb[16].mxu0 %v563_v33  ;;  %4026 = vmatmul.mubr.f32.gmra.mrb[16].mxu1 %v613_v34  ;;  %v427_v33 = vrot.slane %v291_v24, 6  ;;  %v267_v34 = vld [vmem:[#allocation2 + $0x80] sm:$0xff]  ;;  %v621_v49 = vsel %vm544_vm2, %v618_v12, %v620_v31  ;;  %v623_v5 = vsel %vm544_vm2, %v620_v31, %v622_v51  ;;  %v574_v8 = vrot.slane %v5257_v53, 1 }
  0x97   : > { %3953 = vmatprep.mubr.msk.f32.mxu0 %vm4837_vm0, %v4838_v1  ;;  %4028 = vmatprep.mubr.msk.f32.mxu1 %vm4837_vm0, %v4838_v1  ;;  %v573_v2 = vsel %vm544_vm2, %v570_v30, %v572_v50  ;;  %v381_v12 = vrot.slane %v268_v58, 6  ;;  %v385_v61 = vrot.slane %v270_v43, 6 }
  0x98   : > { %v5274_v11 = vsel %vm347_vm1, %v427_v33, %v429_v57  ;;  %v575_v24 = vsel %vm544_vm2, %v572_v50, %v574_v8 }
  0x99   : > { %v626_v30 = vrot.slane %v5274_v11, 1 }
  0x9a   : > { %3954 = vmatmul.mubr.f32.gmra.mrb[18].mxu0 %v565_v54  ;;  %4029 = vmatmul.mubr.f32.gmra.mrb[18].mxu1 %v615_v56  ;;  %v5260_v54 = vsel %vm347_vm1, %v425_v20, %v427_v33  ;;  %v379_v56 = vrot.slane %v267_v34, 6  ;;  %v269_v20 = vld [vmem:[#allocation2 + $0x90] sm:$0xff]  ;;  %v433_v34 = vrot.slane %v294_v23, 6 }
  0x9b   : > { %3956 = vmatprep.mubr.msk.f32.mxu0 %vm4837_vm0, %v4838_v1  ;;  %4031 = vmatprep.mubr.msk.f32.mxu1 %vm4837_vm0, %v4838_v1  ;;  %v383_v33 = vrot.slane %v269_v20, 6  ;;  %v296_v20 = vld [vmem:[#allocation2 + $0x168] sm:$0xff] }
  0x9c   : > { %v5285_v31 = vsel %vm347_vm1, %v379_v56, %v381_v12  ;;  %v5302_v58 = vsel %vm347_vm1, %v431_v17, %v433_v34  ;;  %v437_v43 = vrot.slane %v296_v20, 6 }
  0x9d   : > { %v5313_v23 = vsel %vm347_vm1, %v383_v33, %v385_v61 }
  0x9e   : > { %3957 = vmatmul.mubr.f32.gmra.mrb[20].mxu0 %v567_v9  ;;  %4032 = vmatmul.mubr.f32.gmra.mrb[20].mxu1 %v617_v10  ;;  %v624_v9 = vrot.slane %v5260_v54, 1  ;;  %v5271_v10 = vsel %vm347_vm1, %v377_v36, %v379_v56  ;;  %v5288_v36 = vsel %vm347_vm1, %v429_v57, %v431_v17  ;;  %v5299_v57 = vsel %vm347_vm1, %v381_v12, %v383_v33 }
  0x9f   : > { %3959 = vmatprep.mubr.msk.f32.mxu0 %vm4837_vm0, %v4838_v1  ;;  %4034 = vmatprep.mubr.msk.f32.mxu1 %vm4837_vm0, %v4838_v1  ;;  %v628_v56 = vrot.slane %v5288_v36, 1  ;;  %v580_v12 = vrot.slane %v5299_v57, 1  ;;  %v630_v17 = vrot.slane %v5302_v58, 1  ;;  %v582_v33 = vrot.slane %v5313_v23, 1 }
  0xa0   : > { %v627_v50 = vsel %vm544_vm2, %v624_v9, %v626_v30 }
  0xa2   : > { %3960 = vmatmul.mubr.f32.gmra.mrb[22].mxu0 %v569_v26  ;;  %4035 = vmatmul.mubr.f32.gmra.mrb[22].mxu1 %v619_v28  ;;  %v625_v26 = vsel %vm544_vm2, %v622_v51, %v624_v9  ;;  %v576_v28 = vrot.slane %v5271_v10, 1  ;;  %v578_v51 = vrot.slane %v5285_v31, 1  ;;  %v629_v9 = vsel %vm544_vm2, %v626_v30, %v628_v56 }
  0xa3   : > { %3962 = vmatprep.mubr.msk.f32.mxu0 %vm4837_vm0, %v4838_v1  ;;  %4037 = vmatprep.mubr.msk.f32.mxu1 %vm4837_vm0, %v4838_v1  ;;  %v631_v30 = vsel %vm544_vm2, %v628_v56, %v630_v17 }
  0xa6   : > { %3963 = vmatmul.mubr.f32.gmra.mrb[24].mxu0 %v571_v44  ;;  %4038 = vmatmul.mubr.f32.gmra.mrb[24].mxu1 %v621_v49  ;;  %v295_v44 = vld [vmem:[#allocation2 + $0x160] sm:$0xff]  ;;  %v577_v49 = vsel %vm544_vm2, %v574_v8, %v576_v28  ;;  %v579_v8 = vsel %vm544_vm2, %v576_v28, %v578_v51  ;;  %v581_v28 = vsel %vm544_vm2, %v578_v51, %v580_v12 }
  0xa7   : > { %3965 = vmatprep.mubr.msk.f32.mxu0 %vm4837_vm0, %v4838_v1  ;;  %4040 = vmatprep.mubr.msk.f32.mxu1 %vm4837_vm0, %v4838_v1  ;;  %v583_v51 = vsel %vm544_vm2, %v580_v12, %v582_v33 }
  0xaa   : > { %3966 = vmatmul.mubr.f32.gmra.mrb[26].mxu0 %v573_v2  ;;  %4041 = vmatmul.mubr.f32.gmra.mrb[26].mxu1 %v623_v5  ;;  %v435_v2 = vrot.slane %v295_v44, 6  ;;  %v271_v5 = vld [vmem:[#allocation2 + $0xa0] sm:$0xff]  ;;  %v272_v44 = vld [vmem:[#allocation2 + $0xa8] sm:$0xff] }
  0xab   : > { %3968 = vmatprep.mubr.msk.f32.mxu0 %vm4837_vm0, %v4838_v1  ;;  %4043 = vmatprep.mubr.msk.f32.mxu1 %vm4837_vm0, %v4838_v1  ;;  %v389_v20 = vrot.slane %v272_v44, 6 }
  0xae   : > { %3969 = vmatmul.mubr.f32.gmra.mrb[28].mxu0 %v575_v24  ;;  %4044 = vmatmul.mubr.f32.gmra.mrb[28].mxu1 %v625_v26  ;;  %v5316_v24 = vsel %vm347_vm1, %v433_v34, %v435_v2  ;;  %v387_v26 = vrot.slane %v271_v5, 6  ;;  %v5330_v5 = vsel %vm347_vm1, %v435_v2, %v437_v43 }
  0xaf   : > { %3971 = vmatprep.mubr.msk.f32.mxu0 %vm4837_vm0, %v4838_v1  ;;  %4046 = vmatprep.mubr.msk.f32.mxu1 %vm4837_vm0, %v4838_v1  ;;  %v632_v34 = vrot.slane %v5316_v24, 1  ;;  %v634_v2 = vrot.slane %v5330_v5, 1 }
  0xb0   : > { %v5341_v44 = vsel %vm347_vm1, %v387_v26, %v389_v20 }
  0xb1   : > { %v633_v56 = vsel %vm544_vm2, %v630_v17, %v632_v34  ;;  %v635_v17 = vsel %vm544_vm2, %v632_v34, %v634_v2 }
  0xb2   : > { %3972 = vmatmul.mubr.f32.gmra.mrb[30].mxu0 %v577_v49  ;;  %4047 = vmatmul.mubr.f32.gmra.mrb[30].mxu1 %v627_v50  ;;  %v297_v49 = vld [vmem:[#allocation2 + $0x170] sm:$0xff]  ;;  %v5327_v50 = vsel %vm347_vm1, %v385_v61, %v387_v26  ;;  %v586_v26 = vrot.slane %v5341_v44, 1 }
  0xb3   : > { %3974 = vmatprep.mubr.msk.f32.mxu0 %vm4837_vm0, %v4838_v1  ;;  %4049 = vmatprep.mubr.msk.f32.mxu1 %vm4837_vm0, %v4838_v1  ;;  %v584_v61 = vrot.slane %v5327_v50, 1 }
  0xb5   : > { %v585_v12 = vsel %vm544_vm2, %v582_v33, %v584_v61  ;;  %v587_v33 = vsel %vm544_vm2, %v584_v61, %v586_v26 }
  0xb6   : > { %3975 = vmatmul.mubr.f32.gmra.mrb[32].mxu0 %v579_v8  ;;  %4050 = vmatmul.mubr.f32.gmra.mrb[32].mxu1 %v629_v9  ;;  %v439_v8 = vrot.slane %v297_v49, 6  ;;  %v273_v9 = vld [vmem:[#allocation2 + $0xb0] sm:$0xff] }
  0xb7   : > { %3977 = vmatprep.mubr.msk.f32.mxu0 %vm4837_vm0, %v4838_v1  ;;  %4052 = vmatprep.mubr.msk.f32.mxu1 %vm4837_vm0, %v4838_v1 }
  0xb8   : > { %v5344_v49 = vsel %vm347_vm1, %v437_v43, %v439_v8 }
  0xb9   : > { %v636_v43 = vrot.slane %v5344_v49, 1 }
  0xba   : > { %3978 = vmatmul.mubr.f32.gmra.mrb[34].mxu0 %v581_v28  ;;  %4053 = vmatmul.mubr.f32.gmra.mrb[34].mxu1 %v631_v30  ;;  %v391_v28 = vrot.slane %v273_v9, 6  ;;  %v5346_v30 = vrot.slane %v298_v48, 6 }
  0xbb   : > { %3980 = vmatprep.mubr.msk.f32.mxu0 %vm4837_vm0, %v4838_v1  ;;  %4055 = vmatprep.mubr.msk.f32.mxu1 %vm4837_vm0, %v4838_v1  ;;  %v637_v34 = vsel %vm544_vm2, %v634_v2, %v636_v43 }
  0xbc   : > { %6918 = vst [vmem:[#allocation16_spill] sm:$0xff] %v5346_v30  ;;  %v5357_v48 = vsel %vm347_vm1, %v389_v20, %v391_v28  ;;  %v5361_v9 = vsel %vm347_vm1, %v439_v8, %v5346_v30 }
  0xbd   : > { %v588_v20 = vrot.slane %v5357_v48, 1 }
  0xbe   : > { %3981 = vmatmul.mubr.f32.gmra.mrb[36].mxu0 %v583_v51  ;;  %4056 = vmatmul.mubr.f32.gmra.mrb[36].mxu1 %v633_v56  ;;  %v393_v51 = vrot.slane %v274_v29, 6  ;;  %v638_v56 = vrot.slane %v5361_v9, 1  ;;  %v5376_v29 = vsel %vm347_vm1, %v5346_v30, 0.0 }
  0xbf   : > { %3983 = vmatprep.mubr.msk.f32.mxu0 %vm4837_vm0, %v4838_v1  ;;  %4058 = vmatprep.mubr.msk.f32.mxu1 %vm4837_vm0, %v4838_v1  ;;  %v589_v61 = vsel %vm544_vm2, %v586_v26, %v588_v20 }
  0xc0   : > { %v5372_v8 = vsel %vm347_vm1, %v391_v28, %v393_v51  ;;  %v639_v2 = vsel %vm544_vm2, %v636_v43, %v638_v56  ;;  %v640_v28 = vrot.slane %v5376_v29, 1 }
  0xc2   : > { %3984 = vmatmul.mubr.f32.gmra.mrb[38].mxu0 %v585_v12  ;;  %4059 = vmatmul.mubr.f32.gmra.mrb[38].mxu1 %v635_v17  ;;  %v590_v12 = vrot.slane %v5372_v8, 1  ;;  %v6919_v17 = vrot.slane %v4996_v21, 6  ;;  %v641_v43 = vsel %vm544_vm2, %v638_v56, %v640_v28  ;;  %v1313_v56 = vrot.slane %v5005_v37, 2 }
  0xc3   : > { %3986 = vmatprep.mubr.msk.f32.mxu0 %vm4837_vm0, %v4838_v1  ;;  %4061 = vmatprep.mubr.msk.f32.mxu1 %vm4837_vm0, %v4838_v1 }
  0xc4   : > { %v5389_v30 = vsel %vm347_vm1, %v393_v51, %v6919_v17  ;;  %v591_v26 = vsel %vm544_vm2, %v588_v20, %v590_v12  ;;  %v1312_v51 = vrot.slane %v5009_v38, 2  ;;  %v1323_v17 = vrot.slane %v5103_v62, 2 }
  0xc6   : > { %3987 = vmatmul.mubr.f32.gmra.mrb[40].mxu0 %v587_v33  ;;  %4062 = vmatmul.mubr.f32.gmra.mrb[40].mxu1 %v637_v34  ;;  %v592_v33 = vrot.slane %v5389_v30, 1  ;;  %v6920_v34 = vrot.slane %v5016_v40, 1  ;;  %v1314_v38 = vsel %vm1311_vm4, %v1312_v51, %v1313_v56  ;;  %v1333_v51 = vrot.slane %v5201_v47, 2 }
  0xc7   : > { %3989 = vmatprep.mubr.msk.f32.mxu0 %vm4837_vm0, %v4838_v1  ;;  %4064 = vmatprep.mubr.msk.f32.mxu1 %vm4837_vm0, %v4838_v1 }
  0xc8   : > { %v593_v21 = vsel %vm544_vm2, %v590_v12, %v592_v33  ;;  %v595_v20 = vsel %vm544_vm2, %v592_v33, %v6920_v34  ;;  %v1319_v12 = vrot.slane %v5055_v16, 2  ;;  %v1329_v33 = vrot.slane %v5168_v3, 2 }
  0xc9   : > { %v1335_v34 = vrot.slane %v5215_v59, 2 }
  0xca   : > { %3990 = vmatmul.mubr.f32.gmra.mrb[42].mxu0 %v589_v61  ;;  %4065 = vmatmul.mubr.f32.gmra.mrb[42].mxu1 %v639_v2  ;;  %v1315_v61 = vrot.slane %v5026_v52, 2  ;;  %v1317_v2 = vrot.slane %v5042_v4, 2 }
  0xcb   : > { %3992 = vmatprep.mubr.msk.f32.mxu0 %vm4837_vm0, %v4838_v1  ;;  %4067 = vmatprep.mubr.msk.f32.mxu1 %vm4837_vm0, %v4838_v1 }
  0xce   : > { %3993 = vmatmul.mubr.f32.gmra.mrb[44].mxu0 %v591_v26  ;;  %4068 = vmatmul.mubr.f32.gmra.mrb[44].mxu1 %v641_v43  ;;  %v1325_v26 = vrot.slane %v5117_v14, 2  ;;  %v1327_v43 = vrot.slane %v5145_v42, 2 }
  0xcf   : > { %3995 = vmatprep.mubr.msk.f32.mxu0 %vm4837_vm0, %v4838_v1  ;;  %4070 = vmatprep.mubr.msk.f32.mxu1 %vm4837_vm0, %v4838_v1 }
  0xd2   : > { %3996 = vmatmul.mubr.f32.gmra.mrb[46].mxu0 %v593_v21  ;;  %4071 = vmatmul.mubr.f32.gmra.mrb[46].mxu1 %v640_v28  ;;  %v1321_v28 = vrot.slane %v5080_v39, 2  ;;  %v1331_v21 = vrot.slane %v5178_v22, 2 }
  0xd3   : > { %3998 = vmatprep.mubr.msk.f32.mxu0 %vm4837_vm0, %v4838_v1  ;;  %4105 = vmatprep.mubr.msk.f32.mxu1 %vm4837_vm0, %v4838_v1 }
  0xd6   : > { %3999 = vmatmul.mubr.f32.gmra.mrb[48].mxu0 %v595_v20  ;;  %4106 = vmatmul.mubr.msk.f32.vlgmr.msra.gmra.mrb[48].mxu1 %vm3683_vm3, %v4998_v25  ;;  %v1316_v25 = vsel %vm1311_vm4, %v1313_v56, %v1315_v61  ;;  %v1337_v20 = vrot.slane %v5229_v13, 2  ;;  %v1339_v56 = vrot.slane %v5243_v32, 2 }
  0xd7   : > { %4108 = vmatprep.mubr.msk.f32.mxu1 %vm4837_vm0, %v4838_v1  ;;  %4284 = vmatprep.mubr.msk.f32.mxu0 %vm4837_vm0, %v4838_v1 }
  0xda   : > { %4109 = vmatmul.mubr.f32.gmra.mrb[50].mxu1 %v5005_v37  ;;  %4285 = vmatmul.mubr.f32.vlgmr.msra.gmra.mrb[50].mxu0 %v1314_v38  ;;  %v1318_v37 = vsel %vm1311_vm4, %v1315_v61, %v1317_v2  ;;  %v1341_v38 = vrot.slane %v5257_v53, 2  ;;  %v1343_v61 = vrot.slane %v5271_v10, 2 }
  0xdb   : > { %4111 = vmatprep.mubr.msk.f32.mxu1 %vm4837_vm0, %v4838_v1  ;;  %4287 = vmatprep.mubr.msk.f32.mxu0 %vm4837_vm0, %v4838_v1 }
  0xde   : > { %4112 = vmatmul.mubr.f32.gmra.mrb[52].mxu1 %v5026_v52  ;;  %4288 = vmatmul.mubr.f32.gmra.mrb[52].mxu0 %v1316_v25  ;;  %v1320_v52 = vsel %vm1311_vm4, %v1317_v2, %v1319_v12  ;;  %v1345_v25 = vrot.slane %v5285_v31, 2  ;;  %v1347_v2 = vrot.slane %v5299_v57, 2 }
  0xdf   : > { %4114 = vmatprep.mubr.msk.f32.mxu1 %vm4837_vm0, %v4838_v1  ;;  %4290 = vmatprep.mubr.msk.f32.mxu0 %vm4837_vm0, %v4838_v1 }
  0xe2   : > { %4115 = vmatmul.mubr.f32.gmra.mrb[54].mxu1 %v5042_v4  ;;  %4291 = vmatmul.mubr.f32.gmra.mrb[54].mxu0 %v1318_v37  ;;  %v1322_v4 = vsel %vm1311_vm4, %v1319_v12, %v1321_v28  ;;  %v1349_v37 = vrot.slane %v5313_v23, 2  ;;  %v1351_v12 = vrot.slane %v5327_v50, 2 }
  0xe3   : > { %4117 = vmatprep.mubr.msk.f32.mxu1 %vm4837_vm0, %v4838_v1  ;;  %4293 = vmatprep.mubr.msk.f32.mxu0 %vm4837_vm0, %v4838_v1 }
  0xe6   : > { %4118 = vmatmul.mubr.f32.gmra.mrb[56].mxu1 %v5055_v16  ;;  %4294 = vmatmul.mubr.f32.gmra.mrb[56].mxu0 %v1320_v52  ;;  %v1324_v16 = vsel %vm1311_vm4, %v1321_v28, %v1323_v17  ;;  %v1353_v52 = vrot.slane %v5341_v44, 2  ;;  %v1355_v28 = vrot.slane %v5357_v48, 2 }
  0xe7   : > { %4120 = vmatprep.mubr.msk.f32.mxu1 %vm4837_vm0, %v4838_v1  ;;  %4296 = vmatprep.mubr.msk.f32.mxu0 %vm4837_vm0, %v4838_v1 }
  0xea   : > { %4121 = vmatmul.mubr.f32.gmra.mrb[58].mxu1 %v5080_v39  ;;  %4297 = vmatmul.mubr.f32.gmra.mrb[58].mxu0 %v1322_v4  ;;  %v1326_v39 = vsel %vm1311_vm4, %v1323_v17, %v1325_v26  ;;  %v1357_v4 = vrot.slane %v5372_v8, 2  ;;  %v1359_v17 = vrot.slane %v5389_v30, 2 }
  0xeb   : > { %4123 = vmatprep.mubr.msk.f32.mxu1 %vm4837_vm0, %v4838_v1  ;;  %4299 = vmatprep.mubr.msk.f32.mxu0 %vm4837_vm0, %v4838_v1 }
  0xee   : > { %4124 = vmatmul.mubr.f32.gmra.mrb[60].mxu1 %v5103_v62  ;;  %4300 = vmatmul.mubr.f32.gmra.mrb[60].mxu0 %v1324_v16  ;;  %v1328_v62 = vsel %vm1311_vm4, %v1325_v26, %v1327_v43  ;;  %v1361_v16 = vrot.slane %v5016_v40, 2  ;;  %v1363_v26 = vrot.slane %v5019_v41, 2 }
  0xef   : > { %4126 = vmatprep.mubr.msk.f32.mxu1 %vm4837_vm0, %v4838_v1  ;;  %4302 = vmatprep.mubr.msk.f32.mxu0 %vm4837_vm0, %v4838_v1 }
  0xf2   : > { %4127 = vmatmul.mubr.f32.gmra.mrb[62].mxu1 %v5117_v14  ;;  %4303 = vmatmul.mubr.f32.gmra.mrb[62].mxu0 %v1326_v39  ;;  %v1330_v14 = vsel %vm1311_vm4, %v1327_v43, %v1329_v33  ;;  %v1365_v39 = vrot.slane %v5031_v55, 2  ;;  %v1367_v43 = vrot.slane %v5048_v7, 2 }
  0xf3   : > { %4129 = vmatprep.mubr.msk.f32.mxu1 %vm4837_vm0, %v4838_v1  ;;  %4305 = vmatprep.mubr.msk.f32.mxu0 %vm4837_vm0, %v4838_v1 }
  0xf6   : > { %4130 = vmatmul.mubr.f32.gmra.mrb[64].mxu1 %v5145_v42  ;;  %4306 = vmatmul.mubr.f32.gmra.mrb[64].mxu0 %v1328_v62  ;;  %v1332_v42 = vsel %vm1311_vm4, %v1329_v33, %v1331_v21  ;;  %v1369_v62 = vrot.slane %v5062_v19, 2  ;;  %v1371_v33 = vrot.slane %v5088_v46, 2 }
  0xf7   : > { %4132 = vmatprep.mubr.msk.f32.mxu1 %vm4837_vm0, %v4838_v1  ;;  %4308 = vmatprep.mubr.msk.f32.mxu0 %vm4837_vm0, %v4838_v1 }
  0xfa   : > { %4133 = vmatmul.mubr.f32.gmra.mrb[66].mxu1 %v5168_v3  ;;  %4309 = vmatmul.mubr.f32.gmra.mrb[66].mxu0 %v1330_v14  ;;  %v1334_v3 = vsel %vm1311_vm4, %v1331_v21, %v1333_v51 }
  0xfb   : > { %4135 = vmatprep.mubr.msk.f32.mxu1 %vm4837_vm0, %v4838_v1  ;;  %4311 = vmatprep.mubr.msk.f32.mxu0 %vm4837_vm0, %v4838_v1 }
  0xfe   : > { %4136 = vmatmul.mubr.f32.gmra.mrb[68].mxu1 %v5178_v22  ;;  %4312 = vmatmul.mubr.f32.gmra.mrb[68].mxu0 %v1332_v42  ;;  %v1336_v22 = vsel %vm1311_vm4, %v1333_v51, %v1335_v34  ;;  %v1372_v51 = vsel %vm1311_vm4, %v1369_v62, %v1371_v33 }
  0xff   : > { %4138 = vmatprep.mubr.msk.f32.mxu1 %vm4837_vm0, %v4838_v1  ;;  %4314 = vmatprep.mubr.msk.f32.mxu0 %vm4837_vm0, %v4838_v1 }
 0x102   : > { %4139 = vmatmul.mubr.f32.gmra.mrb[70].mxu1 %v5201_v47  ;;  %4315 = vmatmul.mubr.f32.gmra.mrb[70].mxu0 %v1334_v3  ;;  %v1338_v47 = vsel %vm1311_vm4, %v1335_v34, %v1337_v20  ;;  %v1373_v3 = vrot.slane %v5106_v63, 2 }
 0x103   : > { %4141 = vmatprep.mubr.msk.f32.mxu1 %vm4837_vm0, %v4838_v1  ;;  %4317 = vmatprep.mubr.msk.f32.mxu0 %vm4837_vm0, %v4838_v1 }
 0x106   : > { %4142 = vmatmul.mubr.f32.gmra.mrb[72].mxu1 %v5215_v59  ;;  %4318 = vmatmul.mubr.f32.gmra.mrb[72].mxu0 %v1336_v22  ;;  %v1340_v59 = vsel %vm1311_vm4, %v1337_v20, %v1339_v56 }
 0x107   : > { %4144 = vmatprep.mubr.msk.f32.mxu1 %vm4837_vm0, %v4838_v1  ;;  %4320 = vmatprep.mubr.msk.f32.mxu0 %vm4837_vm0, %v4838_v1 }
 0x10a   : > { %4145 = vmatmul.mubr.f32.gmra.mrb[74].mxu1 %v5229_v13  ;;  %4321 = vmatmul.mubr.f32.gmra.mrb[74].mxu0 %v1338_v47  ;;  %v1342_v13 = vsel %vm1311_vm4, %v1339_v56, %v1341_v38  ;;  %v1374_v47 = vsel %vm1311_vm4, %v1371_v33, %v1373_v3  ;;  %v1375_v56 = vrot.slane %v5126_v18, 2 }
 0x10b   : > { %4147 = vmatprep.mubr.msk.f32.mxu1 %vm4837_vm0, %v4838_v1  ;;  %4323 = vmatprep.mubr.msk.f32.mxu0 %vm4837_vm0, %v4838_v1 }
 0x10e   : > { %4148 = vmatmul.mubr.f32.gmra.mrb[76].mxu1 %v5243_v32  ;;  %4324 = vmatmul.mubr.f32.gmra.mrb[76].mxu0 %v1340_v59  ;;  %v1344_v32 = vsel %vm1311_vm4, %v1341_v38, %v1343_v61 }
 0x10f   : > { %4150 = vmatprep.mubr.msk.f32.mxu1 %vm4837_vm0, %v4838_v1  ;;  %4326 = vmatprep.mubr.msk.f32.mxu0 %vm4837_vm0, %v4838_v1 }
 0x112   : > { %4151 = vmatmul.mubr.f32.gmra.mrb[78].mxu1 %v5257_v53  ;;  %4327 = vmatmul.mubr.f32.gmra.mrb[78].mxu0 %v1342_v13  ;;  %v1346_v53 = vsel %vm1311_vm4, %v1343_v61, %v1345_v25  ;;  %v1376_v61 = vsel %vm1311_vm4, %v1373_v3, %v1375_v56 }
 0x113   : > { %4153 = vmatprep.mubr.msk.f32.mxu1 %vm4837_vm0, %v4838_v1  ;;  %4329 = vmatprep.mubr.msk.f32.mxu0 %vm4837_vm0, %v4838_v1 }
 0x116   : > { %4154 = vmatmul.mubr.f32.gmra.mrb[80].mxu1 %v5271_v10  ;;  %4330 = vmatmul.mubr.f32.gmra.mrb[80].mxu0 %v1344_v32  ;;  %v1348_v10 = vsel %vm1311_vm4, %v1345_v25, %v1347_v2  ;;  %v1377_v32 = vrot.slane %v5151_v45, 2 }
 0x117   : > { %4156 = vmatprep.mubr.msk.f32.mxu1 %vm4837_vm0, %v4838_v1  ;;  %4332 = vmatprep.mubr.msk.f32.mxu0 %vm4837_vm0, %v4838_v1 }
 0x11a   : > { %4157 = vmatmul.mubr.f32.gmra.mrb[82].mxu1 %v5285_v31  ;;  %4333 = vmatmul.mubr.f32.gmra.mrb[82].mxu0 %v1346_v53  ;;  %v1350_v31 = vsel %vm1311_vm4, %v1347_v2, %v1349_v37 }
 0x11b   : > { %4159 = vmatprep.mubr.msk.f32.mxu1 %vm4837_vm0, %v4838_v1  ;;  %4335 = vmatprep.mubr.msk.f32.mxu0 %vm4837_vm0, %v4838_v1 }
 0x11e   : > { %4160 = vmatmul.mubr.f32.gmra.mrb[84].mxu1 %v5299_v57  ;;  %4336 = vmatmul.mubr.f32.gmra.mrb[84].mxu0 %v1348_v10  ;;  %v1352_v57 = vsel %vm1311_vm4, %v1349_v37, %v1351_v12  ;;  %v1378_v10 = vsel %vm1311_vm4, %v1375_v56, %v1377_v32  ;;  %v1379_v37 = vrot.slane %v5172_v6, 2  ;;  %v1391_v56 = vrot.slane %v5260_v54, 2 }
 0x11f   : > { %4162 = vmatprep.mubr.msk.f32.mxu1 %vm4837_vm0, %v4838_v1  ;;  %4338 = vmatprep.mubr.msk.f32.mxu0 %vm4837_vm0, %v4838_v1 }
 0x122   : > { %4163 = vmatmul.mubr.f32.gmra.mrb[86].mxu1 %v5313_v23  ;;  %4339 = vmatmul.mubr.f32.gmra.mrb[86].mxu0 %v1350_v31  ;;  %v1354_v23 = vsel %vm1311_vm4, %v1351_v12, %v1353_v52 }
 0x123   : > { %4165 = vmatprep.mubr.msk.f32.mxu1 %vm4837_vm0, %v4838_v1  ;;  %4341 = vmatprep.mubr.msk.f32.mxu0 %vm4837_vm0, %v4838_v1 }
 0x126   : > { %4166 = vmatmul.mubr.f32.gmra.mrb[88].mxu1 %v5327_v50  ;;  %4342 = vmatmul.mubr.f32.gmra.mrb[88].mxu0 %v1352_v57  ;;  %v1356_v50 = vsel %vm1311_vm4, %v1353_v52, %v1355_v28  ;;  %v1380_v52 = vsel %vm1311_vm4, %v1377_v32, %v1379_v37 }
 0x127   : > { %4168 = vmatprep.mubr.msk.f32.mxu1 %vm4837_vm0, %v4838_v1  ;;  %4344 = vmatprep.mubr.msk.f32.mxu0 %vm4837_vm0, %v4838_v1 }
 0x12a   : > { %4169 = vmatmul.mubr.f32.gmra.mrb[90].mxu1 %v5341_v44  ;;  %4345 = vmatmul.mubr.f32.gmra.mrb[90].mxu0 %v1354_v23  ;;  %v1358_v44 = vsel %vm1311_vm4, %v1355_v28, %v1357_v4  ;;  %v1381_v23 = vrot.slane %v5188_v27, 2 }
 0x12b   : > { %4171 = vmatprep.mubr.msk.f32.mxu1 %vm4837_vm0, %v4838_v1  ;;  %4347 = vmatprep.mubr.msk.f32.mxu0 %vm4837_vm0, %v4838_v1 }
 0x12e   : > { %4172 = vmatmul.mubr.f32.gmra.mrb[92].mxu1 %v5357_v48  ;;  %4348 = vmatmul.mubr.f32.gmra.mrb[92].mxu0 %v1356_v50  ;;  %v1360_v48 = vsel %vm1311_vm4, %v1357_v4, %v1359_v17 }
 0x12f   : > { %4174 = vmatprep.mubr.msk.f32.mxu1 %vm4837_vm0, %v4838_v1  ;;  %4350 = vmatprep.mubr.msk.f32.mxu0 %vm4837_vm0, %v4838_v1 }
 0x132   : > { %4175 = vmatmul.mubr.f32.gmra.mrb[94].mxu1 %v5372_v8  ;;  %4351 = vmatmul.mubr.f32.gmra.mrb[94].mxu0 %v1358_v44  ;;  %v1362_v8 = vsel %vm1311_vm4, %v1359_v17, %v1361_v16  ;;  %v1382_v44 = vsel %vm1311_vm4, %v1379_v37, %v1381_v23  ;;  %v1383_v17 = vrot.slane %v5204_v0, 2 }
 0x133   : > { %4177 = vmatprep.mubr.msk.f32.mxu1 %vm4837_vm0, %v4838_v1  ;;  %4353 = vmatprep.mubr.msk.f32.mxu0 %vm4837_vm0, %v4838_v1 }
 0x136   : > { %4178 = vmatmul.mubr.f32.gmra.mrb[96].mxu1 %v5389_v30  ;;  %4354 = vmatmul.mubr.f32.gmra.mrb[96].mxu0 %v1360_v48  ;;  %v1364_v30 = vsel %vm1311_vm4, %v1361_v16, %v1363_v26 }
 0x137   : > { %4180 = vmatprep.mubr.msk.f32.mxu1 %vm4837_vm0, %v4838_v1  ;;  %4356 = vmatprep.mubr.msk.f32.mxu0 %vm4837_vm0, %v4838_v1 }
 0x13a   : > { %4181 = vmatmul.mubr.f32.gmra.mrb[98].mxu1 %v5016_v40  ;;  %4357 = vmatmul.mubr.f32.gmra.mrb[98].mxu0 %v1362_v8  ;;  %v1366_v40 = vsel %vm1311_vm4, %v1363_v26, %v1365_v39  ;;  %v1384_v26 = vsel %vm1311_vm4, %v1381_v23, %v1383_v17 }
 0x13b   : > { %4183 = vmatprep.mubr.msk.f32.mxu1 %vm4837_vm0, %v4838_v1  ;;  %4359 = vmatprep.mubr.msk.f32.mxu0 %vm4837_vm0, %v4838_v1 }
 0x13e   : > { %4184 = vmatmul.mubr.f32.gmra.mrb[100].mxu1 %v5019_v41  ;;  %4360 = vmatmul.mubr.f32.gmra.mrb[100].mxu0 %v1364_v30  ;;  %v1368_v41 = vsel %vm1311_vm4, %v1365_v39, %v1367_v43  ;;  %v1385_v30 = vrot.slane %v5218_v60, 2 }
 0x13f   : > { %4186 = vmatprep.mubr.msk.f32.mxu1 %vm4837_vm0, %v4838_v1  ;;  %4362 = vmatprep.mubr.msk.f32.mxu0 %vm4837_vm0, %v4838_v1 }
 0x142   : > { %4187 = vmatmul.mubr.f32.gmra.mrb[102].mxu1 %v5031_v55  ;;  %4363 = vmatmul.mubr.f32.gmra.mrb[102].mxu0 %v1366_v40  ;;  %v1370_v55 = vsel %vm1311_vm4, %v1367_v43, %v1369_v62  ;;  %v1387_v62 = vrot.slane %v5232_v15, 2 }
 0x143   : > { %4189 = vmatprep.mubr.msk.f32.mxu1 %vm4837_vm0, %v4838_v1  ;;  %4365 = vmatprep.mubr.msk.f32.mxu0 %vm4837_vm0, %v4838_v1 }
 0x146   : > { %4190 = vmatmul.mubr.f32.gmra.mrb[104].mxu1 %v5048_v7  ;;  %4366 = vmatmul.mubr.f32.gmra.mrb[104].mxu0 %v1368_v41  ;;  %v1386_v41 = vsel %vm1311_vm4, %v1383_v17, %v1385_v30 }
 0x147   : > { %4192 = vmatprep.mubr.msk.f32.mxu1 %vm4837_vm0, %v4838_v1  ;;  %4368 = vmatprep.mubr.msk.f32.mxu0 %vm4837_vm0, %v4838_v1 }
 0x149   : > { %v5616_v14 = vpop.f32.mrb[0].mxu0  ;;  %v5618_v21 = vpop.f32.mrb[0].mxu1 }
 0x14a   : > { %v3928_v42 = vpop.f32.mrb[1].mxu0  ;;  %4193 = vmatmul.mubr.f32.gmra.mrb[106].mxu1 %v5062_v19  ;;  %4369 = vmatmul.mubr.f32.gmra.mrb[106].mxu0 %v1370_v55  ;;  %v4003_v7 = vpop.f32.mrb[1].mxu1 }
 0x14b   : > { %4195 = vmatprep.mubr.msk.f32.mxu1 %vm4837_vm0, %v4838_v1  ;;  %4371 = vmatprep.mubr.msk.f32.mxu0 %vm4837_vm0, %v4838_v1  ;;  %v1388_v7 = vsel %vm1311_vm4, %v1385_v30, %v1387_v62  ;;  %v1399_v30 = vrot.slane %v5316_v24, 2 }
 0x14d   : > { %v5627_v34 = vpop.f32.mrb[2].mxu0  ;;  %v5629_v22 = vpop.f32.mrb[2].mxu1 }
 0x14e   : > { %v3931_v20 = vpop.f32.mrb[3].mxu0  ;;  %4196 = vmatmul.mubr.f32.gmra.mrb[108].mxu1 %v5088_v46  ;;  %4372 = vmatmul.mubr.f32.gmra.mrb[108].mxu0 %v1372_v51  ;;  %v4006_v19 = vpop.f32.mrb[3].mxu1  ;;  %v1389_v51 = vrot.slane %v5246_v35, 2 }
 0x14f   : > { %4198 = vmatprep.mubr.msk.f32.mxu1 %vm4837_vm0, %v4838_v1  ;;  %4374 = vmatprep.mubr.msk.f32.mxu0 %vm4837_vm0, %v4838_v1 }
 0x150   : > { %v1392_v32 = vsel %vm1311_vm4, %v1389_v51, %v1391_v56 }
 0x151   : > { %v5638_v59 = vpop.f32.mrb[4].mxu0  ;;  %v5640_v38 = vpop.f32.mrb[4].mxu1 }
 0x152   : > { %v3934_v13 = vpop.f32.mrb[5].mxu0  ;;  %4199 = vmatmul.mubr.f32.gmra.mrb[110].mxu1 %v5106_v63  ;;  %4375 = vmatmul.mubr.f32.gmra.mrb[110].mxu0 %v1374_v47  ;;  %v4009_v46 = vpop.f32.mrb[5].mxu1  ;;  %v1390_v47 = vsel %vm1311_vm4, %v1387_v62, %v1389_v51 }
 0x153   : > { %4201 = vmatprep.mubr.msk.f32.mxu1 %vm4837_vm0, %v4838_v1  ;;  %4377 = vmatprep.mubr.msk.f32.mxu0 %vm4837_vm0, %v4838_v1 }
 0x155   : > { %v5649_v25 = vpop.f32.mrb[6].mxu0  ;;  %v5651_v53 = vpop.f32.mrb[6].mxu1 }
 0x156   : > { %v3937_v2 = vpop.f32.mrb[7].mxu0  ;;  %4202 = vmatmul.mubr.f32.gmra.mrb[112].mxu1 %v5126_v18  ;;  %4378 = vmatmul.mubr.f32.gmra.mrb[112].mxu0 %v1376_v61  ;;  %v4012_v63 = vpop.f32.mrb[7].mxu1 }
 0x157   : > { %4204 = vmatprep.mubr.msk.f32.mxu1 %vm4837_vm0, %v4838_v1  ;;  %4380 = vmatprep.mubr.msk.f32.mxu0 %vm4837_vm0, %v4838_v1  ;;  %v1393_v2 = vrot.slane %v5274_v11, 2 }
 0x159   : > { %v5660_v31 = vpop.f32.mrb[8].mxu0  ;;  %v5662_v12 = vpop.f32.mrb[8].mxu1 }
 0x15a   : > { %v3940_v57 = vpop.f32.mrb[9].mxu0  ;;  %4205 = vmatmul.mubr.f32.gmra.mrb[114].mxu1 %v5151_v45  ;;  %4381 = vmatmul.mubr.f32.gmra.mrb[114].mxu0 %v1378_v10  ;;  %v4015_v18 = vpop.f32.mrb[9].mxu1 }
 0x15b   : > { %4207 = vmatprep.mubr.msk.f32.mxu1 %vm4837_vm0, %v4838_v1  ;;  %4383 = vmatprep.mubr.msk.f32.mxu0 %vm4837_vm0, %v4838_v1  ;;  %v1394_v57 = vsel %vm1311_vm4, %v1391_v56, %v1393_v2  ;;  %v1395_v18 = vrot.slane %v5288_v36, 2 }
 0x15d   : > { %v5671_v28 = vpop.f32.mrb[10].mxu0  ;;  %v5673_v50 = vpop.f32.mrb[10].mxu1 }
 0x15e   : > { %v3943_v4 = vpop.f32.mrb[11].mxu0  ;;  %4208 = vmatmul.mubr.f32.gmra.mrb[116].mxu1 %v5172_v6  ;;  %4384 = vmatmul.mubr.f32.gmra.mrb[116].mxu0 %v1380_v52  ;;  %v4018_v45 = vpop.f32.mrb[11].mxu1 }
 0x15f   : > { %4210 = vmatprep.mubr.msk.f32.mxu1 %vm4837_vm0, %v4838_v1  ;;  %4386 = vmatprep.mubr.msk.f32.mxu0 %vm4837_vm0, %v4838_v1  ;;  %v1396_v45 = vsel %vm1311_vm4, %v1393_v2, %v1395_v18 }
 0x161   : > { %v5682_v48 = vpop.f32.mrb[12].mxu0  ;;  %v5684_v16 = vpop.f32.mrb[12].mxu1 }
 0x162   : > { %v3946_v8 = vpop.f32.mrb[13].mxu0  ;;  %4211 = vmatmul.mubr.f32.gmra.mrb[118].mxu1 %v5188_v27  ;;  %4387 = vmatmul.mubr.f32.gmra.mrb[118].mxu0 %v1382_v44  ;;  %v4021_v6 = vpop.f32.mrb[13].mxu1  ;;  %v1397_v44 = vrot.slane %v5302_v58, 2 }
 0x163   : > { %4213 = vmatprep.mubr.msk.f32.mxu1 %vm4837_vm0, %v4838_v1  ;;  %4389 = vmatprep.mubr.msk.f32.mxu0 %vm4837_vm0, %v4838_v1 }
 0x164   : > { %v1400_v62 = vsel %vm1311_vm4, %v1397_v44, %v1399_v30 }
 0x165   : > { %v5693_v39 = vpop.f32.mrb[14].mxu0  ;;  %v5695_v40 = vpop.f32.mrb[14].mxu1 }
 0x166   : > { %v3949_v43 = vpop.f32.mrb[15].mxu0  ;;  %4214 = vmatmul.mubr.f32.gmra.mrb[120].mxu1 %v5204_v0  ;;  %4390 = vmatmul.mubr.f32.gmra.mrb[120].mxu0 %v1384_v26  ;;  %v4024_v27 = vpop.f32.mrb[15].mxu1  ;;  %v1398_v26 = vsel %vm1311_vm4, %v1395_v18, %v1397_v44  ;;  %v1407_v18 = vrot.slane %v5376_v29, 2 }
 0x167   : > { %4216 = vmatprep.mubr.msk.f32.mxu1 %vm4837_vm0, %v4838_v1  ;;  %4392 = vmatprep.mubr.msk.f32.mxu0 %vm4837_vm0, %v4838_v1 }
 0x169   : > { %v5704_v55 = vpop.f32.mrb[16].mxu0  ;;  %v5706_v33 = vpop.f32.mrb[16].mxu1 }
 0x16a   : > { %v3952_v42 = vpop.f32.mrb[17].mxu0  ;;  %4217 = vmatmul.mubr.f32.gmra.mrb[122].mxu1 %v5218_v60  ;;  %4393 = vmatmul.mubr.f32.gmra.mrb[122].mxu0 %v1386_v41  ;;  %v4027_v0 = vpop.f32.mrb[17].mxu1 }
 0x16b   : > { %4219 = vmatprep.mubr.msk.f32.mxu1 %vm4837_vm0, %v4838_v1  ;;  %4395 = vmatprep.mubr.msk.f32.mxu0 %vm4837_vm0, %v4838_v1  ;;  %v1401_v42 = vrot.slane %v5330_v5, 2 }
 0x16d   : > { %v5715_v3 = vpop.f32.mrb[18].mxu0  ;;  %v5717_v20 = vpop.f32.mrb[18].mxu1 }
 0x16e   : > { %v3955_v19 = vpop.f32.mrb[19].mxu0  ;;  %4220 = vmatmul.mubr.f32.gmra.mrb[124].mxu1 %v5232_v15  ;;  %4396 = vmatmul.mubr.f32.gmra.mrb[124].mxu0 %v1388_v7  ;;  %v4030_v60 = vpop.f32.mrb[19].mxu1 }
 0x16f   : > { %4222 = vmatprep.mubr.msk.f32.mxu1 %vm4837_vm0, %v4838_v1  ;;  %4398 = vmatprep.mubr.msk.f32.mxu0 %vm4837_vm0, %v4838_v1  ;;  %v1402_v19 = vsel %vm1311_vm4, %v1399_v30, %v1401_v42  ;;  %v1403_v60 = vrot.slane %v5344_v49, 2 }
 0x171   : > { %v5726_v13 = vpop.f32.mrb[20].mxu0  ;;  %v5728_v46 = vpop.f32.mrb[20].mxu1 }
 0x172   : > { %v3958_v61 = vpop.f32.mrb[21].mxu0  ;;  %4223 = vmatmul.mubr.f32.gmra.mrb[126].mxu1 %v5246_v35  ;;  %4399 = vmatmul.mubr.f32.gmra.mrb[126].mxu0 %v1390_v47  ;;  %v4033_v15 = vpop.f32.mrb[21].mxu1 }
 0x173   : > { %4225 = vmatprep.mubr.msk.f32.mxu1 %vm4837_vm0, %v4838_v1  ;;  %4401 = vmatprep.mubr.msk.f32.mxu0 %vm4837_vm0, %v4838_v1  ;;  %v1404_v15 = vsel %vm1311_vm4, %v1401_v42, %v1403_v60 }
 0x175   : > { %v5737_v63 = vpop.f32.mrb[22].mxu0  ;;  %v5739_v10 = vpop.f32.mrb[22].mxu1 }
 0x176   : > { %v3961_v37 = vpop.f32.mrb[23].mxu0  ;;  %4226 = vmatmul.mubr.f32.gmra.mrb[128].mxu1 %v5260_v54  ;;  %4402 = vmatmul.mubr.f32.gmra.mrb[128].mxu0 %v1392_v32  ;;  %v4036_v35 = vpop.f32.mrb[23].mxu1  ;;  %v1405_v32 = vrot.slane %v5361_v9, 2 }
 0x177   : > { %4228 = vmatprep.mubr.msk.f32.mxu1 %vm4837_vm0, %v4838_v1  ;;  %4404 = vmatprep.mubr.msk.f32.mxu0 %vm4837_vm0, %v4838_v1 }
 0x178   : > { %v1408_v44 = vsel %vm1311_vm4, %v1405_v32, %v1407_v18 }
 0x179   : > { %v5748_v52 = vpop.f32.mrb[24].mxu0  ;;  %v5750_v23 = vpop.f32.mrb[24].mxu1 }
 0x17a   : > { %v3964_v4 = vpop.f32.mrb[25].mxu0  ;;  %4229 = vmatmul.mubr.f32.gmra.mrb[130].mxu1 %v5274_v11  ;;  %4405 = vmatmul.mubr.f32.gmra.mrb[130].mxu0 %v1394_v57  ;;  %v4039_v54 = vpop.f32.mrb[25].mxu1  ;;  %v1406_v57 = vsel %vm1311_vm4, %v1403_v60, %v1405_v32 }
 0x17b   : > { %4231 = vmatprep.mubr.msk.f32.mxu1 %vm4837_vm0, %v4838_v1  ;;  %4407 = vmatprep.mubr.msk.f32.mxu0 %vm4837_vm0, %v4838_v1 }
 0x17d   : > { %v5759_v17 = vpop.f32.mrb[26].mxu0  ;;  %v5761_v8 = vpop.f32.mrb[26].mxu1 }
 0x17e   : > { %v3967_v6 = vpop.f32.mrb[27].mxu0  ;;  %4232 = vmatmul.mubr.f32.gmra.mrb[132].mxu1 %v5288_v36  ;;  %4408 = vmatmul.mubr.f32.gmra.mrb[132].mxu0 %v1396_v45  ;;  %v4042_v11 = vpop.f32.mrb[27].mxu1 }
 0x17f   : > { %4234 = vmatprep.mubr.msk.f32.mxu1 %vm4837_vm0, %v4838_v1  ;;  %4410 = vmatprep.mubr.msk.f32.mxu0 %vm4837_vm0, %v4838_v1 }
 0x181   : > { %v5770_v43 = vpop.f32.mrb[28].mxu0  ;;  %v5772_v27 = vpop.f32.mrb[28].mxu1 }
 0x182   : > { %v3970_v41 = vpop.f32.mrb[29].mxu0  ;;  %4235 = vmatmul.mubr.f32.gmra.mrb[134].mxu1 %v5302_v58  ;;  %4411 = vmatmul.mubr.f32.gmra.mrb[134].mxu0 %v1398_v26  ;;  %v4045_v36 = vpop.f32.mrb[29].mxu1  ;;  %v6925_v26 = vld [vmem:[#allocation16_spill] sm:$0xff] }
 0x183   : > { %4237 = vmatprep.mubr.msk.f32.mxu1 %vm4837_vm0, %v4838_v1  ;;  %4413 = vmatprep.mubr.msk.f32.mxu0 %vm4837_vm0, %v4838_v1 }
 0x185   : > { %v5781_v0 = vpop.f32.mrb[30].mxu0  ;;  %v5783_v7 = vpop.f32.mrb[30].mxu1 }
 0x186   : > { %v3973_v51 = vpop.f32.mrb[31].mxu0  ;;  %4238 = vmatmul.mubr.f32.gmra.mrb[136].mxu1 %v5316_v24  ;;  %4414 = vmatmul.mubr.f32.gmra.mrb[136].mxu0 %v1400_v62  ;;  %v4048_v58 = vpop.f32.mrb[31].mxu1 }
 0x187   : > { %4240 = vmatprep.mubr.msk.f32.mxu1 %vm4837_vm0, %v4838_v1  ;;  %4416 = vmatprep.mubr.msk.f32.mxu0 %vm4837_vm0, %v4838_v1 }
 0x189   : > { %v5792_v47 = vpop.f32.mrb[32].mxu0  ;;  %v5794_v56 = vpop.f32.mrb[32].mxu1 }
 0x18a   : > { %6921 = vst [vmem:[#allocation17_spill] sm:$0xff] %v5794_v56  ;;  %v3976_v61 = vpop.f32.mrb[33].mxu0  ;;  %4241 = vmatmul.mubr.f32.gmra.mrb[138].mxu1 %v5330_v5  ;;  %4417 = vmatmul.mubr.f32.gmra.mrb[138].mxu0 %v1402_v19  ;;  %v4051_v24 = vpop.f32.mrb[33].mxu1 }
 0x18b   : > { %4243 = vmatprep.mubr.msk.f32.mxu1 %vm4837_vm0, %v4838_v1  ;;  %4419 = vmatprep.mubr.msk.f32.mxu0 %vm4837_vm0, %v4838_v1 }
 0x18d   : > { %v5803_v2 = vpop.f32.mrb[34].mxu0  ;;  %v5805_v37 = vpop.f32.mrb[34].mxu1 }
 0x18e   : > { %6922 = vst [vmem:[#allocation18_spill] sm:$0xff] %v5805_v37  ;;  %v3979_v35 = vpop.f32.mrb[35].mxu0  ;;  %4244 = vmatmul.mubr.f32.gmra.mrb[140].mxu1 %v5344_v49  ;;  %4420 = vmatmul.mubr.f32.gmra.mrb[140].mxu0 %v1404_v15  ;;  %v4054_v5 = vpop.f32.mrb[35].mxu1 }
 0x18f   : > { %4246 = vmatprep.mubr.msk.f32.mxu1 %vm4837_vm0, %v4838_v1  ;;  %4422 = vmatprep.mubr.msk.f32.mxu0 %vm4837_vm0, %v4838_v1 }
 0x191   : > { %v5814_v4 = vpop.f32.mrb[36].mxu0  ;;  %v5816_v54 = vpop.f32.mrb[36].mxu1 }
 0x192   : > { %6923 = vst [vmem:[#allocation19_spill] sm:$0xff] %v5816_v54  ;;  %v3982_v45 = vpop.f32.mrb[37].mxu0  ;;  %4247 = vmatmul.mubr.f32.gmra.mrb[142].mxu1 %v5361_v9  ;;  %4423 = vmatmul.mubr.f32.gmra.mrb[142].mxu0 %v1406_v57  ;;  %v4057_v49 = vpop.f32.mrb[37].mxu1 }
 0x193   : > { %4249 = vmatprep.mubr.msk.f32.mxu1 %vm4837_vm0, %v4838_v1  ;;  %4425 = vmatprep.mubr.msk.f32.mxu0 %vm4837_vm0, %v4838_v1 }
 0x195   : > { %v5824_v6 = vpop.f32.mrb[38].mxu0  ;;  %v5826_v29 = vpop.f32.mrb[38].mxu1 }
 0x196   : > { %6924 = vst [vmem:[#allocation20_spill] sm:$0xff] %v5826_v29  ;;  %v3985_v11 = vpop.f32.mrb[39].mxu0  ;;  %4250 = vmatmul.mubr.msk.f32.gmra.mrb[144].mxu1 %vm347_vm1, %v6925_v26  ;;  %4426 = vmatmul.mubr.f32.gmra.mrb[144].mxu0 %v1408_v44  ;;  %v4060_v9 = vpop.f32.mrb[39].mxu1 }
 0x197   : > { %4428 = vmatprep.mubr.msk.f32.mxu0 %vm4837_vm0, %v4838_v1  ;;  %v1874_v1 = vlaneseq }
 0x199   : > { %v5832_v30 = vpop.f32.mrb[40].mxu0  ;;  %v5834_v41 = vpop.f32.mrb[40].mxu1 }
 0x19a   : > { %6926 = vst [vmem:[#allocation16_spill] sm:$0xff] %v5834_v41  ;;  %v3988_v36 = vpop.f32.mrb[41].mxu0  ;;  %4429 = vmatmul.mubr.f32.gmra.mrb[146].mxu0 %v1407_v18  ;;  %v4063_v62 = vpop.f32.mrb[41].mxu1  ;;  %v5848_v18 = vshrl.u32 %v1874_v1, 7 }
 0x19c   : > { %6930 = vst [vmem:[#allocation24_spill] sm:$0xff] %v5848_v18  ;;  %v1925_v9 = vadd.s32 4294967295, %v5848_v18 }
 0x19d   : > { %v5836_v42 = vpop.f32.mrb[42].mxu0  ;;  %v5838_v51 = vpop.f32.mrb[42].mxu1 }
 0x19e   : > { %6927 = vst [vmem:[#allocation21_spill] sm:$0xff] %v5838_v51  ;;  %v3991_v58 = vpop.f32.mrb[43].mxu0  ;;  %v4066_v19 = vpop.f32.mrb[43].mxu1  ;;  %vm1974_vm5 = vcmp.ge.s32.totalorder %v1925_v9, 0 }
 0x19f   : > { %v5857_v58 = vld [vmem:[%s6882_s2] ss:$0 sm:$0xff] }
 0x1a1   : > { %v5840_v60 = vpop.f32.mrb[44].mxu0  ;;  %v5842_v61 = vpop.f32.mrb[44].mxu1 }
 0x1a2   : > { %6928 = vst [vmem:[#allocation22_spill] sm:$0xff] %v5842_v61  ;;  %v3994_v24 = vpop.f32.mrb[45].mxu0  ;;  %v4069_v15 = vpop.f32.mrb[45].mxu1 }
 0x1a5   : > { %v5844_v32 = vpop.f32.mrb[46].mxu0  ;;  %v5846_v35 = vpop.f32.mrb[46].mxu1 }
 0x1a6   : > { %6929 = vst [vmem:[#allocation23_spill] sm:$0xff] %v5846_v35  ;;  %v3997_v5 = vpop.f32.mrb[47].mxu0  ;;  %v4072_v57 = vpop.f32.mrb[47].mxu1 }
 0x1a9   : > { %v5850_v45 = vpop.f32.mrb[48].mxu0  ;;  %v1067_v49 = vpop.f32.mrb[48].mxu1 }
 0x1aa   : > { %v1068_v44 = vadd.f32 %v1067_v49, %v5616_v14  ;;  %v4000_v11 = vpop.f32.mrb[49].mxu0  ;;  %v4107_v26 = vpop.f32.mrb[49].mxu1 }
 0x1ad   : > { %v1072_v36 = vpop.f32.mrb[50].mxu1  ;;  %v1524_v62 = vpop.f32.mrb[50].mxu0 }
 0x1ae   : > { %v1073_v19 = vadd.f32 %v1072_v36, %v5627_v34  ;;  %v1768_v24 = vadd.f32 %v1524_v62, %v1068_v44  ;;  %v4286_v15 = vpop.f32.mrb[51].mxu0  ;;  %v4110_v1 = vpop.f32.mrb[51].mxu1 }
 0x1b0   : > { %v1824_v5 = vadd.f32 %v5857_v58, %v1768_v24 }
 0x1b1   : > { %v1077_v14 = vpop.f32.mrb[52].mxu1  ;;  %v1529_v57 = vpop.f32.mrb[52].mxu0 }
 0x1b2   : > { %v2219_v49 = vsel %vm1974_vm5, %v1824_v5, -inf  ;;  %v1078_v11 = vadd.f32 %v1077_v14, %v5638_v59  ;;  %v1769_v26 = vadd.f32 %v1529_v57, %v1073_v19  ;;  %v4289_v35 = vpop.f32.mrb[53].mxu0  ;;  %v4113_v61 = vpop.f32.mrb[53].mxu1 }
 0x1b3   : > { %v2317_v41 = vrot.slane %v2219_v49, 1  ;;  %v2510_v29 = vrot.slane %v2219_v49, 2 }
 0x1b4   : > { %v1825_v51 = vadd.f32 %v5857_v58, %v1769_v26 }
 0x1b5   : > { %v1082_v54 = vpop.f32.mrb[54].mxu1  ;;  %v1534_v34 = vpop.f32.mrb[54].mxu0 }
 0x1b6   : > { %v2318_v44 = vrot.slane %v1825_v51, 1  ;;  %v2511_v36 = vrot.slane %v1825_v51, 2  ;;  %v1083_v9 = vadd.f32 %v1082_v54, %v5649_v25  ;;  %v1770_v62 = vadd.f32 %v1534_v34, %v1078_v11  ;;  %v4292_v24 = vpop.f32.mrb[55].mxu0  ;;  %v4116_v15 = vpop.f32.mrb[55].mxu1 }
 0x1b8   : > { %v1826_v1 = vadd.f32 %v5857_v58, %v1770_v62  ;;  %v2319_v59 = vsel %vm544_vm2, %v2317_v41, %v2318_v44  ;;  %v2512_v35 = vsel %vm1311_vm4, %v2510_v29, %v2511_v36 }
 0x1b9   : > { %v1087_v61 = vpop.f32.mrb[56].mxu1  ;;  %v1539_v19 = vpop.f32.mrb[56].mxu0  ;;  %v2462_v5 = vmax.f32 %v2219_v49, %v2319_v59 }
 0x1ba   : > { %v2320_v14 = vrot.slane %v1826_v1, 1  ;;  %v2513_v57 = vrot.slane %v1826_v1, 2  ;;  %v1088_v26 = vadd.f32 %v1087_v61, %v5660_v31  ;;  %v1771_v18 = vadd.f32 %v1539_v19, %v1083_v9  ;;  %v4295_v37 = vpop.f32.mrb[57].mxu0  ;;  %v4119_v56 = vpop.f32.mrb[57].mxu1 }
 0x1bb   : > { %v5868_v25 = vmax.f32 %v2462_v5, %v2512_v35 }
 0x1bc   : > { %v1827_v54 = vadd.f32 %v5857_v58, %v1771_v18  ;;  %v2321_v11 = vsel %vm544_vm2, %v2318_v44, %v2320_v14  ;;  %v2514_v41 = vsel %vm1311_vm4, %v2511_v36, %v2513_v57 }
 0x1bd   : > { %v1092_v34 = vpop.f32.mrb[58].mxu1  ;;  %2703 = vadd.xlane.f32.xlu0 %v5868_v25  ;;  %v1544_v29 = vpop.f32.mrb[58].mxu0  ;;  %v2463_v49 = vmax.f32 %v1825_v51, %v2321_v11  ;;  %v2799_v15 = vmul.f32 %v5868_v25, %v5868_v25 }
 0x1be   : > { %v2322_v62 = vrot.slane %v1827_v54, 1  ;;  %v2515_v24 = vrot.slane %v1827_v54, 2  ;;  %v1093_v31 = vadd.f32 %v1092_v34, %v5671_v28  ;;  %v1772_v9 = vadd.f32 %v1544_v29, %v1088_v26  ;;  %v4298_v37 = vpop.f32.mrb[59].mxu0  ;;  %v4122_v56 = vpop.f32.mrb[59].mxu1 }
 0x1bf   : > { %v5877_v18 = vmax.f32 %v2463_v49, %v2514_v41 }
 0x1c0   : > { %v1828_v44 = vadd.f32 %v5857_v58, %v1772_v9  ;;  %v2323_v36 = vsel %vm544_vm2, %v2320_v14, %v2322_v62  ;;  %v2516_v59 = vsel %vm1311_vm4, %v2513_v57, %v2515_v24 }
 0x1c1   : > { %v1097_v35 = vpop.f32.mrb[60].mxu1  ;;  %2847 = vadd.xlane.f32.xlu0 %v2799_v15  ;;  %v1549_v51 = vpop.f32.mrb[60].mxu0  ;;  %v2800_v28 = vmul.f32 %v5877_v18, %v5877_v18  ;;  %v2464_v61 = vmax.f32 %v1826_v1, %v2323_v36 }
 0x1c2   : > { %v2324_v19 = vrot.slane %v1828_v44, 1  ;;  %v2517_v5 = vrot.slane %v1828_v44, 2  ;;  %v1098_v26 = vadd.f32 %v1097_v35, %v5682_v48  ;;  %v1773_v11 = vadd.f32 %v1549_v51, %v1093_v31  ;;  %v4301_v41 = vpop.f32.mrb[61].mxu0  ;;  %v4125_v34 = vpop.f32.mrb[61].mxu1 }
 0x1c3   : > { %2849 = vadd.xlane.f32.xlu1 %v2800_v28  ;;  %v5885_v29 = vmax.f32 %v2464_v61, %v2516_v59 }
 0x1c4   : > { %v1829_v14 = vadd.f32 %v5857_v58, %v1773_v11  ;;  %v2325_v57 = vsel %vm544_vm2, %v2322_v62, %v2324_v19  ;;  %v2518_v49 = vsel %vm1311_vm4, %v2515_v24, %v2517_v5 }
 0x1c5   : > { %v1102_v9 = vpop.f32.mrb[62].mxu1  ;;  %2705 = vadd.xlane.f32.xlu0 %v5877_v18  ;;  %v1554_v1 = vpop.f32.mrb[62].mxu0  ;;  %v2465_v37 = vmax.f32 %v1827_v54, %v2325_v57  ;;  %v2801_v59 = vmul.f32 %v5885_v29, %v5885_v29 }
 0x1c6   : > { %v2326_v56 = vrot.slane %v1829_v14, 1  ;;  %v2519_v15 = vrot.slane %v1829_v14, 2  ;;  %v1103_v48 = vadd.f32 %v1102_v9, %v5693_v39  ;;  %v1774_v31 = vadd.f32 %v1554_v1, %v1098_v26  ;;  %v4304_v36 = vpop.f32.mrb[63].mxu0  ;;  %v4128_v35 = vpop.f32.mrb[63].mxu1 }
 0x1c7   : > { %2707 = vadd.xlane.f32.xlu1 %v5885_v29  ;;  %v5895_v62 = vmax.f32 %v2465_v37, %v2518_v49 }
 0x1c8   : > { %v1830_v24 = vadd.f32 %v5857_v58, %v1774_v31  ;;  %v2327_v51 = vsel %vm544_vm2, %v2324_v19, %v2326_v56  ;;  %v2520_v54 = vsel %vm1311_vm4, %v2517_v5, %v2519_v15 }
 0x1c9   : > { %v1107_v28 = vpop.f32.mrb[64].mxu1  ;;  %2851 = vadd.xlane.f32.xlu0 %v2801_v59  ;;  %v1559_v61 = vpop.f32.mrb[64].mxu0  ;;  %v2466_v39 = vmax.f32 %v1828_v44, %v2327_v51 }
 0x1ca   : > { %v2328_v26 = vrot.slane %v1830_v24, 1  ;;  %v2521_v11 = vrot.slane %v1830_v24, 2  ;;  %v1108_v41 = vadd.f32 %v1107_v28, %v5704_v55  ;;  %v1775_v34 = vadd.f32 %v1559_v61, %v1103_v48  ;;  %v4307_v57 = vpop.f32.mrb[65].mxu0  ;;  %v4131_v9 = vpop.f32.mrb[65].mxu1 }
 0x1cb   : > { %2709 = vadd.xlane.f32.xlu1 %v5895_v62  ;;  %v5902_v49 = vmax.f32 %v2466_v39, %v2520_v54  ;;  %v2802_v55 = vmul.f32 %v5895_v62, %v5895_v62 }
 0x1cc   : > { %v1831_v1 = vadd.f32 %v5857_v58, %v1775_v34  ;;  %v2329_v19 = vsel %vm544_vm2, %v2326_v56, %v2328_v26  ;;  %v2522_v5 = vsel %vm1311_vm4, %v2519_v15, %v2521_v11 }
 0x1cd   : > { %v1112_v37 = vpop.f32.mrb[66].mxu1  ;;  %2711 = vadd.xlane.f32.xlu0 %v5902_v49  ;;  %v1564_v44 = vpop.f32.mrb[66].mxu0  ;;  %v2467_v48 = vmax.f32 %v1829_v14, %v2329_v19  ;;  %v2803_v56 = vmul.f32 %v5902_v49, %v5902_v49 }
 0x1ce   : > { %v2330_v31 = vrot.slane %v1831_v1, 1  ;;  %v2523_v36 = vrot.slane %v1831_v1, 2  ;;  %v1113_v35 = vadd.f32 %v1112_v37, %v5715_v3  ;;  %v1776_v59 = vadd.f32 %v1564_v44, %v1108_v41  ;;  %v4310_v51 = vpop.f32.mrb[67].mxu0  ;;  %v4134_v54 = vpop.f32.mrb[67].mxu1 }
 0x1cf   : > { %2853 = vadd.xlane.f32.xlu1 %v2802_v55  ;;  %v5913_v15 = vmax.f32 %v2467_v48, %v2522_v5 }
 0x1d0   : > { %v1832_v28 = vadd.f32 %v5857_v58, %v1776_v59  ;;  %v2331_v61 = vsel %vm544_vm2, %v2328_v26, %v2330_v31  ;;  %v2524_v39 = vsel %vm1311_vm4, %v2521_v11, %v2523_v36 }
 0x1d1   : > { %v1117_v14 = vpop.f32.mrb[68].mxu1  ;;  %2855 = vadd.xlane.f32.xlu0 %v2803_v56  ;;  %v1569_v34 = vpop.f32.mrb[68].mxu0  ;;  %v2468_v57 = vmax.f32 %v1830_v24, %v2331_v61 }
 0x1d2   : > { %v2332_v3 = vrot.slane %v1832_v28, 1  ;;  %v2525_v41 = vrot.slane %v1832_v28, 2  ;;  %v1118_v9 = vadd.f32 %v1117_v14, %v5726_v13  ;;  %v1777_v19 = vadd.f32 %v1569_v34, %v1113_v35  ;;  %v4313_v37 = vpop.f32.mrb[69].mxu0  ;;  %v4137_v44 = vpop.f32.mrb[69].mxu1 }
 0x1d3   : > { %2713 = vadd.xlane.f32.xlu1 %v5913_v15  ;;  %v5920_v5 = vmax.f32 %v2468_v57, %v2524_v39  ;;  %v2804_v13 = vmul.f32 %v5913_v15, %v5913_v15 }
 0x1d4   : > { %v1833_v55 = vadd.f32 %v5857_v58, %v1777_v19  ;;  %v2333_v26 = vsel %vm544_vm2, %v2330_v31, %v2332_v3  ;;  %v2526_v11 = vsel %vm1311_vm4, %v2523_v36, %v2525_v41 }
 0x1d5   : > { %v1122_v48 = vpop.f32.mrb[70].mxu1  ;;  %2715 = vadd.xlane.f32.xlu0 %v5920_v5  ;;  %v1574_v24 = vpop.f32.mrb[70].mxu0  ;;  %v2469_v35 = vmax.f32 %v1831_v1, %v2333_v26  ;;  %v2805_v31 = vmul.f32 %v5920_v5, %v5920_v5 }
 0x1d6   : > { %v2334_v59 = vrot.slane %v1833_v55, 1  ;;  %v2527_v51 = vrot.slane %v1833_v55, 2  ;;  %v1123_v54 = vadd.f32 %v1122_v48, %v5737_v63  ;;  %v1778_v56 = vadd.f32 %v1574_v24, %v1118_v9  ;;  %v4316_v61 = vpop.f32.mrb[71].mxu0  ;;  %v4140_v39 = vpop.f32.mrb[71].mxu1 }
 0x1d7   : > { %2857 = vadd.xlane.f32.xlu1 %v2804_v13  ;;  %v5931_v36 = vmax.f32 %v2469_v35, %v2526_v11 }
 0x1d8   : > { %v1834_v14 = vadd.f32 %v5857_v58, %v1778_v56  ;;  %v2335_v34 = vsel %vm544_vm2, %v2332_v3, %v2334_v59  ;;  %v2528_v57 = vsel %vm1311_vm4, %v2525_v41, %v2527_v51 }
 0x1d9   : > { %v1127_v1 = vpop.f32.mrb[72].mxu1  ;;  %2859 = vadd.xlane.f32.xlu0 %v2805_v31  ;;  %v1579_v19 = vpop.f32.mrb[72].mxu0  ;;  %v2470_v37 = vmax.f32 %v1832_v28, %v2335_v34 }
 0x1da   : > { %v2336_v63 = vrot.slane %v1834_v14, 1  ;;  %v2529_v9 = vrot.slane %v1834_v14, 2  ;;  %v1128_v44 = vadd.f32 %v1127_v1, %v5748_v52  ;;  %v1779_v26 = vadd.f32 %v1579_v19, %v1123_v54  ;;  %v4319_v48 = vpop.f32.mrb[73].mxu0  ;;  %v4143_v24 = vpop.f32.mrb[73].mxu1 }
 0x1db   : > { %2717 = vadd.xlane.f32.xlu1 %v5931_v36  ;;  %v5938_v11 = vmax.f32 %v2470_v37, %v2528_v57  ;;  %v2806_v52 = vmul.f32 %v5931_v36, %v5931_v36 }
 0x1dc   : > { %v1835_v13 = vadd.f32 %v5857_v58, %v1779_v26  ;;  %v2337_v3 = vsel %vm544_vm2, %v2334_v59, %v2336_v63  ;;  %v2530_v41 = vsel %vm1311_vm4, %v2527_v51, %v2529_v9 }
 0x1dd   : > { %v1132_v35 = vpop.f32.mrb[74].mxu1  ;;  %2719 = vadd.xlane.f32.xlu0 %v5938_v11  ;;  %v1584_v28 = vpop.f32.mrb[74].mxu0  ;;  %v2471_v54 = vmax.f32 %v1833_v55, %v2337_v3  ;;  %v2807_v59 = vmul.f32 %v5938_v11, %v5938_v11 }
 0x1de   : > { %v2338_v56 = vrot.slane %v1835_v13, 1  ;;  %v2531_v61 = vrot.slane %v1835_v13, 2  ;;  %v1133_v39 = vadd.f32 %v1132_v35, %v5759_v17  ;;  %v1780_v31 = vadd.f32 %v1584_v28, %v1128_v44  ;;  %v4322_v34 = vpop.f32.mrb[75].mxu0  ;;  %v4146_v57 = vpop.f32.mrb[75].mxu1 }
 0x1df   : > { %2861 = vadd.xlane.f32.xlu1 %v2806_v52  ;;  %v5949_v51 = vmax.f32 %v2471_v54, %v2530_v41 }
 0x1e0   : > { %v1836_v1 = vadd.f32 %v5857_v58, %v1780_v31  ;;  %v2339_v19 = vsel %vm544_vm2, %v2336_v63, %v2338_v56  ;;  %v2532_v37 = vsel %vm1311_vm4, %v2529_v9, %v2531_v61 }
 0x1e1   : > { %v1137_v55 = vpop.f32.mrb[76].mxu1  ;;  %2863 = vadd.xlane.f32.xlu0 %v2807_v59  ;;  %v1589_v26 = vpop.f32.mrb[76].mxu0  ;;  %v2472_v48 = vmax.f32 %v1834_v14, %v2339_v19 }
 0x1e2   : > { %v2340_v17 = vrot.slane %v1836_v1, 1  ;;  %v2533_v44 = vrot.slane %v1836_v1, 2  ;;  %v1138_v24 = vadd.f32 %v1137_v55, %v5770_v43  ;;  %v1781_v3 = vadd.f32 %v1589_v26, %v1133_v39  ;;  %v4325_v35 = vpop.f32.mrb[77].mxu0  ;;  %v4149_v28 = vpop.f32.mrb[77].mxu1 }
 0x1e3   : > { %2721 = vadd.xlane.f32.xlu1 %v5949_v51  ;;  %v5956_v41 = vmax.f32 %v2472_v48, %v2532_v37  ;;  %v2808_v43 = vmul.f32 %v5949_v51, %v5949_v51 }
 0x1e4   : > { %v1837_v52 = vadd.f32 %v5857_v58, %v1781_v3  ;;  %v2341_v63 = vsel %vm544_vm2, %v2338_v56, %v2340_v17  ;;  %v2534_v9 = vsel %vm1311_vm4, %v2531_v61, %v2533_v44 }
 0x1e5   : > { %v1142_v54 = vpop.f32.mrb[78].mxu1  ;;  %2723 = vadd.xlane.f32.xlu0 %v5956_v41  ;;  %v1594_v14 = vpop.f32.mrb[78].mxu0  ;;  %v2473_v39 = vmax.f32 %v1835_v13, %v2341_v63  ;;  %v2809_v56 = vmul.f32 %v5956_v41, %v5956_v41 }
 0x1e6   : > { %v2342_v31 = vrot.slane %v1837_v52, 1  ;;  %v2535_v34 = vrot.slane %v1837_v52, 2  ;;  %v1143_v57 = vadd.f32 %v1142_v54, %v5781_v0  ;;  %v1782_v59 = vadd.f32 %v1594_v14, %v1138_v24  ;;  %v4328_v19 = vpop.f32.mrb[79].mxu0  ;;  %v4152_v37 = vpop.f32.mrb[79].mxu1 }
 0x1e7   : > { %2865 = vadd.xlane.f32.xlu1 %v2808_v43  ;;  %v5967_v61 = vmax.f32 %v2473_v39, %v2534_v9 }
 0x1e8   : > { %v1838_v55 = vadd.f32 %v5857_v58, %v1782_v59  ;;  %v2343_v26 = vsel %vm544_vm2, %v2340_v17, %v2342_v31  ;;  %v2536_v48 = vsel %vm1311_vm4, %v2533_v44, %v2535_v34 }
 0x1e9   : > { %v1147_v13 = vpop.f32.mrb[80].mxu1  ;;  %2867 = vadd.xlane.f32.xlu0 %v2809_v56  ;;  %v1599_v3 = vpop.f32.mrb[80].mxu0  ;;  %v2474_v35 = vmax.f32 %v1836_v1, %v2343_v26 }
 0x1ea   : > { %v2344_v0 = vrot.slane %v1838_v55, 1  ;;  %v2537_v24 = vrot.slane %v1838_v55, 2  ;;  %v1148_v28 = vadd.f32 %v1147_v13, %v5792_v47  ;;  %v1783_v63 = vadd.f32 %v1599_v3, %v1143_v57  ;;  %v4331_v54 = vpop.f32.mrb[81].mxu0  ;;  %v4155_v14 = vpop.f32.mrb[81].mxu1 }
 0x1eb   : > { %2725 = vadd.xlane.f32.xlu1 %v5967_v61  ;;  %v5974_v9 = vmax.f32 %v2474_v35, %v2536_v48  ;;  %v2810_v47 = vmul.f32 %v5967_v61, %v5967_v61 }
 0x1ec   : > { %v1839_v43 = vadd.f32 %v5857_v58, %v1783_v63  ;;  %v2345_v17 = vsel %vm544_vm2, %v2342_v31, %v2344_v0  ;;  %v2538_v44 = vsel %vm1311_vm4, %v2535_v34, %v2537_v24 }
 0x1ed   : > { %v1152_v39 = vpop.f32.mrb[82].mxu1  ;;  %2727 = vadd.xlane.f32.xlu0 %v5974_v9  ;;  %v1604_v1 = vpop.f32.mrb[82].mxu0  ;;  %v2475_v57 = vmax.f32 %v1837_v52, %v2345_v17  ;;  %v2811_v31 = vmul.f32 %v5974_v9, %v5974_v9 }
 0x1ee   : > { %v2346_v59 = vrot.slane %v1839_v43, 1  ;;  %v2539_v19 = vrot.slane %v1839_v43, 2  ;;  %v1153_v37 = vadd.f32 %v1152_v39, %v5803_v2  ;;  %v1784_v56 = vadd.f32 %v1604_v1, %v1148_v28  ;;  %v4334_v26 = vpop.f32.mrb[83].mxu0  ;;  %v4158_v48 = vpop.f32.mrb[83].mxu1 }
 0x1ef   : > { %2869 = vadd.xlane.f32.xlu1 %v2810_v47  ;;  %v5985_v34 = vmax.f32 %v2475_v57, %v2538_v44 }
 0x1f0   : > { %v1840_v13 = vadd.f32 %v5857_v58, %v1784_v56  ;;  %v2347_v3 = vsel %vm544_vm2, %v2344_v0, %v2346_v59  ;;  %v2540_v35 = vsel %vm1311_vm4, %v2537_v24, %v2539_v19 }
 0x1f1   : > { %v1157_v52 = vpop.f32.mrb[84].mxu1  ;;  %2871 = vadd.xlane.f32.xlu0 %v2811_v31  ;;  %v1609_v63 = vpop.f32.mrb[84].mxu0  ;;  %v2476_v54 = vmax.f32 %v1838_v55, %v2347_v3 }
 0x1f2   : > { %v2348_v2 = vrot.slane %v1840_v13, 1  ;;  %v2541_v28 = vrot.slane %v1840_v13, 2  ;;  %v1158_v14 = vadd.f32 %v1157_v52, %v5814_v4  ;;  %v1785_v17 = vadd.f32 %v1609_v63, %v1153_v37  ;;  %v4337_v39 = vpop.f32.mrb[85].mxu0  ;;  %v4161_v1 = vpop.f32.mrb[85].mxu1 }
 0x1f3   : > { %2729 = vadd.xlane.f32.xlu1 %v5985_v34  ;;  %v5992_v44 = vmax.f32 %v2476_v54, %v2540_v35  ;;  %v2812_v4 = vmul.f32 %v5985_v34, %v5985_v34 }
 0x1f4   : > { %v1841_v47 = vadd.f32 %v5857_v58, %v1785_v17  ;;  %v2349_v0 = vsel %vm544_vm2, %v2346_v59, %v2348_v2  ;;  %v2542_v24 = vsel %vm1311_vm4, %v2539_v19, %v2541_v28 }
 0x1f5   : > { %v1162_v57 = vpop.f32.mrb[86].mxu1  ;;  %2731 = vadd.xlane.f32.xlu0 %v5992_v44  ;;  %v1614_v55 = vpop.f32.mrb[86].mxu0  ;;  %v2477_v37 = vmax.f32 %v1839_v43, %v2349_v0  ;;  %v2813_v59 = vmul.f32 %v5992_v44, %v5992_v44 }
 0x1f6   : > { %v2350_v56 = vrot.slane %v1841_v47, 1  ;;  %v2543_v26 = vrot.slane %v1841_v47, 2  ;;  %v1163_v48 = vadd.f32 %v1162_v57, %v5824_v6  ;;  %v1786_v31 = vadd.f32 %v1614_v55, %v1158_v14  ;;  %v4340_v3 = vpop.f32.mrb[87].mxu0  ;;  %v4164_v35 = vpop.f32.mrb[87].mxu1 }
 0x1f7   : > { %2873 = vadd.xlane.f32.xlu1 %v2812_v4  ;;  %v6003_v19 = vmax.f32 %v2477_v37, %v2542_v24 }
 0x1f8   : > { %v1842_v52 = vadd.f32 %v5857_v58, %v1786_v31  ;;  %v2351_v63 = vsel %vm544_vm2, %v2348_v2, %v2350_v56  ;;  %v2544_v54 = vsel %vm1311_vm4, %v2541_v28, %v2543_v26 }
 0x1f9   : > { %v1167_v43 = vpop.f32.mrb[88].mxu1  ;;  %2875 = vadd.xlane.f32.xlu0 %v2813_v59  ;;  %v1619_v17 = vpop.f32.mrb[88].mxu0  ;;  %v2478_v39 = vmax.f32 %v1840_v13, %v2351_v63 }
 0x1fa   : > { %v2352_v6 = vrot.slane %v1842_v52, 1  ;;  %v2545_v14 = vrot.slane %v1842_v52, 2  ;;  %v1168_v1 = vadd.f32 %v1167_v43, %v5832_v30  ;;  %v1787_v0 = vadd.f32 %v1619_v17, %v1163_v48  ;;  %v4343_v57 = vpop.f32.mrb[89].mxu0  ;;  %v4167_v55 = vpop.f32.mrb[89].mxu1 }
 0x1fb   : > { %2733 = vadd.xlane.f32.xlu1 %v6003_v19  ;;  %v6010_v24 = vmax.f32 %v2478_v39, %v2544_v54  ;;  %v2814_v30 = vmul.f32 %v6003_v19, %v6003_v19 }
 0x1fc   : > { %v1843_v4 = vadd.f32 %v5857_v58, %v1787_v0  ;;  %v2353_v2 = vsel %vm544_vm2, %v2350_v56, %v2352_v6  ;;  %v2546_v28 = vsel %vm1311_vm4, %v2543_v26, %v2545_v14 }
 0x1fd   : > { %v1172_v37 = vpop.f32.mrb[90].mxu1  ;;  %2735 = vadd.xlane.f32.xlu0 %v6010_v24  ;;  %v1624_v13 = vpop.f32.mrb[90].mxu0  ;;  %v2479_v48 = vmax.f32 %v1841_v47, %v2353_v2  ;;  %v2815_v56 = vmul.f32 %v6010_v24, %v6010_v24 }
 0x1fe   : > { %v2354_v31 = vrot.slane %v1843_v4, 1  ;;  %v2547_v3 = vrot.slane %v1843_v4, 2  ;;  %v1173_v35 = vadd.f32 %v1172_v37, %v5836_v42  ;;  %v1788_v59 = vadd.f32 %v1624_v13, %v1168_v1  ;;  %v4346_v63 = vpop.f32.mrb[91].mxu0  ;;  %v4170_v54 = vpop.f32.mrb[91].mxu1 }
 0x1ff   : > { %2877 = vadd.xlane.f32.xlu1 %v2814_v30  ;;  %v6021_v26 = vmax.f32 %v2479_v48, %v2546_v28 }
 0x200   : > { %v1844_v43 = vadd.f32 %v5857_v58, %v1788_v59  ;;  %v2355_v17 = vsel %vm544_vm2, %v2352_v6, %v2354_v31  ;;  %v2548_v39 = vsel %vm1311_vm4, %v2545_v14, %v2547_v3 }
 0x201   : > { %v1177_v47 = vpop.f32.mrb[92].mxu1  ;;  %2879 = vadd.xlane.f32.xlu0 %v2815_v56  ;;  %v1629_v0 = vpop.f32.mrb[92].mxu0  ;;  %v2480_v57 = vmax.f32 %v1842_v52, %v2355_v17 }
 0x202   : > { %v2356_v42 = vrot.slane %v1844_v43, 1  ;;  %v2549_v1 = vrot.slane %v1844_v43, 2  ;;  %v1178_v55 = vadd.f32 %v1177_v47, %v5840_v60  ;;  %v1789_v2 = vadd.f32 %v1629_v0, %v1173_v35  ;;  %v4349_v37 = vpop.f32.mrb[93].mxu0  ;;  %v4173_v13 = vpop.f32.mrb[93].mxu1 }
 0x203   : > { %2737 = vadd.xlane.f32.xlu1 %v6021_v26  ;;  %v6028_v28 = vmax.f32 %v2480_v57, %v2548_v39  ;;  %v2816_v60 = vmul.f32 %v6021_v26, %v6021_v26 }
 0x204   : > { %v1845_v30 = vadd.f32 %v5857_v58, %v1789_v2  ;;  %v2357_v6 = vsel %vm544_vm2, %v2354_v31, %v2356_v42  ;;  %v2550_v14 = vsel %vm1311_vm4, %v2547_v3, %v2549_v1 }
 0x205   : > { %v1182_v48 = vpop.f32.mrb[94].mxu1  ;;  %2739 = vadd.xlane.f32.xlu0 %v6028_v28  ;;  %v1634_v52 = vpop.f32.mrb[94].mxu0  ;;  %v2481_v35 = vmax.f32 %v1843_v4, %v2357_v6  ;;  %v2817_v31 = vmul.f32 %v6028_v28, %v6028_v28 }
 0x206   : > { %v2358_v59 = vrot.slane %v1845_v30, 1  ;;  %v2551_v63 = vrot.slane %v1845_v30, 2  ;;  %v1183_v54 = vadd.f32 %v1182_v48, %v5844_v32  ;;  %v1790_v56 = vadd.f32 %v1634_v52, %v1178_v55  ;;  %v4352_v17 = vpop.f32.mrb[95].mxu0  ;;  %v4176_v39 = vpop.f32.mrb[95].mxu1 }
 0x207   : > { %2881 = vadd.xlane.f32.xlu1 %v2816_v60  ;;  %v6039_v3 = vmax.f32 %v2481_v35, %v2550_v14 }
 0x208   : > { %v1846_v47 = vadd.f32 %v5857_v58, %v1790_v56  ;;  %v2359_v0 = vsel %vm544_vm2, %v2356_v42, %v2358_v59  ;;  %v2552_v57 = vsel %vm1311_vm4, %v2549_v1, %v2551_v63 }
 0x209   : > { %v1187_v4 = vpop.f32.mrb[96].mxu1  ;;  %2883 = vadd.xlane.f32.xlu0 %v2817_v31  ;;  %v1639_v2 = vpop.f32.mrb[96].mxu0  ;;  %v2482_v37 = vmax.f32 %v1844_v43, %v2359_v0 }
 0x20a   : > { %v2360_v32 = vrot.slane %v1846_v47, 1  ;;  %v2553_v55 = vrot.slane %v1846_v47, 2  ;;  %v1188_v13 = vadd.f32 %v1187_v4, %v5850_v45  ;;  %v1791_v6 = vadd.f32 %v1639_v2, %v1183_v54  ;;  %v4355_v48 = vpop.f32.mrb[97].mxu0  ;;  %v4179_v52 = vpop.f32.mrb[97].mxu1 }
 0x20b   : > { %2741 = vadd.xlane.f32.xlu1 %v6039_v3  ;;  %v6046_v14 = vmax.f32 %v2482_v37, %v2552_v57  ;;  %v2818_v45 = vmul.f32 %v6039_v3, %v6039_v3 }
 0x20c   : > { %v1847_v60 = vadd.f32 %v5857_v58, %v1791_v6  ;;  %v2361_v42 = vsel %vm544_vm2, %v2358_v59, %v2360_v32  ;;  %v2554_v1 = vsel %vm1311_vm4, %v2551_v63, %v2553_v55 }
 0x20d   : > { %v1192_v35 = vpop.f32.mrb[98].mxu1  ;;  %2743 = vadd.xlane.f32.xlu0 %v6046_v14  ;;  %v1644_v43 = vpop.f32.mrb[98].mxu0  ;;  %v2483_v54 = vmax.f32 %v1845_v30, %v2361_v42  ;;  %v2819_v59 = vmul.f32 %v6046_v14, %v6046_v14 }
 0x20e   : > { %v2362_v56 = vrot.slane %v1847_v60, 1  ;;  %v2555_v17 = vrot.slane %v1847_v60, 2  ;;  %v1193_v39 = vadd.f32 %v1192_v35, %v5618_v21  ;;  %v1792_v31 = vadd.f32 %v1644_v43, %v1188_v13  ;;  %v4358_v0 = vpop.f32.mrb[99].mxu0  ;;  %v4182_v57 = vpop.f32.mrb[99].mxu1 }
 0x20f   : > { %2885 = vadd.xlane.f32.xlu1 %v2818_v45  ;;  %v6057_v63 = vmax.f32 %v2483_v54, %v2554_v1 }
 0x210   : > { %v1848_v4 = vadd.f32 %v5857_v58, %v1792_v31  ;;  %v2363_v2 = vsel %vm544_vm2, %v2360_v32, %v2362_v56  ;;  %v2556_v37 = vsel %vm1311_vm4, %v2553_v55, %v2555_v17 }
 0x211   : > { %v1197_v30 = vpop.f32.mrb[100].mxu1  ;;  %2887 = vadd.xlane.f32.xlu0 %v2819_v59  ;;  %v1649_v6 = vpop.f32.mrb[100].mxu0  ;;  %v2484_v48 = vmax.f32 %v1846_v47, %v2363_v2 }
 0x212   : > { %v2364_v21 = vrot.slane %v1848_v4, 1  ;;  %v2557_v13 = vrot.slane %v1848_v4, 2  ;;  %v1198_v52 = vadd.f32 %v1197_v30, %v5629_v22  ;;  %v1793_v42 = vadd.f32 %v1649_v6, %v1193_v39  ;;  %v4361_v35 = vpop.f32.mrb[101].mxu0  ;;  %v4185_v43 = vpop.f32.mrb[101].mxu1 }
 0x213   : > { %2745 = vadd.xlane.f32.xlu1 %v6057_v63  ;;  %v6064_v1 = vmax.f32 %v2484_v48, %v2556_v37  ;;  %v2820_v22 = vmul.f32 %v6057_v63, %v6057_v63 }
 0x214   : > { %v1849_v45 = vadd.f32 %v5857_v58, %v1793_v42  ;;  %v2365_v32 = vsel %vm544_vm2, %v2362_v56, %v2364_v21  ;;  %v2558_v55 = vsel %vm1311_vm4, %v2555_v17, %v2557_v13 }
 0x215   : > { %v1202_v54 = vpop.f32.mrb[102].mxu1  ;;  %2747 = vadd.xlane.f32.xlu0 %v6064_v1  ;;  %v1654_v47 = vpop.f32.mrb[102].mxu0  ;;  %v2485_v39 = vmax.f32 %v1847_v60, %v2365_v32  ;;  %v2821_v56 = vmul.f32 %v6064_v1, %v6064_v1 }
 0x216   : > { %v2366_v31 = vrot.slane %v1849_v45, 1  ;;  %v2559_v0 = vrot.slane %v1849_v45, 2  ;;  %v1203_v57 = vadd.f32 %v1202_v54, %v5640_v38  ;;  %v1794_v59 = vadd.f32 %v1654_v47, %v1198_v52  ;;  %v4364_v2 = vpop.f32.mrb[103].mxu0  ;;  %v4188_v37 = vpop.f32.mrb[103].mxu1 }
 0x217   : > { %2889 = vadd.xlane.f32.xlu1 %v2820_v22  ;;  %v6075_v17 = vmax.f32 %v2485_v39, %v2558_v55 }
 0x218   : > { %v1850_v30 = vadd.f32 %v5857_v58, %v1794_v59  ;;  %v2367_v6 = vsel %vm544_vm2, %v2364_v21, %v2366_v31  ;;  %v2560_v48 = vsel %vm1311_vm4, %v2557_v13, %v2559_v0 }
 0x219   : > { %v1207_v60 = vpop.f32.mrb[104].mxu1  ;;  %2891 = vadd.xlane.f32.xlu0 %v2821_v56  ;;  %v1659_v42 = vpop.f32.mrb[104].mxu0  ;;  %v2486_v35 = vmax.f32 %v1848_v4, %v2367_v6 }
 0x21a   : > { %v2368_v38 = vrot.slane %v1850_v30, 1  ;;  %v2561_v52 = vrot.slane %v1850_v30, 2  ;;  %v1208_v43 = vadd.f32 %v1207_v60, %v5651_v53  ;;  %v1795_v32 = vadd.f32 %v1659_v42, %v1203_v57  ;;  %v4367_v54 = vpop.f32.mrb[105].mxu0  ;;  %v4191_v47 = vpop.f32.mrb[105].mxu1 }
 0x21b   : > { %2749 = vadd.xlane.f32.xlu1 %v6075_v17  ;;  %v6082_v55 = vmax.f32 %v2486_v35, %v2560_v48  ;;  %v2822_v53 = vmul.f32 %v6075_v17, %v6075_v17 }
 0x21c   : > { %v1851_v22 = vadd.f32 %v5857_v58, %v1795_v32  ;;  %v2369_v21 = vsel %vm544_vm2, %v2366_v31, %v2368_v38  ;;  %v2562_v13 = vsel %vm1311_vm4, %v2559_v0, %v2561_v52 }
 0x21d   : > { %v1212_v39 = vpop.f32.mrb[106].mxu1  ;;  %2751 = vadd.xlane.f32.xlu0 %v6082_v55  ;;  %v1664_v4 = vpop.f32.mrb[106].mxu0  ;;  %v2487_v57 = vmax.f32 %v1849_v45, %v2369_v21  ;;  %v2823_v31 = vmul.f32 %v6082_v55, %v6082_v55 }
 0x21e   : > { %v2370_v59 = vrot.slane %v1851_v22, 1  ;;  %v2563_v2 = vrot.slane %v1851_v22, 2  ;;  %v1213_v37 = vadd.f32 %v1212_v39, %v5662_v12  ;;  %v1796_v56 = vadd.f32 %v1664_v4, %v1208_v43  ;;  %v4370_v6 = vpop.f32.mrb[107].mxu0  ;;  %v4194_v48 = vpop.f32.mrb[107].mxu1 }
 0x21f   : > { %2893 = vadd.xlane.f32.xlu1 %v2822_v53  ;;  %v6093_v0 = vmax.f32 %v2487_v57, %v2562_v13 }
 0x220   : > { %v1852_v60 = vadd.f32 %v5857_v58, %v1796_v56  ;;  %v2371_v42 = vsel %vm544_vm2, %v2368_v38, %v2370_v59  ;;  %v2564_v35 = vsel %vm1311_vm4, %v2561_v52, %v2563_v2 }
 0x221   : > { %v1217_v45 = vpop.f32.mrb[108].mxu1  ;;  %2895 = vadd.xlane.f32.xlu0 %v2823_v31  ;;  %v1669_v32 = vpop.f32.mrb[108].mxu0  ;;  %v2488_v54 = vmax.f32 %v1850_v30, %v2371_v42 }
 0x222   : > { %v2372_v12 = vrot.slane %v1852_v60, 1  ;;  %v2565_v43 = vrot.slane %v1852_v60, 2  ;;  %v1218_v47 = vadd.f32 %v1217_v45, %v5673_v50  ;;  %v1797_v21 = vadd.f32 %v1669_v32, %v1213_v37  ;;  %v4373_v39 = vpop.f32.mrb[109].mxu0  ;;  %v4197_v4 = vpop.f32.mrb[109].mxu1 }
 0x223   : > { %2753 = vadd.xlane.f32.xlu1 %v6093_v0  ;;  %v6100_v13 = vmax.f32 %v2488_v54, %v2564_v35  ;;  %v2824_v50 = vmul.f32 %v6093_v0, %v6093_v0 }
 0x224   : > { %v1853_v53 = vadd.f32 %v5857_v58, %v1797_v21  ;;  %v2373_v38 = vsel %vm544_vm2, %v2370_v59, %v2372_v12  ;;  %v2566_v52 = vsel %vm1311_vm4, %v2563_v2, %v2565_v43 }
 0x225   : > { %v1222_v57 = vpop.f32.mrb[110].mxu1  ;;  %2755 = vadd.xlane.f32.xlu0 %v6100_v13  ;;  %v1674_v30 = vpop.f32.mrb[110].mxu0  ;;  %v2489_v37 = vmax.f32 %v1851_v22, %v2373_v38  ;;  %v2825_v59 = vmul.f32 %v6100_v13, %v6100_v13 }
 0x226   : > { %v2374_v56 = vrot.slane %v1853_v53, 1  ;;  %v2567_v6 = vrot.slane %v1853_v53, 2  ;;  %v1223_v48 = vadd.f32 %v1222_v57, %v5684_v16  ;;  %v1798_v31 = vadd.f32 %v1674_v30, %v1218_v47  ;;  %v4376_v42 = vpop.f32.mrb[111].mxu0  ;;  %v4200_v35 = vpop.f32.mrb[111].mxu1 }
 0x227   : > { %2897 = vadd.xlane.f32.xlu1 %v2824_v50  ;;  %v6111_v2 = vmax.f32 %v2489_v37, %v2566_v52 }
 0x228   : > { %v1854_v45 = vadd.f32 %v5857_v58, %v1798_v31  ;;  %v2375_v32 = vsel %vm544_vm2, %v2372_v12, %v2374_v56  ;;  %v2568_v54 = vsel %vm1311_vm4, %v2565_v43, %v2567_v6 }
 0x229   : > { %6931 = vst [vmem:[#allocation25_spill] sm:$0xff] %v6111_v2  ;;  %v1227_v22 = vpop.f32.mrb[112].mxu1  ;;  %2899 = vadd.xlane.f32.xlu0 %v2825_v59  ;;  %v1679_v21 = vpop.f32.mrb[112].mxu0  ;;  %v2490_v39 = vmax.f32 %v1852_v60, %v2375_v32 }
 0x22a   : > { %v2376_v16 = vrot.slane %v1854_v45, 1  ;;  %v2569_v47 = vrot.slane %v1854_v45, 2  ;;  %v1228_v4 = vadd.f32 %v1227_v22, %v5695_v40  ;;  %v1799_v38 = vadd.f32 %v1679_v21, %v1223_v48  ;;  %v4379_v57 = vpop.f32.mrb[113].mxu0  ;;  %v4203_v30 = vpop.f32.mrb[113].mxu1 }
 0x22b   : > { %2757 = vadd.xlane.f32.xlu1 %v6111_v2  ;;  %v6118_v52 = vmax.f32 %v2490_v39, %v2568_v54  ;;  %v2826_v40 = vmul.f32 %v6111_v2, %v6111_v2 }
 0x22c   : > { %v1855_v50 = vadd.f32 %v5857_v58, %v1799_v38  ;;  %v2377_v12 = vsel %vm544_vm2, %v2374_v56, %v2376_v16  ;;  %v2570_v43 = vsel %vm1311_vm4, %v2567_v6, %v2569_v47 }
 0x22d   : > { %6932 = vst [vmem:[#allocation26_spill] sm:$0xff] %v6118_v52  ;;  %v1232_v37 = vpop.f32.mrb[114].mxu1  ;;  %2759 = vadd.xlane.f32.xlu0 %v6118_v52  ;;  %v1684_v60 = vpop.f32.mrb[114].mxu0  ;;  %v2491_v48 = vmax.f32 %v1853_v53, %v2377_v12  ;;  %v2827_v56 = vmul.f32 %v6118_v52, %v6118_v52 }
 0x22e   : > { %v2378_v31 = vrot.slane %v1855_v50, 1  ;;  %v2571_v42 = vrot.slane %v1855_v50, 2  ;;  %v1233_v35 = vadd.f32 %v1232_v37, %v5706_v33  ;;  %v1800_v59 = vadd.f32 %v1684_v60, %v1228_v4  ;;  %v4382_v32 = vpop.f32.mrb[115].mxu0  ;;  %v4206_v54 = vpop.f32.mrb[115].mxu1 }
 0x22f   : > { %2901 = vadd.xlane.f32.xlu1 %v2826_v40  ;;  %v6129_v6 = vmax.f32 %v2491_v48, %v2570_v43 }
 0x230   : > { %v1856_v22 = vadd.f32 %v5857_v58, %v1800_v59  ;;  %v2379_v21 = vsel %vm544_vm2, %v2376_v16, %v2378_v31  ;;  %v2572_v39 = vsel %vm1311_vm4, %v2569_v47, %v2571_v42  ;;  %v6141_v58 = vld [vmem:[%s6882_s2] ss:$0 sm:$0xff] }
 0x231   : > { %6933 = vst [vmem:[#allocation27_spill] sm:$0xff] %v6129_v6  ;;  %v1237_v53 = vpop.f32.mrb[116].mxu1  ;;  %2903 = vadd.xlane.f32.xlu0 %v2827_v56  ;;  %v1689_v38 = vpop.f32.mrb[116].mxu0  ;;  %v2492_v57 = vmax.f32 %v1854_v45, %v2379_v21  ;;  %v2828_v48 = vmul.f32 %v6129_v6, %v6129_v6 }
 0x232   : > { %v2380_v33 = vrot.slane %v1856_v22, 1  ;;  %v2573_v4 = vrot.slane %v1856_v22, 2  ;;  %v1238_v30 = vadd.f32 %v1237_v53, %v5717_v20  ;;  %v1801_v12 = vadd.f32 %v1689_v38, %v1233_v35  ;;  %v4385_v37 = vpop.f32.mrb[117].mxu0  ;;  %v4209_v60 = vpop.f32.mrb[117].mxu1 }
 0x233   : > { %2761 = vadd.xlane.f32.xlu1 %v6129_v6  ;;  %v6136_v43 = vmax.f32 %v2492_v57, %v2572_v39 }
 0x234   : > { %v1857_v16 = vadd.f32 %v6141_v58, %v1801_v12  ;;  %v2381_v45 = vsel %vm544_vm2, %v2378_v31, %v2380_v33  ;;  %v2574_v47 = vsel %vm1311_vm4, %v2571_v42, %v2573_v4 }
 0x235   : > { %6934 = vst [vmem:[#allocation28_spill] sm:$0xff] %v6136_v43  ;;  %v1242_v40 = vpop.f32.mrb[118].mxu1  ;;  %2763 = vadd.xlane.f32.xlu0 %v6136_v43  ;;  %v1694_v20 = vpop.f32.mrb[118].mxu0  ;;  %v2493_v35 = vmax.f32 %v1855_v50, %v2381_v45  ;;  %v2829_v31 = vmul.f32 %v6136_v43, %v6136_v43 }
 0x236   : > { %v2382_v59 = vrot.slane %v1857_v16, 1  ;;  %v2575_v32 = vrot.slane %v1857_v16, 2  ;;  %v1243_v54 = vadd.f32 %v1242_v40, %v5728_v46  ;;  %v1802_v56 = vadd.f32 %v1694_v20, %v1238_v30  ;;  %v4388_v21 = vpop.f32.mrb[119].mxu0  ;;  %v4212_v39 = vpop.f32.mrb[119].mxu1 }
 0x237   : > { %2905 = vadd.xlane.f32.xlu1 %v2828_v48  ;;  %v6152_v42 = vmax.f32 %v2493_v35, %v2574_v47 }
 0x238   : > { %v1858_v53 = vadd.f32 %v6141_v58, %v1802_v56  ;;  %v2383_v38 = vsel %vm544_vm2, %v2380_v33, %v2382_v59  ;;  %v2576_v57 = vsel %vm1311_vm4, %v2573_v4, %v2575_v32 }
 0x239   : > { %6935 = vst [vmem:[#allocation29_spill] sm:$0xff] %v6152_v42  ;;  %v1247_v50 = vpop.f32.mrb[120].mxu1  ;;  %2907 = vadd.xlane.f32.xlu0 %v2829_v31  ;;  %v1699_v12 = vpop.f32.mrb[120].mxu0  ;;  %v2494_v37 = vmax.f32 %v1856_v22, %v2383_v38 }
 0x23a   : > { %v2384_v46 = vrot.slane %v1858_v53, 1  ;;  %v2577_v30 = vrot.slane %v1858_v53, 2  ;;  %v1248_v60 = vadd.f32 %v1247_v50, %v5739_v10  ;;  %v1803_v45 = vadd.f32 %v1699_v12, %v1243_v54  ;;  %v4391_v40 = vpop.f32.mrb[121].mxu0  ;;  %v4215_v20 = vpop.f32.mrb[121].mxu1 }
 0x23b   : > { %2765 = vadd.xlane.f32.xlu1 %v6152_v42  ;;  %v6159_v47 = vmax.f32 %v2494_v37, %v2576_v57  ;;  %v2830_v10 = vmul.f32 %v6152_v42, %v6152_v42 }
 0x23c   : > { %v1859_v48 = vadd.f32 %v6141_v58, %v1803_v45  ;;  %v2385_v33 = vsel %vm544_vm2, %v2382_v59, %v2384_v46  ;;  %v2578_v4 = vsel %vm1311_vm4, %v2575_v32, %v2577_v30 }
 0x23d   : > { %6936 = vst [vmem:[#allocation30_spill] sm:$0xff] %v6159_v47  ;;  %v1252_v35 = vpop.f32.mrb[122].mxu1  ;;  %2767 = vadd.xlane.f32.xlu0 %v6159_v47  ;;  %v1704_v22 = vpop.f32.mrb[122].mxu0  ;;  %v2495_v54 = vmax.f32 %v1857_v16, %v2385_v33  ;;  %v2831_v59 = vmul.f32 %v6159_v47, %v6159_v47 }
 0x23e   : > { %v2386_v56 = vrot.slane %v1859_v48, 1  ;;  %v2579_v21 = vrot.slane %v1859_v48, 2  ;;  %v1253_v39 = vadd.f32 %v1252_v35, %v5750_v23  ;;  %v1804_v31 = vadd.f32 %v1704_v22, %v1248_v60  ;;  %v4394_v38 = vpop.f32.mrb[123].mxu0  ;;  %v4218_v57 = vpop.f32.mrb[123].mxu1 }
 0x23f   : > { %2909 = vadd.xlane.f32.xlu1 %v2830_v10  ;;  %v6170_v32 = vmax.f32 %v2495_v54, %v2578_v4 }
 0x240   : > { %v1860_v50 = vadd.f32 %v6141_v58, %v1804_v31  ;;  %v2387_v12 = vsel %vm544_vm2, %v2384_v46, %v2386_v56  ;;  %v2580_v37 = vsel %vm1311_vm4, %v2577_v30, %v2579_v21 }
 0x241   : > { %6937 = vst [vmem:[#allocation31_spill] sm:$0xff] %v6170_v32  ;;  %v1257_v16 = vpop.f32.mrb[124].mxu1  ;;  %2911 = vadd.xlane.f32.xlu0 %v2831_v59  ;;  %v1709_v45 = vpop.f32.mrb[124].mxu0  ;;  %v2496_v40 = vmax.f32 %v1858_v53, %v2387_v12 }
 0x242   : > { %v2388_v23 = vrot.slane %v1860_v50, 1  ;;  %v2581_v60 = vrot.slane %v1860_v50, 2  ;;  %v1258_v20 = vadd.f32 %v1257_v16, %v5761_v8  ;;  %v1805_v33 = vadd.f32 %v1709_v45, %v1253_v39  ;;  %v4397_v35 = vpop.f32.mrb[125].mxu0  ;;  %v4221_v22 = vpop.f32.mrb[125].mxu1 }
 0x243   : > { %2769 = vadd.xlane.f32.xlu1 %v6170_v32  ;;  %v6177_v4 = vmax.f32 %v2496_v40, %v2580_v37  ;;  %v2832_v8 = vmul.f32 %v6170_v32, %v6170_v32 }
 0x244   : > { %v1861_v10 = vadd.f32 %v6141_v58, %v1805_v33  ;;  %v2389_v46 = vsel %vm544_vm2, %v2386_v56, %v2388_v23  ;;  %v2582_v30 = vsel %vm1311_vm4, %v2579_v21, %v2581_v60 }
 0x245   : > { %6938 = vst [vmem:[#allocation32_spill] sm:$0xff] %v6177_v4  ;;  %v1262_v54 = vpop.f32.mrb[126].mxu1  ;;  %2771 = vadd.xlane.f32.xlu0 %v6177_v4  ;;  %v1714_v53 = vpop.f32.mrb[126].mxu0  ;;  %v2497_v39 = vmax.f32 %v1859_v48, %v2389_v46  ;;  %v2833_v56 = vmul.f32 %v6177_v4, %v6177_v4 }
 0x246   : > { %v2390_v31 = vrot.slane %v1861_v10, 1  ;;  %v2583_v38 = vrot.slane %v1861_v10, 2  ;;  %v1263_v57 = vadd.f32 %v1262_v54, %v5772_v27  ;;  %v1806_v59 = vadd.f32 %v1714_v53, %v1258_v20  ;;  %v4400_v12 = vpop.f32.mrb[127].mxu0  ;;  %v4224_v37 = vpop.f32.mrb[127].mxu1 }
 0x247   : > { %2913 = vadd.xlane.f32.xlu1 %v2832_v8  ;;  %v6188_v21 = vmax.f32 %v2497_v39, %v2582_v30 }
 0x248   : > { %v1862_v16 = vadd.f32 %v6141_v58, %v1806_v59  ;;  %v2391_v45 = vsel %vm544_vm2, %v2388_v23, %v2390_v31  ;;  %v2584_v40 = vsel %vm1311_vm4, %v2581_v60, %v2583_v38 }
 0x249   : > { %6939 = vst [vmem:[#allocation33_spill] sm:$0xff] %v6188_v21  ;;  %v1267_v48 = vpop.f32.mrb[128].mxu1  ;;  %2915 = vadd.xlane.f32.xlu0 %v2833_v56  ;;  %v1719_v33 = vpop.f32.mrb[128].mxu0  ;;  %v2498_v35 = vmax.f32 %v1860_v50, %v2391_v45  ;;  %v6941_v45 = vld [vmem:[#allocation17_spill] sm:$0xff] }
 0x24a   : > { %v2392_v27 = vrot.slane %v1862_v16, 1  ;;  %v2585_v20 = vrot.slane %v1862_v16, 2  ;;  %v1268_v22 = vadd.f32 %v1267_v48, %v5783_v7  ;;  %v1807_v46 = vadd.f32 %v1719_v33, %v1263_v57  ;;  %v2704_v54 = vpop.xlane.xlu0 %2703  ;;  %v4403_v53 = vpop.f32.mrb[129].mxu0 }
 0x24b   : > { %v6194_v8 = vmul.f32 0.0078125, %v2704_v54  ;;  %2773 = vadd.xlane.f32.xlu1 %v6188_v21  ;;  %v4227_v30 = vpop.f32.mrb[129].mxu1  ;;  %v6197_v39 = vmax.f32 %v2498_v35, %v2584_v40  ;;  %v2834_v57 = vmul.f32 %v6188_v21, %v6188_v21 }
 0x24c   : > { %v6200_v23 = vadd.f32 %v6141_v58, %v1807_v46  ;;  %v2393_v60 = vsel %vm544_vm2, %v2390_v31, %v2392_v27  ;;  %v2586_v50 = vsel %vm1311_vm4, %v2583_v38, %v2585_v20 }
 0x24d   : > { %6940 = vst [vmem:[#allocation34_spill] sm:$0xff] %v6197_v39  ;;  %v1272_v59 = vpop.f32.mrb[130].mxu1  ;;  %2775 = vadd.xlane.f32.xlu0 %v6197_v39  ;;  %v1724_v7 = vpop.f32.mrb[130].mxu0  ;;  %v2499_v12 = vmax.f32 %v1861_v10, %v2393_v60  ;;  %v3039_v31 = vmul.f32 %v6194_v8, %v6194_v8  ;;  %v2835_v54 = vmul.f32 %v6197_v39, %v6197_v39 }
 0x24e   : > { %v2394_v37 = vrot.slane %v6200_v23, 1  ;;  %v2587_v56 = vrot.slane %v6200_v23, 2  ;;  %v1273_v40 = vadd.f32 %v1272_v59, %v6941_v45  ;;  %v1808_v48 = vadd.f32 %v1724_v7, %v1268_v22  ;;  %v2848_v33 = vpop.xlane.xlu0 %2847  ;;  %v4406_v35 = vpop.f32.mrb[131].mxu0 }
 0x24f   : > { %v2991_v38 = vmul.f32 0.0078125, %v2848_v33  ;;  %2917 = vadd.xlane.f32.xlu1 %v2834_v57  ;;  %v4230_v46 = vpop.f32.mrb[131].mxu1  ;;  %v6214_v53 = vmax.f32 %v2499_v12, %v2586_v50 }
 0x250   : > { %v6217_v10 = vadd.f32 %v6141_v58, %v1808_v48  ;;  %v2850_v30 = vpop.xlane.xlu1 %2849  ;;  %v2395_v60 = vsel %vm544_vm2, %v2392_v27, %v2394_v37  ;;  %v2588_v22 = vsel %vm1311_vm4, %v2585_v20, %v2587_v56  ;;  %v6943_v46 = vld [vmem:[#allocation18_spill] sm:$0xff] }
 0x251   : > { %6942 = vst [vmem:[#allocation17_spill] sm:$0xff] %v6214_v53  ;;  %v3087_v59 = vsub.f32 %v2991_v38, %v3039_v31  ;;  %v1277_v7 = vpop.f32.mrb[132].mxu1  ;;  %2919 = vadd.xlane.f32.xlu0 %v2835_v54  ;;  %v1729_v45 = vpop.f32.mrb[132].mxu0  ;;  %v2500_v33 = vmax.f32 %v1862_v16, %v2395_v60  ;;  %v6945_v31 = vld [vmem:[#allocation24_spill] sm:$0xff]  ;;  %v2992_v16 = vmul.f32 0.0078125, %v2850_v30  ;;  %v2836_v30 = vmul.f32 %v6214_v53, %v6214_v53 }
 0x252   : > { %v2396_v57 = vrot.slane %v6217_v10, 1  ;;  %v2589_v35 = vrot.slane %v6217_v10, 2  ;;  %v1278_v50 = vadd.f32 %v1277_v7, %v6943_v46  ;;  %v1809_v12 = vadd.f32 %v1729_v45, %v1273_v40  ;;  %v2706_v39 = vpop.xlane.xlu0 %2705  ;;  %v4409_v48 = vpop.f32.mrb[133].mxu0 }
 0x253   : > { %v3135_v21 = vmax.f32 %v3087_v59, 0.0  ;;  %v6224_v4 = vmul.f32 0.0078125, %v2706_v39  ;;  %2777 = vadd.xlane.f32.xlu1 %v6214_v53  ;;  %v4233_v27 = vpop.f32.mrb[133].mxu1  ;;  %v6227_v20 = vmax.f32 %v2500_v33, %v2588_v22  ;;  %v1923_v38 = vadd.s32 384, %v6945_v31 }
 0x254   : > { %v6231_v54 = vadd.f32 %v6141_v58, %v1809_v12  ;;  %v2708_v60 = vpop.xlane.xlu1 %2707  ;;  %v2397_v7 = vsel %vm544_vm2, %v2394_v37, %v2396_v57  ;;  %v2590_v40 = vsel %vm1311_vm4, %v2587_v56, %v2589_v35  ;;  %v6946_v37 = vld [vmem:[#allocation19_spill] sm:$0xff] }
 0x255   : > { %6944 = vst [vmem:[#allocation18_spill] sm:$0xff] %v6227_v20  ;;  %v3231_v45 = vadd.f32 1e-05, %v3135_v21  ;;  %v3040_v39 = vmul.f32 %v6224_v4, %v6224_v4  ;;  %v6237_v59 = vmul.f32 0.0078125, %v2708_v60  ;;  %v1282_v46 = vpop.f32.mrb[134].mxu1  ;;  %2779 = vadd.xlane.f32.xlu0 %v6227_v20  ;;  %v1734_v22 = vpop.f32.mrb[134].mxu0  ;;  %v2837_v12 = vmul.f32 %v6227_v20, %v6227_v20 }
 0x256   : > { %v2398_v33 = vrot.slane %v6231_v54, 1  ;;  %v1283_v48 = vadd.f32 %v1282_v46, %v6946_v37  ;;  %v1810_v56 = vadd.f32 %v1734_v22, %v1278_v50  ;;  %v2852_v21 = vpop.xlane.xlu0 %2851  ;;  %v4412_v27 = vpop.f32.mrb[135].mxu0  ;;  %v2501_v46 = vmax.f32 %v6200_v23, %v2397_v7 }
 0x257   : > { %4595 = vrsqrt.f32 %v3231_v45  ;;  %v3088_v31 = vsub.f32 %v2992_v16, %v3040_v39  ;;  %v3041_v60 = vmul.f32 %v6237_v59, %v6237_v59  ;;  %2921 = vadd.xlane.f32.xlu1 %v2836_v30  ;;  %v4236_v32 = vpop.f32.mrb[135].mxu1  ;;  %v2993_v53 = vmul.f32 0.0078125, %v2852_v21  ;;  %v6948_v21 = vld [vmem:[#allocation20_spill] sm:$0xff] }
 0x258   : > { %v6248_v47 = vadd.f32 %v6141_v58, %v1810_v56  ;;  %v2710_v42 = vpop.xlane.xlu1 %2709  ;;  %v2399_v39 = vsel %vm544_vm2, %v2396_v57, %v2398_v33  ;;  %v6947_v30 = vrot.slane %v6231_v54, 2  ;;  %v6261_v23 = vadd.s32 4294967295, %v1923_v38 }
 0x259   : > { %v3136_v50 = vmax.f32 %v3088_v31, 0.0  ;;  %v6253_v22 = vmul.f32 0.0078125, %v2710_v42  ;;  %v1287_v45 = vpop.f32.mrb[136].mxu1  ;;  %v1739_v16 = vpop.f32.mrb[136].mxu0  ;;  %v3089_v56 = vsub.f32 %v2993_v53, %v3041_v60  ;;  %2923 = vadd.xlane.f32.xlu0 %v2837_v12  ;;  %v3183_v42 = vsub.f32 %v5868_v25, %v6194_v8 }
 0x25a   : > { %v2592_v32 = vsel %vm1311_vm4, %v2589_v35, %v6947_v30  ;;  %v6904_v37 = vrot.slane %v6248_v47, 1  ;;  %v1288_v27 = vadd.f32 %v1287_v45, %v6948_v21  ;;  %v2712_v20 = vpop.xlane.xlu0 %2711  ;;  %v4415_v43 = vpop.f32.mrb[137].mxu0  ;;  %v1811_v31 = vadd.f32 %v1739_v16, %v1283_v48 }
 0x25b   : > { %v3232_v7 = vadd.f32 1e-05, %v3136_v50  ;;  %v4239_v6 = vpop.f32.mrb[137].mxu1  ;;  %v3137_v35 = vmax.f32 %v3089_v56, 0.0  ;;  %v6267_v30 = vmul.f32 0.0078125, %v2712_v20  ;;  %v6269_v53 = vmax.f32 %v2501_v46, %v2590_v40 }
 0x25c   : > { %v2854_v60 = vpop.xlane.xlu1 %2853  ;;  %v2502_v12 = vmax.f32 %v6217_v10, %v2399_v39  ;;  %v3042_v43 = vmul.f32 %v6253_v22, %v6253_v22  ;;  %v2401_v48 = vsel %vm544_vm2, %v2398_v33, %v6904_v37  ;;  %v6906_v20 = vrot.slane %v6248_v47, 2  ;;  %v6950_v10 = vld [vmem:[#allocation16_spill] sm:$0xff] }
 0x25d   : > { %6949 = vst [vmem:[#allocation24_spill] sm:$0xff] %v6269_v53  ;;  %4597 = vrsqrt.f32 %v3232_v7  ;;  %v2994_v38 = vmul.f32 0.0078125, %v2854_v60  ;;  %v1292_v25 = vpop.f32.mrb[138].mxu1  ;;  %v1744_v8 = vpop.f32.mrb[138].mxu0  ;;  %v3233_v40 = vadd.f32 1e-05, %v3137_v35  ;;  %2781 = vadd.xlane.f32.xlu1 %v6269_v53  ;;  %v6283_v16 = vadd.f32 %v6141_v58, %v1811_v31 }
 0x25e   : > { %v1293_v46 = vadd.f32 %v1292_v25, %v6950_v10  ;;  %v2856_v50 = vpop.xlane.xlu0 %2855  ;;  %v4418_v45 = vpop.f32.mrb[139].mxu0  ;;  %v3043_v39 = vmul.f32 %v6267_v30, %v6267_v30  ;;  %v6287_v33 = vmax.f32 %v2502_v12, %v2592_v32  ;;  %v1812_v7 = vadd.f32 %v1744_v8, %v1288_v27  ;;  %v6294_v31 = vld [vmem:[%s6883_s3] ss:$0 sm:$0xff] }
 0x25f   : > { %v3090_v56 = vsub.f32 %v2994_v38, %v3042_v43  ;;  %v4242_v21 = vpop.f32.mrb[139].mxu1  ;;  %4599 = vrsqrt.f32 %v3233_v40  ;;  %v2995_v60 = vmul.f32 0.0078125, %v2856_v50  ;;  %v2838_v35 = vmul.f32 %v6269_v53, %v6269_v53  ;;  %v6952_v45 = vld [vmem:[#allocation21_spill] sm:$0xff] }
 0x260   : > { %6951 = vst [vmem:[#allocation19_spill] sm:$0xff] %v6287_v33  ;;  %v2714_v6 = vpop.xlane.xlu1 %2713  ;;  %2783 = vadd.xlane.f32.xlu0 %v6287_v33  ;;  %v2503_v38 = vmax.f32 %v6231_v54, %v2401_v48  ;;  %v6311_v10 = vadd.f32 %v6141_v58, %v1812_v7  ;;  %v6961_v52 = vsub.f32 %v5885_v29, %v6237_v59  ;;  %vm2071_vm6 = vcmp.lt.s32.totalorder %v6261_v23, 384 }
 0x261   : > { %v4596_v25 = vpop.eup %4595  ;;  %v3138_v43 = vmax.f32 %v3090_v56, 0.0  ;;  %v6299_v32 = vmul.f32 0.0078125, %v2714_v6  ;;  %v1297_v27 = vpop.f32.mrb[140].mxu1  ;;  %v3091_v50 = vsub.f32 %v2995_v60, %v3043_v39  ;;  %2925 = vadd.xlane.f32.xlu1 %v2838_v35  ;;  %v6308_v56 = vld [vmem:[%s6884_s4] ss:$0 sm:$0xff] }
 0x262   : > { %v1749_v12 = vpop.f32.mrb[140].mxu0  ;;  %v3327_v8 = vmul.f32 %v4596_v25, %v3183_v42  ;;  %v1298_v21 = vadd.f32 %v1297_v27, %v6952_v45  ;;  %v2716_v37 = vpop.xlane.xlu0 %2715  ;;  %v2839_v42 = vmul.f32 %v6287_v33, %v6287_v33  ;;  %v6957_v33 = vrot.slane %v6283_v16, 1 }
 0x263   : > { %v4421_v57 = vpop.f32.mrb[141].mxu0  ;;  %v3234_v6 = vadd.f32 1e-05, %v3138_v43  ;;  %v1813_v48 = vadd.f32 %v1749_v12, %v1293_v46  ;;  %v4245_v25 = vpop.f32.mrb[141].mxu1  ;;  %v3139_v35 = vmax.f32 %v3091_v50, 0.0  ;;  %v3044_v43 = vmul.f32 %v6299_v32, %v6299_v32 }
 0x264   : > { %v3382_v39 = vmul.f32 %v6294_v31, %v3327_v8  ;;  %v2858_v27 = vpop.xlane.xlu1 %2857  ;;  %2927 = vadd.xlane.f32.xlu0 %v2839_v42  ;;  %v6320_v7 = vmul.f32 0.0078125, %v2716_v37  ;;  %v6953_v46 = vrot.slane %v6231_v54, 2 }
 0x265   : > { %4601 = vrsqrt.f32 %v3234_v6  ;;  %v1302_v8 = vpop.f32.mrb[142].mxu1  ;;  %v1754_v45 = vpop.f32.mrb[142].mxu0  ;;  %v3235_v50 = vadd.f32 1e-05, %v3139_v35  ;;  %v2996_v6 = vmul.f32 0.0078125, %v2858_v27  ;;  %v6334_v54 = vadd.f32 %v6141_v58, %v1813_v48  ;;  %v6956_v35 = vld [vmem:[#allocation22_spill] sm:$0xff] }
 0x266   : > { %v2594_v12 = vsel %vm1311_vm4, %v6953_v46, %v6906_v20  ;;  %v3437_v25 = vadd.f32 %v6308_v56, %v3382_v39  ;;  %v2860_v57 = vpop.xlane.xlu0 %2859  ;;  %v4424_v60 = vpop.f32.mrb[143].mxu0  ;;  %v3045_v46 = vmul.f32 %v6320_v7, %v6320_v7  ;;  %v1303_v27 = vadd.f32 %v1302_v8, %v6956_v35 }
 0x267   : > { %v6328_v40 = vmax.f32 %v2503_v38, %v2594_v12  ;;  %v4598_v42 = vpop.eup %4597  ;;  %v4248_v20 = vpop.f32.mrb[143].mxu1  ;;  %v6955_v38 = vsub.f32 %v5877_v18, %v6224_v4  ;;  %4603 = vrsqrt.f32 %v3235_v50  ;;  %v3092_v60 = vsub.f32 %v2996_v6, %v3044_v43 }
 0x268   : > { %3485 = vst [vmem:[%s4980_s10] sm:$0xff] %v3437_v25  ;;  %v2718_v12 = vpop.xlane.xlu1 %2717  ;;  %v6958_v48 = vrot.slane %v6248_v47, 1  ;;  %v6959_v20 = vrot.slane %v6283_v16, 2  ;;  %v6960_v25 = vrot.slane %v6248_v47, 2  ;;  %v1814_v4 = vadd.f32 %v1754_v45, %v1298_v21 }
 0x269   : > { %6954 = vst [vmem:[#allocation20_spill] sm:$0xff] %v6328_v40  ;;  %v3328_v39 = vmul.f32 %v4598_v42, %v6955_v38  ;;  %2785 = vadd.xlane.f32.xlu1 %v6328_v40  ;;  %v2997_v50 = vmul.f32 0.0078125, %v2860_v57  ;;  %v1307_v42 = vpop.f32.mrb[144].mxu1  ;;  %v1759_v38 = vpop.f32.mrb[144].mxu0  ;;  %v3140_v6 = vmax.f32 %v3092_v60, 0.0  ;;  %v2840_v53 = vmul.f32 %v6328_v40, %v6328_v40 }
 0x26a   : > { %v2403_v37 = vsel %vm544_vm2, %v6958_v48, %v6957_v33  ;;  %v2596_v18 = vsel %vm1311_vm4, %v6960_v25, %v6959_v20  ;;  %v4600_v43 = vpop.eup %4599  ;;  %v2720_v33 = vpop.xlane.xlu0 %2719  ;;  %v2597_v21 = vrot.slane %v6311_v10, 2  ;;  %v6362_v45 = vmul.f32 0.0078125, %v2718_v12 }
 0x26b   : > { %v3383_v8 = vmul.f32 %v6294_v31, %v3328_v39  ;;  %v2504_v35 = vmax.f32 %v6248_v47, %v2403_v37  ;;  %v4427_v48 = vpop.f32.mrb[145].mxu0  ;;  %v3329_v2 = vmul.f32 %v4600_v43, %v6961_v52  ;;  %v3093_v57 = vsub.f32 %v2997_v50, %v3045_v46  ;;  %v4251_v20 = vpop.f32.mrb[145].mxu1  ;;  %v6962_v37 = vld [vmem:[#allocation23_spill] sm:$0xff] }
 0x26c   : > { %v3236_v60 = vadd.f32 1e-05, %v3140_v6  ;;  %v1308_v25 = vadd.f32 %v1307_v42, %v6962_v37  ;;  %v2862_v48 = vpop.xlane.xlu1 %2861  ;;  %v2406_v29 = vrot.slane %v6334_v54, 1  ;;  %v6371_v52 = vadd.f32 %v6141_v58, %v1814_v4 }
 0x26d   : > { %v3438_v39 = vadd.f32 %v6308_v56, %v3383_v8  ;;  %v6365_v47 = vmax.f32 %v2504_v35, %v2596_v18  ;;  %2929 = vadd.xlane.f32.xlu1 %v2840_v53  ;;  %v3384_v40 = vmul.f32 %v6294_v31, %v3329_v2  ;;  %v3141_v59 = vmax.f32 %v3093_v57, 0.0  ;;  %v1764_v46 = vpop.f32.mrb[146].mxu0 }
 0x26e   : > { %4605 = vrsqrt.f32 %v3236_v60  ;;  %v3046_v53 = vmul.f32 %v6362_v45, %v6362_v45  ;;  %v2864_v18 = vpop.xlane.xlu0 %2863  ;;  %v4430_v4 = vpop.f32.mrb[147].mxu0  ;;  %v1815_v8 = vadd.f32 %v1759_v38, %v1303_v27  ;;  %v6382_v6 = vmul.f32 0.0078125, %v2720_v33 }
 0x26f   : > { %3486 = vst [vmem:[%s4980_s10 + $0x8] sm:$0xff] %v3438_v39  ;;  %2787 = vadd.xlane.f32.xlu0 %v6365_v47  ;;  %v2841_v2 = vmul.f32 %v6365_v47, %v6365_v47  ;;  %v4602_v50 = vpop.eup %4601  ;;  %v3439_v42 = vadd.f32 %v6308_v56, %v3384_v40  ;;  %v3237_v43 = vadd.f32 1e-05, %v3141_v59  ;;  %v6963_v35 = vsub.f32 %v5895_v62, %v6253_v22 }
 0x270   : > { %v6964_v20 = vrot.slane %v6311_v10, 1  ;;  %v6965_v39 = vrot.slane %v6283_v16, 1  ;;  %v6966_v37 = vrot.slane %v6283_v16, 2  ;;  %v2998_v12 = vmul.f32 0.0078125, %v2862_v48  ;;  %v2722_v40 = vpop.xlane.xlu1 %2721 }
 0x271   : > { %v3330_v57 = vmul.f32 %v4602_v50, %v6963_v35  ;;  %3487 = vst [vmem:[%s4980_s10 + $0x10] sm:$0xff] %v3439_v42  ;;  %v3189_v27 = vsub.f32 %v5920_v5, %v6320_v7  ;;  %v2408_v38 = vrot.slane %v6371_v52, 1  ;;  %4607 = vrsqrt.f32 %v3237_v43  ;;  %v4604_v22 = vpop.eup %4603 }
 0x272   : > { %v2405_v60 = vsel %vm544_vm2, %v6965_v39, %v6964_v20  ;;  %v2598_v4 = vsel %vm1311_vm4, %v6966_v37, %v2597_v21  ;;  %v6400_v62 = vadd.f32 %v6141_v58, %v1815_v8  ;;  %v3094_v50 = vsub.f32 %v2998_v12, %v3046_v53  ;;  %v2724_v7 = vpop.xlane.xlu0 %2723 }
 0x273   : > { %v3385_v33 = vmul.f32 %v6294_v31, %v3330_v57  ;;  %2931 = vadd.xlane.f32.xlu0 %v2841_v2  ;;  %v2505_v59 = vmax.f32 %v6283_v16, %v2405_v60  ;;  %v6967_v48 = vmov %v6964_v20  ;;  %v6968_v42 = vsub.f32 %v5902_v49, %v6267_v30 }
 0x274   : > { %v2407_v5 = vsel %vm544_vm2, %v6967_v48, %v2406_v29  ;;  %v2601_v8 = vrot.slane %v6371_v52, 2  ;;  %v3047_v2 = vmul.f32 %v6382_v6, %v6382_v6  ;;  %v3142_v35 = vmax.f32 %v3094_v50, 0.0  ;;  %v2866_v39 = vpop.xlane.xlu1 %2865 }
 0x275   : > { %v3331_v43 = vmul.f32 %v4604_v22, %v6968_v42  ;;  %v2506_v16 = vmax.f32 %v6311_v10, %v2407_v5  ;;  %v3440_v12 = vadd.f32 %v6308_v56, %v3385_v33  ;;  %v6417_v53 = vmax.f32 %v2505_v59, %v2598_v4 }
 0x276   : > { %v6969_v57 = vrot.slane %v6334_v54, 2  ;;  %v1816_v60 = vadd.f32 %v1764_v46, %v1308_v25  ;;  %v2999_v37 = vmul.f32 0.0078125, %v2864_v18  ;;  %v2410_v22 = vrot.slane %v6400_v62, 1  ;;  %v2868_v59 = vpop.xlane.xlu0 %2867 }
 0x277   : > { %v3386_v49 = vmul.f32 %v6294_v31, %v3331_v43  ;;  %3488 = vst [vmem:[%s4980_s10 + $0x18] sm:$0xff] %v3440_v12  ;;  %2789 = vadd.xlane.f32.xlu1 %v6417_v53  ;;  %v3238_v10 = vadd.f32 1e-05, %v3142_v35  ;;  %v6428_v4 = vmul.f32 0.0078125, %v2722_v40  ;;  %v6430_v33 = vmul.f32 0.0078125, %v2724_v7 }
 0x278   : > { %v2600_v20 = vsel %vm1311_vm4, %v2597_v21, %v6969_v57  ;;  %v2603_v50 = vrot.slane %v6400_v62, 2  ;;  %v1872_v25 = vadd.f32 %v6141_v58, %v1816_v60  ;;  %v3095_v46 = vsub.f32 %v2999_v37, %v3047_v2  ;;  %v4606_v18 = vpop.eup %4605  ;;  %v2726_v7 = vpop.xlane.xlu1 %2725 }
 0x279   : > { %v6423_v30 = vmax.f32 %v2506_v16, %v2600_v20  ;;  %v3441_v21 = vadd.f32 %v6308_v56, %v3386_v49  ;;  %4609 = vrsqrt.f32 %v3238_v10  ;;  %v2842_v48 = vmul.f32 %v6417_v53, %v6417_v53 }
 0x27a   : > { %v3048_v40 = vmul.f32 %v6428_v4, %v6428_v4  ;;  %v6970_v42 = vsub.f32 %v5913_v15, %v6299_v32  ;;  %v2267_v58 = vsel %vm2071_vm6, %v1872_v25, -inf  ;;  %v3143_v2 = vmax.f32 %v3095_v46, 0.0  ;;  %v2728_v15 = vpop.xlane.xlu0 %2727 }
 0x27b   : > { %2791 = vadd.xlane.f32.xlu0 %v6423_v30  ;;  %v2843_v5 = vmul.f32 %v6423_v30, %v6423_v30  ;;  %3489 = vst [vmem:[%s4980_s10 + $0x20] sm:$0xff] %v3441_v21  ;;  %v3049_v16 = vmul.f32 %v6430_v33, %v6430_v33  ;;  %v2412_v12 = vrot.slane %v2267_v58, 1  ;;  %v2605_v35 = vrot.slane %v2267_v58, 2  ;;  %2933 = vadd.xlane.f32.xlu1 %v2842_v48  ;;  %v4608_v32 = vpop.eup %4607 }
 0x27c   : > { %v3332_v43 = vmul.f32 %v4606_v18, %v6970_v42  ;;  %v2409_v57 = vsel %vm544_vm2, %v2406_v29, %v2408_v38  ;;  %v6971_v20 = vrot.slane %v6334_v54, 2  ;;  %v3239_v60 = vadd.f32 1e-05, %v3143_v2  ;;  %v2870_v18 = vpop.xlane.xlu1 %2869 }
 0x27d   : > { %v2507_v37 = vmax.f32 %v6334_v54, %v2409_v57  ;;  %v3000_v10 = vmul.f32 0.0078125, %v2866_v39  ;;  %v3333_v21 = vmul.f32 %v4608_v32, %v3189_v27  ;;  %v2411_v25 = vsel %vm544_vm2, %v2408_v38, %v2410_v22 }
 0x27e   : > { %v2602_v49 = vsel %vm1311_vm4, %v6971_v20, %v2601_v8  ;;  %v3387_v23 = vmul.f32 %v6294_v31, %v3332_v43  ;;  %v2604_v46 = vsel %vm1311_vm4, %v2601_v8, %v2603_v50  ;;  %v3001_v29 = vmul.f32 0.0078125, %v2868_v59  ;;  %v2872_v27 = vpop.xlane.xlu0 %2871 }
 0x27f   : > { %2935 = vadd.xlane.f32.xlu0 %v2843_v5  ;;  %4611 = vrsqrt.f32 %v3239_v60  ;;  %v6461_v42 = vmax.f32 %v2507_v37, %v2602_v49  ;;  %v3096_v58 = vsub.f32 %v3000_v10, %v3048_v40  ;;  %v3388_v43 = vmul.f32 %v6294_v31, %v3333_v21 }
 0x280   : > { %v3442_v48 = vadd.f32 %v6308_v56, %v3387_v23  ;;  %v2508_v5 = vmax.f32 %v6371_v52, %v2411_v25  ;;  %v3097_v54 = vsub.f32 %v3001_v29, %v3049_v16  ;;  %v6465_v2 = vmul.f32 0.0078125, %v2726_v7  ;;  %v2730_v7 = vpop.xlane.xlu1 %2729 }
 0x281   : > { %2793 = vadd.xlane.f32.xlu1 %v6461_v42  ;;  %v3144_v38 = vmax.f32 %v3096_v58, 0.0  ;;  %v6469_v8 = vmul.f32 0.0078125, %v2728_v15  ;;  %v2413_v39 = vsel %vm544_vm2, %v2410_v22, %v2412_v12  ;;  %v3443_v59 = vadd.f32 %v6308_v56, %v3388_v43 }
 0x282   : > { %3490 = vst [vmem:[%s4980_s10 + $0x28] sm:$0xff] %v3442_v48  ;;  %v3190_v40 = vsub.f32 %v5931_v36, %v6362_v45  ;;  %v6475_v57 = vmax.f32 %v2508_v5, %v2604_v46  ;;  %v3145_v52 = vmax.f32 %v3097_v54, 0.0  ;;  %v2844_v20 = vmul.f32 %v6461_v42, %v6461_v42  ;;  %v2732_v23 = vpop.xlane.xlu0 %2731 }
 0x283   : > { %v3240_v16 = vadd.f32 1e-05, %v3144_v38  ;;  %v3050_v49 = vmul.f32 %v6465_v2, %v6465_v2  ;;  %v3051_v15 = vmul.f32 %v6469_v8, %v6469_v8  ;;  %v4610_v22 = vpop.eup %4609  ;;  %3491 = vst [vmem:[%s4980_s10 + $0x30] sm:$0xff] %v3443_v59  ;;  %v2509_v45 = vmax.f32 %v6400_v62, %v2413_v39 }
 0x284   : > { %2795 = vadd.xlane.f32.xlu0 %v6475_v57  ;;  %v3241_v12 = vadd.f32 1e-05, %v3145_v52  ;;  %v2845_v36 = vmul.f32 %v6475_v57, %v6475_v57  ;;  %v2606_v32 = vsel %vm1311_vm4, %v2603_v50, %v2605_v35  ;;  %v3334_v60 = vmul.f32 %v4610_v22, %v3190_v40  ;;  %v2874_v29 = vpop.xlane.xlu1 %2873 }
 0x285   : > { %4613 = vrsqrt.f32 %v3240_v16  ;;  %2937 = vadd.xlane.f32.xlu1 %v2844_v20  ;;  %v3002_v37 = vmul.f32 0.0078125, %v2870_v18  ;;  %v3003_v10 = vmul.f32 0.0078125, %v2872_v27  ;;  %v6489_v21 = vmax.f32 %v2509_v45, %v2606_v32 }
 0x286   : > { %4615 = vrsqrt.f32 %v3241_v12  ;;  %v6491_v25 = vmul.f32 0.0078125, %v2730_v7  ;;  %v6493_v46 = vmul.f32 0.0078125, %v2732_v23  ;;  %v3389_v48 = vmul.f32 %v6294_v31, %v3334_v60  ;;  %v2876_v43 = vpop.xlane.xlu0 %2875 }
 0x287   : > { %v3098_v58 = vsub.f32 %v3002_v37, %v3050_v49  ;;  %v3099_v62 = vsub.f32 %v3003_v10, %v3051_v15  ;;  %v3004_v50 = vmul.f32 0.0078125, %v2874_v29  ;;  %v3191_v35 = vsub.f32 %v5938_v11, %v6382_v6 }
 0x288   : > { %2939 = vadd.xlane.f32.xlu0 %v2845_v36  ;;  %v3052_v18 = vmul.f32 %v6491_v25, %v6491_v25  ;;  %v3444_v54 = vadd.f32 %v6308_v56, %v3389_v48  ;;  %v3053_v59 = vmul.f32 %v6493_v46, %v6493_v46  ;;  %v3005_v52 = vmul.f32 0.0078125, %v2876_v43  ;;  %v2734_v7 = vpop.xlane.xlu1 %2733 }
 0x289   : > { %v4612_v5 = vpop.eup %4611  ;;  %2797 = vadd.xlane.f32.xlu1 %v6489_v21  ;;  %v3146_v27 = vmax.f32 %v3098_v58, 0.0  ;;  %v3147_v38 = vmax.f32 %v3099_v62, 0.0  ;;  %v2846_v16 = vmul.f32 %v6489_v21, %v6489_v21  ;;  %v6507_v20 = vmul.f32 0.0078125, %v2734_v7 }
 0x28a   : > { %v3335_v39 = vmul.f32 %v4612_v5, %v3191_v35  ;;  %v3100_v40 = vsub.f32 %v3004_v50, %v3052_v18  ;;  %3492 = vst [vmem:[%s4980_s10 + $0x38] sm:$0xff] %v3444_v54  ;;  %v3101_v22 = vsub.f32 %v3005_v52, %v3053_v59  ;;  %v2736_v12 = vpop.xlane.xlu0 %2735  ;;  %v3192_v36 = vsub.f32 %v5949_v51, %v6428_v4 }
 0x28b   : > { %v3242_v11 = vadd.f32 1e-05, %v3146_v27  ;;  %v3243_v6 = vadd.f32 1e-05, %v3147_v38  ;;  %v6512_v45 = vmul.f32 0.0078125, %v2736_v12  ;;  %v3193_v29 = vsub.f32 %v5956_v41, %v6430_v33 }
 0x28c   : > { %v3390_v49 = vmul.f32 %v6294_v31, %v3335_v39  ;;  %v3148_v15 = vmax.f32 %v3100_v40, 0.0  ;;  %v3149_v60 = vmax.f32 %v3101_v22, 0.0  ;;  %v2878_v37 = vpop.xlane.xlu1 %2877  ;;  %v3054_v48 = vmul.f32 %v6507_v20, %v6507_v20 }
 0x28d   : > { %4617 = vrsqrt.f32 %v3242_v11  ;;  %2941 = vadd.xlane.f32.xlu1 %v2846_v16  ;;  %v3006_v58 = vmul.f32 0.0078125, %v2878_v37  ;;  %v3055_v18 = vmul.f32 %v6512_v45, %v6512_v45  ;;  %v3195_v16 = vsub.f32 %v5974_v9, %v6469_v8 }
 0x28e   : > { %v3445_v32 = vadd.f32 %v6308_v56, %v3390_v49  ;;  %4619 = vrsqrt.f32 %v3243_v6  ;;  %v3244_v23 = vadd.f32 1e-05, %v3148_v15  ;;  %v3245_v4 = vadd.f32 1e-05, %v3149_v60  ;;  %v2880_v50 = vpop.xlane.xlu0 %2879 }
 0x28f   : > { %v4614_v10 = vpop.eup %4613  ;;  %v3102_v43 = vsub.f32 %v3006_v58, %v3054_v48  ;;  %v3007_v5 = vmul.f32 0.0078125, %v2880_v50  ;;  %v3194_v6 = vsub.f32 %v5967_v61, %v6465_v2  ;;  %v3196_v37 = vsub.f32 %v5985_v34, %v6491_v25 }
 0x290   : > { %v4616_v62 = vpop.eup %4615  ;;  %3493 = vst [vmem:[%s4980_s10 + $0x40] sm:$0xff] %v3445_v32  ;;  %v3336_v51 = vmul.f32 %v4614_v10, %v3192_v36  ;;  %4621 = vrsqrt.f32 %v3244_v23  ;;  %v2738_v41 = vpop.xlane.xlu1 %2737  ;;  %v3197_v58 = vsub.f32 %v5992_v44, %v6493_v46 }
 0x291   : > { %v3337_v35 = vmul.f32 %v4616_v62, %v3193_v29  ;;  %4623 = vrsqrt.f32 %v3245_v4  ;;  %v3150_v27 = vmax.f32 %v3102_v43, 0.0  ;;  %v3103_v38 = vsub.f32 %v3007_v5, %v3055_v18 }
 0x292   : > { %v3391_v54 = vmul.f32 %v6294_v31, %v3336_v51  ;;  %v6524_v39 = vmul.f32 0.0078125, %v2738_v41  ;;  %v2740_v40 = vpop.xlane.xlu0 %2739 }
 0x293   : > { %v3392_v33 = vmul.f32 %v6294_v31, %v3337_v35  ;;  %v3246_v7 = vadd.f32 1e-05, %v3150_v27  ;;  %v3151_v11 = vmax.f32 %v3103_v38, 0.0  ;;  %v6533_v49 = vmul.f32 0.0078125, %v2740_v40 }
 0x294   : > { %v3446_v59 = vadd.f32 %v6308_v56, %v3391_v54  ;;  %v2882_v15 = vpop.xlane.xlu1 %2881  ;;  %v3056_v36 = vmul.f32 %v6524_v39, %v6524_v39 }
 0x295   : > { %v3447_v52 = vadd.f32 %v6308_v56, %v3392_v33  ;;  %4625 = vrsqrt.f32 %v3246_v7  ;;  %v3247_v12 = vadd.f32 1e-05, %v3151_v11  ;;  %v3008_v32 = vmul.f32 0.0078125, %v2882_v15 }
 0x296   : > { %3494 = vst [vmem:[%s4980_s10 + $0x48] sm:$0xff] %v3446_v59  ;;  %v3057_v61 = vmul.f32 %v6533_v49, %v6533_v49  ;;  %v2884_v9 = vpop.xlane.xlu0 %2883  ;;  %v3198_v7 = vsub.f32 %v6003_v19, %v6507_v20 }
 0x297   : > { %v4618_v22 = vpop.eup %4617  ;;  %3495 = vst [vmem:[%s4980_s10 + $0x50] sm:$0xff] %v3447_v52  ;;  %4627 = vrsqrt.f32 %v3247_v12  ;;  %v3104_v8 = vsub.f32 %v3008_v32, %v3056_v36  ;;  %v3009_v10 = vmul.f32 0.0078125, %v2884_v9  ;;  %v3199_v32 = vsub.f32 %v6010_v24, %v6512_v45 }
 0x298   : > { %v4620_v23 = vpop.eup %4619  ;;  %v3338_v60 = vmul.f32 %v4618_v22, %v3194_v6  ;;  %v2742_v62 = vpop.xlane.xlu1 %2741 }
 0x299   : > { %v3339_v2 = vmul.f32 %v4620_v23, %v3195_v16  ;;  %v3152_v34 = vmax.f32 %v3104_v8, 0.0  ;;  %v3105_v25 = vsub.f32 %v3009_v10, %v3057_v61  ;;  %v6547_v18 = vmul.f32 0.0078125, %v2742_v62 }
 0x29a   : > { %v4622_v29 = vpop.eup %4621  ;;  %v3393_v48 = vmul.f32 %v6294_v31, %v3338_v60  ;;  %v2744_v43 = vpop.xlane.xlu0 %2743 }
 0x29b   : > { %v3394_v51 = vmul.f32 %v6294_v31, %v3339_v2  ;;  %v3340_v4 = vmul.f32 %v4622_v29, %v3196_v37  ;;  %v4624_v50 = vpop.eup %4623  ;;  %v3248_v44 = vadd.f32 1e-05, %v3152_v34  ;;  %v3153_v46 = vmax.f32 %v3105_v25, 0.0 }
 0x29c   : > { %v3448_v35 = vadd.f32 %v6308_v56, %v3393_v48  ;;  %v3341_v41 = vmul.f32 %v4624_v50, %v3197_v58  ;;  %v3058_v33 = vmul.f32 %v6547_v18, %v6547_v18  ;;  %v6554_v27 = vmul.f32 0.0078125, %v2744_v43  ;;  %v2886_v38 = vpop.xlane.xlu1 %2885 }
 0x29d   : > { %v3449_v5 = vadd.f32 %v6308_v56, %v3394_v51  ;;  %v3395_v54 = vmul.f32 %v6294_v31, %v3340_v4  ;;  %4629 = vrsqrt.f32 %v3248_v44  ;;  %v3010_v52 = vmul.f32 0.0078125, %v2886_v38 }
 0x29e   : > { %3496 = vst [vmem:[%s4980_s10 + $0x58] sm:$0xff] %v3448_v35  ;;  %v3396_v40 = vmul.f32 %v6294_v31, %v3341_v41  ;;  %v3249_v11 = vadd.f32 1e-05, %v3153_v46  ;;  %v2888_v6 = vpop.xlane.xlu0 %2887  ;;  %v3059_v22 = vmul.f32 %v6554_v27, %v6554_v27  ;;  %v3200_v25 = vsub.f32 %v6021_v26, %v6524_v39 }
 0x29f   : > { %3497 = vst [vmem:[%s4980_s10 + $0x60] sm:$0xff] %v3449_v5  ;;  %v3450_v59 = vadd.f32 %v6308_v56, %v3395_v54  ;;  %v4626_v16 = vpop.eup %4625  ;;  %v3106_v12 = vsub.f32 %v3010_v52, %v3058_v33  ;;  %v3011_v36 = vmul.f32 0.0078125, %v2888_v6  ;;  %v3201_v46 = vsub.f32 %v6028_v28, %v6533_v49 }
 0x2a0   : > { %v3451_v15 = vadd.f32 %v6308_v56, %v3396_v40  ;;  %v3342_v23 = vmul.f32 %v4626_v16, %v3198_v7  ;;  %4631 = vrsqrt.f32 %v3249_v11  ;;  %v2746_v60 = vpop.xlane.xlu1 %2745 }
 0x2a1   : > { %3498 = vst [vmem:[%s4980_s10 + $0x68] sm:$0xff] %v3450_v59  ;;  %v4628_v37 = vpop.eup %4627  ;;  %v3154_v19 = vmax.f32 %v3106_v12, 0.0  ;;  %v3107_v20 = vsub.f32 %v3011_v36, %v3059_v22  ;;  %v6568_v61 = vmul.f32 0.0078125, %v2746_v60  ;;  %v3202_v36 = vsub.f32 %v6039_v3, %v6547_v18 }
 0x2a2   : > { %3499 = vst [vmem:[%s4980_s10 + $0x70] sm:$0xff] %v3451_v15  ;;  %v3397_v9 = vmul.f32 %v6294_v31, %v3342_v23  ;;  %v3343_v2 = vmul.f32 %v4628_v37, %v3199_v32  ;;  %v2748_v8 = vpop.xlane.xlu0 %2747 }
 0x2a3   : > { %v3250_v10 = vadd.f32 1e-05, %v3154_v19  ;;  %v3155_v29 = vmax.f32 %v3107_v20, 0.0  ;;  %v6573_v45 = vmul.f32 0.0078125, %v2748_v8  ;;  %v3060_v51 = vmul.f32 %v6568_v61, %v6568_v61 }
 0x2a4   : > { %v3452_v48 = vadd.f32 %v6308_v56, %v3397_v9  ;;  %v3398_v24 = vmul.f32 %v6294_v31, %v3343_v2  ;;  %v2890_v58 = vpop.xlane.xlu1 %2889  ;;  %v3203_v9 = vsub.f32 %v6046_v14, %v6554_v27 }
 0x2a5   : > { %4633 = vrsqrt.f32 %v3250_v10  ;;  %v3251_v62 = vadd.f32 1e-05, %v3155_v29  ;;  %v3012_v4 = vmul.f32 0.0078125, %v2890_v58  ;;  %v3061_v43 = vmul.f32 %v6573_v45, %v6573_v45 }
 0x2a6   : > { %3500 = vst [vmem:[%s4980_s10 + $0x78] sm:$0xff] %v3452_v48  ;;  %v3453_v34 = vadd.f32 %v6308_v56, %v3398_v24  ;;  %v2892_v50 = vpop.xlane.xlu0 %2891 }
 0x2a7   : > { %v4630_v35 = vpop.eup %4629  ;;  %4635 = vrsqrt.f32 %v3251_v62  ;;  %v3108_v5 = vsub.f32 %v3012_v4, %v3060_v51  ;;  %v3013_v54 = vmul.f32 0.0078125, %v2892_v50 }
 0x2a8   : > { %3501 = vst [vmem:[%s4980_s10 + $0x80] sm:$0xff] %v3453_v34  ;;  %v3344_v41 = vmul.f32 %v4630_v35, %v3200_v25  ;;  %v2750_v44 = vpop.xlane.xlu1 %2749 }
 0x2a9   : > { %v3156_v33 = vmax.f32 %v3108_v5, 0.0  ;;  %v3109_v38 = vsub.f32 %v3013_v54, %v3061_v43  ;;  %v6586_v59 = vmul.f32 0.0078125, %v2750_v44  ;;  %v3204_v5 = vsub.f32 %v6057_v63, %v6568_v61 }
 0x2aa   : > { %v4632_v26 = vpop.eup %4631  ;;  %v3399_v39 = vmul.f32 %v6294_v31, %v3344_v41  ;;  %v2752_v40 = vpop.xlane.xlu0 %2751 }
 0x2ab   : > { %v3345_v52 = vmul.f32 %v4632_v26, %v3201_v46  ;;  %v3252_v7 = vadd.f32 1e-05, %v3156_v33  ;;  %v3157_v11 = vmax.f32 %v3109_v38, 0.0  ;;  %v3062_v16 = vmul.f32 %v6586_v59, %v6586_v59 }
 0x2ac   : > { %v3454_v6 = vadd.f32 %v6308_v56, %v3399_v39  ;;  %v6592_v15 = vmul.f32 0.0078125, %v2752_v40  ;;  %v2894_v28 = vpop.xlane.xlu1 %2893  ;;  %v3205_v38 = vsub.f32 %v6064_v1, %v6573_v45 }
 0x2ad   : > { %v3400_v49 = vmul.f32 %v6294_v31, %v3345_v52  ;;  %4637 = vrsqrt.f32 %v3252_v7  ;;  %v3253_v22 = vadd.f32 1e-05, %v3157_v11  ;;  %v3014_v12 = vmul.f32 0.0078125, %v2894_v28 }
 0x2ae   : > { %3502 = vst [vmem:[%s4980_s10 + $0x88] sm:$0xff] %v3454_v6  ;;  %v3063_v32 = vmul.f32 %v6592_v15, %v6592_v15  ;;  %v2896_v23 = vpop.xlane.xlu0 %2895 }
 0x2af   : > { %v4634_v60 = vpop.eup %4633  ;;  %v3455_v37 = vadd.f32 %v6308_v56, %v3400_v49  ;;  %4639 = vrsqrt.f32 %v3253_v22  ;;  %v3110_v19 = vsub.f32 %v3014_v12, %v3062_v16  ;;  %v3015_v20 = vmul.f32 0.0078125, %v2896_v23 }
 0x2b0   : > { %v3346_v2 = vmul.f32 %v4634_v60, %v3202_v36  ;;  %v2754_v8 = vpop.xlane.xlu1 %2753  ;;  %v3206_v60 = vsub.f32 %v6075_v17, %v6586_v59 }
 0x2b1   : > { %v4636_v10 = vpop.eup %4635  ;;  %3503 = vst [vmem:[%s4980_s10 + $0x90] sm:$0xff] %v3455_v37  ;;  %v3158_v29 = vmax.f32 %v3110_v19, 0.0  ;;  %v3111_v3 = vsub.f32 %v3015_v20, %v3063_v32  ;;  %v6604_v18 = vmul.f32 0.0078125, %v2754_v8  ;;  %v3207_v8 = vsub.f32 %v6082_v55, %v6592_v15 }
 0x2b2   : > { %v3401_v48 = vmul.f32 %v6294_v31, %v3346_v2  ;;  %v3347_v24 = vmul.f32 %v4636_v10, %v3203_v9  ;;  %v2756_v58 = vpop.xlane.xlu0 %2755 }
 0x2b3   : > { %v3254_v62 = vadd.f32 1e-05, %v3158_v29  ;;  %v3159_v51 = vmax.f32 %v3111_v3, 0.0  ;;  %v6609_v14 = vmul.f32 0.0078125, %v2756_v58  ;;  %v3064_v50 = vmul.f32 %v6604_v18, %v6604_v18 }
 0x2b4   : > { %v3456_v4 = vadd.f32 %v6308_v56, %v3401_v48  ;;  %v3402_v34 = vmul.f32 %v6294_v31, %v3347_v24  ;;  %v2898_v27 = vpop.xlane.xlu1 %2897 }
 0x2b5   : > { %4641 = vrsqrt.f32 %v3254_v62  ;;  %v3255_v25 = vadd.f32 1e-05, %v3159_v51  ;;  %v3016_v35 = vmul.f32 0.0078125, %v2898_v27  ;;  %v3065_v44 = vmul.f32 %v6609_v14, %v6609_v14 }
 0x2b6   : > { %3504 = vst [vmem:[%s4980_s10 + $0x98] sm:$0xff] %v3456_v4  ;;  %v3457_v43 = vadd.f32 %v6308_v56, %v3402_v34  ;;  %v2900_v54 = vpop.xlane.xlu0 %2899 }
 0x2b7   : > { %v4638_v41 = vpop.eup %4637  ;;  %4643 = vrsqrt.f32 %v3255_v25  ;;  %v3112_v46 = vsub.f32 %v3016_v35, %v3064_v50  ;;  %v3017_v33 = vmul.f32 0.0078125, %v2900_v54 }
 0x2b8   : > { %3505 = vst [vmem:[%s4980_s10 + $0xa0] sm:$0xff] %v3457_v43  ;;  %v3348_v26 = vmul.f32 %v4638_v41, %v3204_v5  ;;  %v2758_v39 = vpop.xlane.xlu1 %2757  ;;  %v3208_v5 = vsub.f32 %v6093_v0, %v6604_v18 }
 0x2b9   : > { %v4640_v40 = vpop.eup %4639  ;;  %v3160_v52 = vmax.f32 %v3112_v46, 0.0  ;;  %v3113_v7 = vsub.f32 %v3017_v33, %v3065_v44  ;;  %v6622_v11 = vmul.f32 0.0078125, %v2758_v39 }
 0x2ba   : > { %v3403_v63 = vmul.f32 %v6294_v31, %v3348_v26  ;;  %v3349_v61 = vmul.f32 %v4640_v40, %v3205_v38  ;;  %v2760_v6 = vpop.xlane.xlu0 %2759  ;;  %v3209_v38 = vsub.f32 %v6100_v13, %v6609_v14 }
 0x2bb   : > { %v3256_v16 = vadd.f32 1e-05, %v3160_v52  ;;  %v3161_v28 = vmax.f32 %v3113_v7, 0.0  ;;  %v6627_v1 = vmul.f32 0.0078125, %v2760_v6  ;;  %v3066_v36 = vmul.f32 %v6622_v11, %v6622_v11 }
 0x2bc   : > { %v3458_v49 = vadd.f32 %v6308_v56, %v3403_v63  ;;  %v3404_v22 = vmul.f32 %v6294_v31, %v3349_v61  ;;  %v2902_v45 = vpop.xlane.xlu1 %2901 }
 0x2bd   : > { %4645 = vrsqrt.f32 %v3256_v16  ;;  %v3257_v12 = vadd.f32 1e-05, %v3161_v28  ;;  %v3018_v32 = vmul.f32 0.0078125, %v2902_v45  ;;  %v3067_v20 = vmul.f32 %v6627_v1, %v6627_v1 }
 0x2be   : > { %3506 = vst [vmem:[%s4980_s10 + $0xa8] sm:$0xff] %v3458_v49  ;;  %v3459_v23 = vadd.f32 %v6308_v56, %v3404_v22  ;;  %v2904_v37 = vpop.xlane.xlu0 %2903 }
 0x2bf   : > { %v4642_v19 = vpop.eup %4641  ;;  %4647 = vrsqrt.f32 %v3257_v12  ;;  %v3114_v9 = vsub.f32 %v3018_v32, %v3066_v36  ;;  %v3019_v2 = vmul.f32 0.0078125, %v2904_v37  ;;  %v6972_v32 = vld [vmem:[#allocation25_spill] sm:$0xff] }
 0x2c0   : > { %3507 = vst [vmem:[%s4980_s10 + $0xb0] sm:$0xff] %v3459_v23  ;;  %v3350_v10 = vmul.f32 %v4642_v19, %v3206_v60  ;;  %v2762_v29 = vpop.xlane.xlu1 %2761  ;;  %v3210_v23 = vsub.f32 %v6972_v32, %v6622_v11  ;;  %v6681_v11 = vld [vmem:[%s6883_s3] ss:$0 sm:$0xff] }
 0x2c1   : > { %v4644_v3 = vpop.eup %4643  ;;  %v3162_v48 = vmax.f32 %v3114_v9, 0.0  ;;  %v3115_v24 = vsub.f32 %v3019_v2, %v3067_v20  ;;  %v6640_v58 = vmul.f32 0.0078125, %v2762_v29  ;;  %v6973_v9 = vld [vmem:[#allocation26_spill] sm:$0xff] }
 0x2c2   : > { %v3405_v17 = vmul.f32 %v6294_v31, %v3350_v10  ;;  %v3351_v59 = vmul.f32 %v4644_v3, %v3207_v8  ;;  %v2764_v62 = vpop.xlane.xlu0 %2763  ;;  %v3211_v2 = vsub.f32 %v6973_v9, %v6627_v1 }
 0x2c3   : > { %v3258_v51 = vadd.f32 1e-05, %v3162_v48  ;;  %v3163_v4 = vmax.f32 %v3115_v24, 0.0  ;;  %v6645_v55 = vmul.f32 0.0078125, %v2764_v62  ;;  %v3068_v50 = vmul.f32 %v6640_v58, %v6640_v58 }
 0x2c4   : > { %v3460_v34 = vadd.f32 %v6308_v56, %v3405_v17  ;;  %v3406_v27 = vmul.f32 %v6294_v31, %v3351_v59  ;;  %v2906_v15 = vpop.xlane.xlu1 %2905 }
 0x2c5   : > { %4649 = vrsqrt.f32 %v3258_v51  ;;  %v3259_v25 = vadd.f32 1e-05, %v3163_v4  ;;  %v3020_v35 = vmul.f32 0.0078125, %v2906_v15  ;;  %v3069_v44 = vmul.f32 %v6645_v55, %v6645_v55 }
 0x2c6   : > { %3508 = vst [vmem:[%s4980_s10 + $0xb8] sm:$0xff] %v3460_v34  ;;  %v3461_v43 = vadd.f32 %v6308_v56, %v3406_v27  ;;  %v2908_v54 = vpop.xlane.xlu0 %2907 }
 0x2c7   : > { %v4646_v41 = vpop.eup %4645  ;;  %4651 = vrsqrt.f32 %v3259_v25  ;;  %v3116_v46 = vsub.f32 %v3020_v35, %v3068_v50  ;;  %v3021_v33 = vmul.f32 0.0078125, %v2908_v54 }
 0x2c8   : > { %3509 = vst [vmem:[%s4980_s10 + $0xc0] sm:$0xff] %v3461_v43  ;;  %v3352_v26 = vmul.f32 %v4646_v41, %v3208_v5  ;;  %v2766_v39 = vpop.xlane.xlu1 %2765  ;;  %v6974_v5 = vld [vmem:[#allocation27_spill] sm:$0xff] }
 0x2c9   : > { %v4648_v40 = vpop.eup %4647  ;;  %v3164_v52 = vmax.f32 %v3116_v46, 0.0  ;;  %v3117_v7 = vsub.f32 %v3021_v33, %v3069_v44  ;;  %v6658_v63 = vmul.f32 0.0078125, %v2766_v39  ;;  %v3212_v54 = vsub.f32 %v6974_v5, %v6640_v58 }
 0x2ca   : > { %v3407_v0 = vmul.f32 %v6294_v31, %v3352_v26  ;;  %v3353_v18 = vmul.f32 %v4648_v40, %v3209_v38  ;;  %v2768_v61 = vpop.xlane.xlu0 %2767  ;;  %v6975_v26 = vld [vmem:[#allocation28_spill] sm:$0xff] }
 0x2cb   : > { %v3260_v6 = vadd.f32 1e-05, %v3164_v52  ;;  %v3165_v16 = vmax.f32 %v3117_v7, 0.0  ;;  %v6663_v13 = vmul.f32 0.0078125, %v2768_v61  ;;  %v3070_v45 = vmul.f32 %v6658_v63, %v6658_v63 }
 0x2cc   : > { %v3462_v28 = vadd.f32 %v6308_v56, %v3407_v0  ;;  %v3408_v49 = vmul.f32 %v6294_v31, %v3353_v18  ;;  %v2910_v14 = vpop.xlane.xlu1 %2909  ;;  %v3213_v39 = vsub.f32 %v6975_v26, %v6645_v55  ;;  %v6979_v26 = vld [vmem:[#allocation32_spill] sm:$0xff] }
 0x2cd   : > { %4653 = vrsqrt.f32 %v3260_v6  ;;  %v3261_v22 = vadd.f32 1e-05, %v3165_v16  ;;  %v3022_v12 = vmul.f32 0.0078125, %v2910_v14  ;;  %v3071_v31 = vmul.f32 %v6663_v13, %v6663_v13 }
 0x2ce   : > { %3510 = vst [vmem:[%s4980_s10 + $0xc8] sm:$0xff] %v3462_v28  ;;  %v3463_v36 = vadd.f32 %v6308_v56, %v3408_v49  ;;  %v2912_v60 = vpop.xlane.xlu0 %2911  ;;  %v6705_v49 = vld [vmem:[%s6884_s4] ss:$0 sm:$0xff] }
 0x2cf   : > { %v4650_v37 = vpop.eup %4649  ;;  %4655 = vrsqrt.f32 %v3261_v22  ;;  %v3118_v19 = vsub.f32 %v3022_v12, %v3070_v45  ;;  %v3023_v20 = vmul.f32 0.0078125, %v2912_v60  ;;  %v6976_v60 = vld [vmem:[#allocation29_spill] sm:$0xff] }
 0x2d0   : > { %3511 = vst [vmem:[%s4980_s10 + $0xd0] sm:$0xff] %v3463_v36  ;;  %v3354_v8 = vmul.f32 %v4650_v37, %v3210_v23  ;;  %v2770_v10 = vpop.xlane.xlu1 %2769  ;;  %v3214_v37 = vsub.f32 %v6976_v60, %v6658_v63 }
 0x2d1   : > { %v4652_v29 = vpop.eup %4651  ;;  %v3166_v3 = vmax.f32 %v3118_v19, 0.0  ;;  %v3119_v48 = vsub.f32 %v3023_v20, %v3071_v31  ;;  %v6676_v24 = vmul.f32 0.0078125, %v2770_v10 }
 0x2d2   : > { %v3409_v17 = vmul.f32 %v6681_v11, %v3354_v8  ;;  %v3355_v59 = vmul.f32 %v4652_v29, %v3211_v2  ;;  %v2772_v62 = vpop.xlane.xlu0 %2771  ;;  %v6977_v8 = vld [vmem:[#allocation30_spill] sm:$0xff] }
 0x2d3   : > { %v3262_v51 = vadd.f32 1e-05, %v3166_v3  ;;  %v3167_v4 = vmax.f32 %v3119_v48, 0.0  ;;  %v6686_v27 = vmul.f32 0.0078125, %v2772_v62  ;;  %v3072_v50 = vmul.f32 %v6676_v24, %v6676_v24 }
 0x2d4   : > { %v3464_v1 = vadd.f32 %v6308_v56, %v3409_v17  ;;  %v3410_v34 = vmul.f32 %v6681_v11, %v3355_v59  ;;  %v2914_v15 = vpop.xlane.xlu1 %2913  ;;  %v3215_v10 = vsub.f32 %v6977_v8, %v6663_v13 }
 0x2d5   : > { %4657 = vrsqrt.f32 %v3262_v51  ;;  %v3263_v25 = vadd.f32 1e-05, %v3167_v4  ;;  %v3024_v35 = vmul.f32 0.0078125, %v2914_v15  ;;  %v3073_v46 = vmul.f32 %v6686_v27, %v6686_v27 }
 0x2d6   : > { %3512 = vst [vmem:[%s4980_s10 + $0xd8] sm:$0xff] %v3464_v1  ;;  %v3465_v43 = vadd.f32 %v6308_v56, %v3410_v34  ;;  %v2916_v41 = vpop.xlane.xlu0 %2915 }
 0x2d7   : > { %v4654_v44 = vpop.eup %4653  ;;  %4659 = vrsqrt.f32 %v3263_v25  ;;  %v3120_v33 = vsub.f32 %v3024_v35, %v3072_v50  ;;  %v3025_v38 = vmul.f32 0.0078125, %v2916_v41  ;;  %v6978_v41 = vld [vmem:[#allocation31_spill] sm:$0xff] }
 0x2d8   : > { %3513 = vst [vmem:[%s4980_s10 + $0xe0] sm:$0xff] %v3465_v43  ;;  %v3356_v40 = vmul.f32 %v4654_v44, %v3212_v54  ;;  %v2774_v52 = vpop.xlane.xlu1 %2773  ;;  %v3216_v44 = vsub.f32 %v6978_v41, %v6676_v24  ;;  %v6983_v41 = vld [vmem:[#allocation18_spill] sm:$0xff] }
 0x2d9   : > { %v4656_v7 = vpop.eup %4655  ;;  %v3168_v0 = vmax.f32 %v3120_v33, 0.0  ;;  %v3121_v56 = vsub.f32 %v3025_v38, %v3073_v46  ;;  %v6699_v18 = vmul.f32 0.0078125, %v2774_v52 }
 0x2da   : > { %v3411_v58 = vmul.f32 %v6681_v11, %v3356_v40  ;;  %v3357_v61 = vmul.f32 %v4656_v7, %v3213_v39  ;;  %v2776_v6 = vpop.xlane.xlu0 %2775  ;;  %v3217_v39 = vsub.f32 %v6979_v26, %v6686_v27 }
 0x2db   : > { %v3264_v16 = vadd.f32 1e-05, %v3168_v0  ;;  %v3169_v28 = vmax.f32 %v3121_v56, 0.0  ;;  %v6709_v22 = vmul.f32 0.0078125, %v2776_v6  ;;  %v3074_v36 = vmul.f32 %v6699_v18, %v6699_v18 }
 0x2dc   : > { %v3466_v55 = vadd.f32 %v6705_v49, %v3411_v58  ;;  %v3412_v14 = vmul.f32 %v6681_v11, %v3357_v61  ;;  %v2918_v45 = vpop.xlane.xlu1 %2917 }
 0x2dd   : > { %4661 = vrsqrt.f32 %v3264_v16  ;;  %v3265_v12 = vadd.f32 1e-05, %v3169_v28  ;;  %v3026_v32 = vmul.f32 0.0078125, %v2918_v45  ;;  %v3075_v20 = vmul.f32 %v6709_v22, %v6709_v22 }
 0x2de   : > { %3514 = vst [vmem:[%s4980_s10 + $0xe8] sm:$0xff] %v3466_v55  ;;  %v3467_v23 = vadd.f32 %v6705_v49, %v3412_v14  ;;  %v2920_v31 = vpop.xlane.xlu0 %2919 }
 0x2df   : > { %v4658_v19 = vpop.eup %4657  ;;  %4663 = vrsqrt.f32 %v3265_v12  ;;  %v3122_v9 = vsub.f32 %v3026_v32, %v3074_v36  ;;  %v3027_v2 = vmul.f32 0.0078125, %v2920_v31  ;;  %v6980_v12 = vld [vmem:[#allocation33_spill] sm:$0xff] }
 0x2e0   : > { %3515 = vst [vmem:[%s4980_s10 + $0xf0] sm:$0xff] %v3467_v23  ;;  %v3358_v29 = vmul.f32 %v4658_v19, %v3214_v37  ;;  %v2778_v3 = vpop.xlane.xlu1 %2777  ;;  %v3218_v36 = vsub.f32 %v6980_v12, %v6699_v18  ;;  %v6981_v37 = vld [vmem:[#allocation34_spill] sm:$0xff] }
 0x2e1   : > { %v4660_v48 = vpop.eup %4659  ;;  %v3170_v17 = vmax.f32 %v3122_v9, 0.0  ;;  %v3123_v59 = vsub.f32 %v3027_v2, %v3075_v20  ;;  %v6722_v62 = vmul.f32 0.0078125, %v2778_v3  ;;  %v3219_v31 = vsub.f32 %v6981_v37, %v6709_v22 }
 0x2e2   : > { %v3413_v63 = vmul.f32 %v6681_v11, %v3358_v29  ;;  %v3359_v51 = vmul.f32 %v4660_v48, %v3215_v10  ;;  %v2780_v4 = vpop.xlane.xlu0 %2779 }
 0x2e3   : > { %v3266_v1 = vadd.f32 1e-05, %v3170_v17  ;;  %v3171_v34 = vmax.f32 %v3123_v59, 0.0  ;;  %v6727_v13 = vmul.f32 0.0078125, %v2780_v4  ;;  %v3076_v43 = vmul.f32 %v6722_v62, %v6722_v62 }
 0x2e4   : > { %v3468_v15 = vadd.f32 %v6705_v49, %v3413_v63  ;;  %v3414_v25 = vmul.f32 %v6681_v11, %v3359_v51  ;;  %v2922_v50 = vpop.xlane.xlu1 %2921 }
 0x2e5   : > { %4665 = vrsqrt.f32 %v3266_v1  ;;  %v3267_v35 = vadd.f32 1e-05, %v3171_v34  ;;  %v3028_v5 = vmul.f32 0.0078125, %v2922_v50  ;;  %v3077_v52 = vmul.f32 %v6727_v13, %v6727_v13 }
 0x2e6   : > { %3516 = vst [vmem:[%s4980_s10 + $0xf8] sm:$0xff] %v3468_v15  ;;  %v3469_v54 = vadd.f32 %v6705_v49, %v3414_v25  ;;  %v2924_v38 = vpop.xlane.xlu0 %2923  ;;  %v6982_v15 = vld [vmem:[#allocation17_spill] sm:$0xff] }
 0x2e7   : > { %v4662_v46 = vpop.eup %4661  ;;  %4667 = vrsqrt.f32 %v3267_v35  ;;  %v3124_v33 = vsub.f32 %v3028_v5, %v3076_v43  ;;  %v3029_v7 = vmul.f32 0.0078125, %v2924_v38  ;;  %v3220_v25 = vsub.f32 %v6982_v15, %v6722_v62 }
 0x2e8   : > { %3517 = vst [vmem:[%s4980_s10 + $0x100] sm:$0xff] %v3469_v54  ;;  %v3360_v40 = vmul.f32 %v4662_v46, %v3216_v44  ;;  %v3221_v44 = vsub.f32 %v6983_v41, %v6727_v13 }
 0x2e9   : > { %v4664_v0 = vpop.eup %4663  ;;  %v3172_v56 = vmax.f32 %v3124_v33, 0.0  ;;  %v3125_v24 = vsub.f32 %v3029_v7, %v3077_v52 }
 0x2ea   : > { %v3415_v58 = vmul.f32 %v6681_v11, %v3360_v40  ;;  %v3361_v61 = vmul.f32 %v4664_v0, %v3217_v39  ;;  %v2782_v16 = vpop.xlane.xlu1 %2781 }
 0x2eb   : > { %v3268_v6 = vadd.f32 1e-05, %v3172_v56  ;;  %v3173_v27 = vmax.f32 %v3125_v24, 0.0  ;;  %v6743_v14 = vmul.f32 0.0078125, %v2782_v16 }
 0x2ec   : > { %v3470_v28 = vadd.f32 %v6705_v49, %v3415_v58  ;;  %v3416_v55 = vmul.f32 %v6681_v11, %v3361_v61 }
 0x2ed   : > { %4669 = vrsqrt.f32 %v3268_v6  ;;  %v3269_v32 = vadd.f32 1e-05, %v3173_v27  ;;  %v2784_v23 = vpop.xlane.xlu0 %2783  ;;  %v3078_v2 = vmul.f32 %v6743_v14, %v6743_v14 }
 0x2ee   : > { %3518 = vst [vmem:[%s4980_s10 + $0x108] sm:$0xff] %v3470_v28  ;;  %v3471_v45 = vadd.f32 %v6705_v49, %v3416_v55  ;;  %v6751_v19 = vmul.f32 0.0078125, %v2784_v23  ;;  %v2926_v20 = vpop.xlane.xlu1 %2925  ;;  %v6984_v55 = vld [vmem:[#allocation24_spill] sm:$0xff]  ;;  %v6985_v23 = vld [vmem:[#allocation19_spill] sm:$0xff] }
 0x2ef   : > { %v4666_v60 = vpop.eup %4665  ;;  %4671 = vrsqrt.f32 %v3269_v32  ;;  %v3030_v8 = vmul.f32 0.0078125, %v2926_v20  ;;  %v3222_v27 = vsub.f32 %v6984_v55, %v6743_v14 }
 0x2f0   : > { %3519 = vst [vmem:[%s4980_s10 + $0x110] sm:$0xff] %v3471_v45  ;;  %v3362_v9 = vmul.f32 %v4666_v60, %v3218_v36  ;;  %v3079_v22 = vmul.f32 %v6751_v19, %v6751_v19  ;;  %v3223_v60 = vsub.f32 %v6985_v23, %v6751_v19 }
 0x2f1   : > { %v4668_v10 = vpop.eup %4667  ;;  %v3126_v3 = vsub.f32 %v3030_v8, %v3078_v2  ;;  %v2928_v48 = vpop.xlane.xlu0 %2927 }
 0x2f2   : > { %v3417_v18 = vmul.f32 %v6681_v11, %v3362_v9  ;;  %v3363_v29 = vmul.f32 %v4668_v10, %v3219_v31  ;;  %v3031_v17 = vmul.f32 0.0078125, %v2928_v48 }
 0x2f3   : > { %v3174_v51 = vmax.f32 %v3126_v3, 0.0 }
 0x2f4   : > { %v3472_v59 = vadd.f32 %v6705_v49, %v3417_v18  ;;  %v3418_v63 = vmul.f32 %v6681_v11, %v3363_v29  ;;  %v3127_v4 = vsub.f32 %v3031_v17, %v3079_v22 }
 0x2f5   : > { %v3270_v50 = vadd.f32 1e-05, %v3174_v51 }
 0x2f6   : > { %v2786_v1 = vpop.xlane.xlu1 %2785  ;;  %3520 = vst [vmem:[%s4980_s10 + $0x118] sm:$0xff] %v3472_v59  ;;  %v3473_v34 = vadd.f32 %v6705_v49, %v3418_v63  ;;  %v3175_v5 = vmax.f32 %v3127_v4, 0.0  ;;  %v6986_v4 = vld [vmem:[#allocation20_spill] sm:$0xff] }
 0x2f7   : > { %v2984_v35 = vmul.f32 0.0078125, %v2786_v1  ;;  %v4670_v43 = vpop.eup %4669  ;;  %4673 = vrsqrt.f32 %v3270_v50 }
 0x2f8   : > { %3521 = vst [vmem:[%s4980_s10 + $0x120] sm:$0xff] %v3473_v34  ;;  %v3364_v54 = vmul.f32 %v4670_v43, %v3220_v25  ;;  %v3271_v46 = vadd.f32 1e-05, %v3175_v5 }
 0x2f9   : > { %v4672_v38 = vpop.eup %4671  ;;  %v3080_v39 = vmul.f32 %v2984_v35, %v2984_v35  ;;  %v3224_v1 = vsub.f32 %v6986_v4, %v2984_v35 }
 0x2fa   : > { %v2930_v33 = vpop.xlane.xlu1 %2929  ;;  %v3419_v26 = vmul.f32 %v6681_v11, %v3364_v54  ;;  %v3365_v62 = vmul.f32 %v4672_v38, %v3221_v44  ;;  %4675 = vrsqrt.f32 %v3271_v46 }
 0x2fb   : > { %v3032_v40 = vmul.f32 0.0078125, %v2930_v33 }
 0x2fc   : > { %v2788_v52 = vpop.xlane.xlu0 %2787  ;;  %v3474_v7 = vadd.f32 %v6705_v49, %v3419_v26  ;;  %v3420_v58 = vmul.f32 %v6681_v11, %v3365_v62 }
 0x2fd   : > { %v2985_v0 = vmul.f32 0.0078125, %v2788_v52  ;;  %v3128_v56 = vsub.f32 %v3032_v40, %v3080_v39 }
 0x2fe   : > { %3522 = vst [vmem:[%s4980_s10 + $0x128] sm:$0xff] %v3474_v7  ;;  %v3475_v13 = vadd.f32 %v6705_v49, %v3420_v58 }
 0x2ff   : > { %v3176_v61 = vmax.f32 %v3128_v56, 0.0  ;;  %v3081_v6 = vmul.f32 %v2985_v0, %v2985_v0  ;;  %v3225_v38 = vsub.f32 %v6365_v47, %v2985_v0 }
 0x300   : > { %v2932_v24 = vpop.xlane.xlu0 %2931  ;;  %3523 = vst [vmem:[%s4980_s10 + $0x130] sm:$0xff] %v3475_v13 }
 0x301   : > { %v3272_v16 = vadd.f32 1e-05, %v3176_v61  ;;  %v3033_v28 = vmul.f32 0.0078125, %v2932_v24  ;;  %v4674_v45 = vpop.eup %4673 }
 0x302   : > { %v3366_v36 = vmul.f32 %v4674_v45, %v3222_v27 }
 0x303   : > { %4677 = vrsqrt.f32 %v3272_v16  ;;  %v3129_v12 = vsub.f32 %v3033_v28, %v3081_v6 }
 0x304   : > { %v2790_v32 = vpop.xlane.xlu1 %2789  ;;  %v4676_v9 = vpop.eup %4675  ;;  %v3421_v2 = vmul.f32 %v6681_v11, %v3366_v36 }
 0x305   : > { %v3177_v37 = vmax.f32 %v3129_v12, 0.0  ;;  %v6778_v31 = vmul.f32 0.0078125, %v2790_v32  ;;  %v3367_v10 = vmul.f32 %v4676_v9, %v3223_v60 }
 0x306   : > { %v3476_v18 = vadd.f32 %v6705_v49, %v3421_v2 }
 0x307   : > { %v3273_v14 = vadd.f32 1e-05, %v3177_v37  ;;  %v3422_v3 = vmul.f32 %v6681_v11, %v3367_v10  ;;  %v3082_v19 = vmul.f32 %v6778_v31, %v6778_v31  ;;  %v3226_v12 = vsub.f32 %v6417_v53, %v6778_v31 }
 0x308   : > { %v2792_v20 = vpop.xlane.xlu0 %2791  ;;  %v2934_v29 = vpop.xlane.xlu1 %2933  ;;  %3524 = vst [vmem:[%s4980_s10 + $0x138] sm:$0xff] %v3476_v18 }
 0x309   : > { %v6781_v8 = vmul.f32 0.0078125, %v2792_v20  ;;  %4679 = vrsqrt.f32 %v3273_v14  ;;  %v3034_v48 = vmul.f32 0.0078125, %v2934_v29  ;;  %v3477_v63 = vadd.f32 %v6705_v49, %v3422_v3 }
 0x30b   : > { %v3083_v17 = vmul.f32 %v6781_v8, %v6781_v8  ;;  %v3130_v51 = vsub.f32 %v3034_v48, %v3082_v19  ;;  %3525 = vst [vmem:[%s4980_s10 + $0x140] sm:$0xff] %v3477_v63  ;;  %v3227_v60 = vsub.f32 %v6423_v30, %v6781_v8 }
 0x30c   : > { %v2936_v22 = vpop.xlane.xlu0 %2935 }
 0x30d   : > { %v3035_v59 = vmul.f32 0.0078125, %v2936_v22  ;;  %v4678_v15 = vpop.eup %4677  ;;  %v3178_v25 = vmax.f32 %v3130_v51, 0.0 }
 0x30e   : > { %v2794_v50 = vpop.xlane.xlu1 %2793  ;;  %v3368_v43 = vmul.f32 %v4678_v15, %v3224_v1 }
 0x30f   : > { %v3131_v34 = vsub.f32 %v3035_v59, %v3083_v17  ;;  %v2988_v54 = vmul.f32 0.0078125, %v2794_v50  ;;  %v3274_v41 = vadd.f32 1e-05, %v3178_v25 }
 0x310   : > { %v3423_v44 = vmul.f32 %v6681_v11, %v3368_v43 }
 0x311   : > { %v3179_v5 = vmax.f32 %v3131_v34, 0.0  ;;  %v2796_v33 = vpop.xlane.xlu0 %2795  ;;  %4681 = vrsqrt.f32 %v3274_v41  ;;  %v3084_v40 = vmul.f32 %v2988_v54, %v2988_v54  ;;  %v3228_v30 = vsub.f32 %v6461_v42, %v2988_v54 }
 0x312   : > { %v2989_v26 = vmul.f32 0.0078125, %v2796_v33  ;;  %v2938_v39 = vpop.xlane.xlu1 %2937  ;;  %v3478_v35 = vadd.f32 %v6705_v49, %v3423_v44 }
 0x313   : > { %v3275_v46 = vadd.f32 1e-05, %v3179_v5  ;;  %v3036_v62 = vmul.f32 0.0078125, %v2938_v39  ;;  %v4680_v52 = vpop.eup %4679 }
 0x314   : > { %3526 = vst [vmem:[%s4980_s10 + $0x148] sm:$0xff] %v3478_v35  ;;  %v3369_v7 = vmul.f32 %v4680_v52, %v3225_v38  ;;  %v3085_v61 = vmul.f32 %v2989_v26, %v2989_v26  ;;  %v3229_v48 = vsub.f32 %v6475_v57, %v2989_v26 }
 0x315   : > { %4683 = vrsqrt.f32 %v3275_v46  ;;  %v3132_v56 = vsub.f32 %v3036_v62, %v3084_v40  ;;  %v2940_v58 = vpop.xlane.xlu0 %2939 }
 0x316   : > { %v3037_v13 = vmul.f32 0.0078125, %v2940_v58  ;;  %v2798_v24 = vpop.xlane.xlu1 %2797  ;;  %v3424_v6 = vmul.f32 %v6681_v11, %v3369_v7 }
 0x317   : > { %v3180_v47 = vmax.f32 %v3132_v56, 0.0  ;;  %v2990_v0 = vmul.f32 0.0078125, %v2798_v24 }
 0x318   : > { %v3133_v16 = vsub.f32 %v3037_v13, %v3085_v61  ;;  %v3479_v28 = vadd.f32 %v6705_v49, %v3424_v6 }
 0x319   : > { %v3276_v55 = vadd.f32 1e-05, %v3180_v47  ;;  %v3086_v36 = vmul.f32 %v2990_v0, %v2990_v0  ;;  %v3230_v4 = vsub.f32 %v6489_v21, %v2990_v0 }
 0x31a   : > { %v3181_v27 = vmax.f32 %v3133_v16, 0.0  ;;  %v2942_v45 = vpop.xlane.xlu1 %2941  ;;  %3527 = vst [vmem:[%s4980_s10 + $0x150] sm:$0xff] %v3479_v28 }
 0x31b   : > { %4685 = vrsqrt.f32 %v3276_v55  ;;  %v3038_v32 = vmul.f32 0.0078125, %v2942_v45  ;;  %v4682_v23 = vpop.eup %4681 }
 0x31c   : > { %v3277_v37 = vadd.f32 1e-05, %v3181_v27  ;;  %v3370_v9 = vmul.f32 %v4682_v23, %v3226_v12 }
 0x31d   : > { %v3134_v2 = vsub.f32 %v3038_v32, %v3086_v36 }
 0x31e   : > { %4687 = vrsqrt.f32 %v3277_v37  ;;  %v3425_v14 = vmul.f32 %v6681_v11, %v3370_v9 }
 0x31f   : > { %v4684_v20 = vpop.eup %4683  ;;  %v3182_v18 = vmax.f32 %v3134_v2, 0.0 }
 0x320   : > { %v3371_v10 = vmul.f32 %v4684_v20, %v3227_v60  ;;  %v3480_v31 = vadd.f32 %v6705_v49, %v3425_v14 }
 0x321   : > { %v3278_v29 = vadd.f32 1e-05, %v3182_v18 }
 0x322   : > { %v3426_v53 = vmul.f32 %v6681_v11, %v3371_v10  ;;  %3528 = vst [vmem:[%s4980_s10 + $0x158] sm:$0xff] %v3480_v31 }
 0x323   : > { %4689 = vrsqrt.f32 %v3278_v29 }
 0x324   : > { %v3481_v3 = vadd.f32 %v6705_v49, %v3426_v53 }
 0x325   : > { %v4686_v8 = vpop.eup %4685 }
 0x326   : > { %3529 = vst [vmem:[%s4980_s10 + $0x160] sm:$0xff] %v3481_v3  ;;  %v3372_v19 = vmul.f32 %v4686_v8, %v3228_v30 }
 0x328   : > { %v4688_v22 = vpop.eup %4687  ;;  %v3427_v17 = vmul.f32 %v6681_v11, %v3372_v19 }
 0x329   : > { %v3373_v59 = vmul.f32 %v4688_v22, %v3229_v48 }
 0x32a   : > { %v3482_v63 = vadd.f32 %v6705_v49, %v3427_v17 }
 0x32b   : > { %v3428_v51 = vmul.f32 %v6681_v11, %v3373_v59 }
 0x32c   : > { %3530 = vst [vmem:[%s4980_s10 + $0x168] sm:$0xff] %v3482_v63 }
 0x32d   : > { %v4690_v42 = vpop.eup %4689  ;;  %v3483_v1 = vadd.f32 %v6705_v49, %v3428_v51 }
 0x32e   : > { %v3374_v34 = vmul.f32 %v4690_v42, %v3230_v4 }
 0x32f   : > { %3531 = vst [vmem:[%s4980_s10 + $0x170] sm:$0xff] %v3483_v1 }
 0x330   : > { %v3429_v57 = vmul.f32 %v6681_v11, %v3374_v34 }
 0x332   : > { %v3484_v15 = vadd.f32 %v6705_v49, %v3429_v57 }
 0x334   : > { %3532 = vst [vmem:[%s4980_s10 + $0x178] sm:$0xff] %v3484_v15 }
 0x335   : > { %4759 = shalt.err (!%p4756_p1)
}
 0x336   : > { %s4760_s13 = scalar_lea.hbm %s6826_s17, 6144  ;;  %s4764_s29 = scalar_lea.hbm %s6885_s5, 12288 }
 0x337   : > { %p4761_p3 = scmp.ne.s32.totalorder %s6826_s17, %s4760_s13  ;;  %p4765_p7 = scmp.lt.u32.totalorder %s6826_s17, %s6885_s5 }
 0x338   : > { %p4766_p9 = scmp.lt.u32.totalorder %s4764_s29, %s4760_s13  ;;  %p4768_p0 = scmp.lt.u32.totalorder %s4760_s13, %s6826_s17 }
 0x339   : > { %p4762_p5 = pnand %p4761_p3, %p6987_p2 }
 0x33a   : > { %p4767_p12 = por %p4766_p9, %p4765_p7 }
 0x33b   : > { %p4763_p6 = pneg %p4762_p5 }
 0x33c   : > { %p4769_p4 = por %p4768_p0, %p4767_p12 }
 0x33e   : > { %p4770_p8 = pnand %p4769_p4, %p4763_p6 }
 0x340   : > { %4773 = shalt.err (!%p4770_p8)
}
 0x341   : > { %s4840_s15 = smov 128   ;;  %s4841_s7 = smov 8  }
 0x342   : > { %4525 = dma.vmem_to_hbm [thread:$0]  (%p6987_p2), %s6829_s11, 6144, %s6826_s17, %s6834_s24, %s4840_s15, %s4840_s15, %s4841_s7  }
 0x343 PF: > { %p4537_p10 = scmp.ge.s32.totalorder %s4830_s23, 2  ;;  %s3564_s16 = sand.u32 1, %s4810_s18  }
 0x344   : > { %p6988_p11 = scmp.ne.s32.totalorder %s6912_s30, 0  ;;  %s3565_s8 = scalar_lea.sflag [#allocation7], %s3564_s16 }
 0x346   : > { %p4532_p13 = pnand %p4537_p10, %p6988_p11 }
 0x348   : > { %4805 = dma.done.wait (!%p4532_p13), %s3565_s8, 6144  }
 0x349   : > { %4807 = vsyncadd (!%p4532_p13), %s3565_s8, 4294961152  ;;  %s19_s23 = sadd.s32 1, %s4830_s23   ;;  %s6989_s18 = smov %s4814_s19 }
 0x34a   : > { %p16_p1 = scmp.ge.s32.totalorder %s19_s23, 4   ;;  %s6990_s19 = smov %s4818_s20 }
 0x34b   : > { %s6991_s20 = smov %s4925_s6  ;;  %s6992_s21 = smov %s4826_s22 }
 0x34c   : > { %s6993_s22 = smov %s6995_s26  ;;  %18 = sbr.rel (!%p16_p1) target bundleno = 5 (0x5), region = 91 }
 0x353   :  { %3570 = vsyncpa [#allocation6], 1 }
 0x354   :  { %3572 = vsyncpa [#allocation6 + $0x1], 1 }
 0x355   :  { %3573 = vsyncpa [#allocation7], 1 }
 0x356   :  { %3575 = vsyncpa [#allocation7 + $0x1], 1 }
 0x357   :  { %3576 = vsyncmov [#allocation4] }
 0x35a   :  { %s3577_s28 = vpop.sfrf %3576 }
 0x35b   :  { %p3692_p2 = scmp.ne.s32.totalorder %s3577_s28, 0 }
 0x35d   :  { %3581 = shalt.err (%p3692_p2)  }
 0x35e   :  { %3583 = vsyncmov [#allocation4 + $0x1] }
 0x361   :  { %s3584_s30 = vpop.sfrf %3583 }
 0x362   :  { %p3693_p3 = scmp.ne.s32.totalorder %s3584_s30, 0 }
 0x364   :  { %3588 = shalt.err (%p3693_p3)  }
 0x365   :  { %3590 = vsyncmov [#allocation4 + $0x2] }
 0x368   :  { %s3591_s6 = vpop.sfrf %3590 }
 0x369   :  { %p3694_p5 = scmp.ne.s32.totalorder %s3591_s6, 0 }
 0x36b   :  { %3595 = shalt.err (%p3694_p5)  }
 0x36c   :  { %3597 = vsyncmov [#allocation4 + $0x3] }
 0x36f   :  { %s3598_s26 = vpop.sfrf %3597 }
 0x370   :  { %p3695_p6 = scmp.ne.s32.totalorder %s3598_s26, 0 }
 0x372   :  { %3602 = shalt.err (%p3695_p6)  }
 0x373   :  { %3604 = vsyncmov [#allocation4 + $0x4] }
 0x376   :  { %s3605_s0 = vpop.sfrf %3604 }
 0x377   :  { %p3696_p7 = scmp.ne.s32.totalorder %s3605_s0, 0 }
 0x379   :  { %3609 = shalt.err (%p3696_p7)  }
 0x37a   :  { %3611 = vsyncmov [#allocation4 + $0x5] }
 0x37d   :  { %s3612_s1 = vpop.sfrf %3611 }
 0x37e   :  { %p3697_p9 = scmp.ne.s32.totalorder %s3612_s1, 0 }
 0x380   :  { %3616 = shalt.err (%p3697_p9)  }

</bundles_post_ra>
